<compile_context>
chip_gen: v6e
topology: v6e:2x2x1
jax: 0.10.0
libtpu: 0.0.40
codegen_flags: <defaults>
</compile_context>

<pallas_src>
import functools

import jax
import jax.numpy as jnp
import numpy as np
from jax import lax
from jax.experimental import pallas as pl
from jax.experimental.pallas import tpu as pltpu

DILATIONS = (6, 12, 18)


# ----------------------------- Pallas kernel --------------------------------
def _aspp_kernel(xw_ref, w2_ref, w3_ref, w4_ref, w5_ref, wout_ref,
                 s2_ref, b2_ref, s3_ref, b3_ref, s4_ref, b4_ref,
                 s5_ref, b5_ref, sout_ref, bout_ref, o_ref, *, W, PAD):
    T = o_ref.shape[-1]                     # spatial tile (lane dim)
    t = pl.program_id(1)

    # global column index (0..W-1) of every output position in this spatial tile
    col = (t * T + lax.broadcasted_iota(jnp.int32, (1, T), 1)) % W

    def bn_relu(z, s_ref, b_ref):           # folded eval-mode BN + ReLU, f32
        return jnp.maximum(z * s_ref[...] + b_ref[...], 0.0)

    # ---- conv2: 1x1 conv -----------------------------------------------------
    x_c = xw_ref[:, pl.ds(PAD, T)]                                   # (Cin, T) bf16
    y2 = bn_relu(jnp.dot(w2_ref[...], x_c, preferred_element_type=jnp.float32),
                 s2_ref, b2_ref)                                     # (Cout, T) f32

    # ---- conv3/4/5: dilated 3x3 convs as 9 shifted K=Cin matmuls each ---------
    def dilated(w_ref, s_ref, b_ref, d):
        acc = None
        for kh in range(3):
            for kw in range(3):
                off = (kh - 1) * d * W + (kw - 1) * d                # static flat shift
                sl = xw_ref[:, pl.ds(PAD + off, T)]                  # (Cin, T) bf16
                dw = (kw - 1) * d
                if dw != 0:                                          # mask row wrap-around
                    valid = jnp.logical_and(col + dw >= 0, col + dw < W)
                    sl = jnp.where(valid, sl, jnp.zeros_like(sl))
                z = jnp.dot(w_ref[kh * 3 + kw], sl,
                            preferred_element_type=jnp.float32)
                acc = z if acc is None else acc + z
        return bn_relu(acc, s_ref, b_ref)

    y3 = dilated(w3_ref, s3_ref, b3_ref, DILATIONS[0])
    y4 = dilated(w4_ref, s4_ref, b4_ref, DILATIONS[1])
    y5 = dilated(w5_ref, s5_ref, b5_ref, DILATIONS[2])

    # ---- output 1x1 conv over concat([y2..y5]): one K=4*Cout matmul -----------
    ycat = jnp.concatenate([y2, y3, y4, y5], axis=0).astype(jnp.bfloat16)
    z = jnp.dot(wout_ref[...], ycat, preferred_element_type=jnp.float32)  # (Cout, T)
    # bout_ref already folds in the (spatially constant) pooled branch.
    o_ref[...] = jnp.maximum(z * sout_ref[...] + bout_ref[...], 0.0)


# ------------------------------ JAX wrapper ----------------------------------
def _pick_tile(hw):
    for t in (1024, 512, 256, 128):
        if hw % t == 0:
            return t
    return hw


def aspp_forward(x_nchw, params):
    x = x_nchw.astype(jnp.float32)                 # stays channels-first (no transpose)
    N, Cin, H, W = x.shape
    HW = H * W
    Cout = params["w2"].shape[1]

    d_max = max(DILATIONS)
    PAD = d_max * (W + 1)                          # covers the largest flat shift d*(W+1)
    T = _pick_tile(HW)
    nt = HW // T
    WIN = T + 2 * PAD

    x_flat = x.reshape(N, Cin, HW)

    # ---- pooled branch hoisted (needs full-image mean); folded into out-BN shift
    xm = jnp.mean(x_flat, axis=2)                                        # (N, Cin)
    y1 = jnp.maximum(xm @ params["w1"] * params["s1"] + params["b1"], 0.0)
    z1 = y1 @ params["wout"][:Cout, :]                                   # (N, Cout)
    bout_eff = (params["bout"] + params["sout"] * z1)[:, :, None]        # (N, Cout, 1)
    bout_eff = bout_eff.astype(jnp.float32)

    # ---- zero-pad flat spatial axis; per-tile windows with halo (bf16) --------
    xp = jnp.pad(x_flat, ((0, 0), (0, 0), (PAD, PAD))).astype(jnp.bfloat16)
    xw = jnp.stack([xp[:, :, i * T:i * T + WIN] for i in range(nt)], axis=1)
    # xw: (N, nt, Cin, WIN)

    # ---- weights, channels-first, bf16 ----------------------------------------
    w2T = params["w2"].T.astype(jnp.bfloat16)                            # (Cout, Cin)

    def conv_w(w):  # (3,3,Cin,Cout) -> (9, Cout, Cin), tap-major (kh*3+kw)
        return jnp.transpose(w.reshape(9, Cin, Cout), (0, 2, 1)).astype(jnp.bfloat16)

    w3r, w4r, w5r = (conv_w(params[k]) for k in ("w3", "w4", "w5"))
    woutT = params["wout"][Cout:, :].T.astype(jnp.bfloat16)              # (Cout, 4*Cout)

    def cs(p):      # (1, Cout) -> (Cout, 1) f32 column for channels-first broadcast
        return p.reshape(Cout, 1).astype(jnp.float32)

    bn = [cs(params[k]) for k in ("s2", "b2", "s3", "b3", "s4", "b4", "s5", "b5", "sout")]

    def full(a):
        return pl.BlockSpec(a.shape, lambda n, t: (0,) * a.ndim)

    in_specs = ([pl.BlockSpec((None, None, Cin, WIN), lambda n, t: (n, t, 0, 0))]
                + [full(w2T), full(w3r), full(w4r), full(w5r), full(woutT)]
                + [full(p) for p in bn]
                + [pl.BlockSpec((None, Cout, 1), lambda n, t: (n, 0, 0))])

    out = pl.pallas_call(
        functools.partial(_aspp_kernel, W=W, PAD=PAD),
        out_shape=jax.ShapeDtypeStruct((N, Cout, HW), jnp.float32),
        grid=(N, nt),
        in_specs=in_specs,
        out_specs=pl.BlockSpec((None, Cout, T), lambda n, t: (n, 0, t)),
        compiler_params=pltpu.CompilerParams(
            dimension_semantics=("parallel", "parallel"),
            vmem_limit_bytes=32 * 1024 * 1024),
    )(xw, w2T, w3r, w4r, w5r, woutT, *bn, bout_eff)

    return out.reshape(N, Cout, H, W)


# ------------------------ deterministic parameters ---------------------------
def init_params(key, in_channels, out_channels):
    ks = jax.random.split(key, 30)
    p = {}

    def bn_fold(kg, kb, km, kv):
        gamma = jax.random.uniform(kg, (1, out_channels), minval=0.5, maxval=1.5)
        beta = 0.1 * jax.random.normal(kb, (1, out_channels))
        mean = 0.1 * jax.random.normal(km, (1, out_channels))
        var = jax.random.uniform(kv, (1, out_channels), minval=0.5, maxval=1.5)
        eps = 1e-5
        scale = gamma / jnp.sqrt(var + eps)
        shift = beta - mean * scale
        return scale.astype(jnp.float32), shift.astype(jnp.float32)

    p["w1"] = 0.1 * jax.random.normal(ks[0], (in_channels, out_channels), jnp.float32)
    p["w2"] = 0.1 * jax.random.normal(ks[1], (in_channels, out_channels), jnp.float32)
    p["w3"] = 0.1 * jax.random.normal(ks[2], (3, 3, in_channels, out_channels), jnp.float32)
    p["w4"] = 0.1 * jax.random.normal(ks[3], (3, 3, in_channels, out_channels), jnp.float32)
    p["w5"] = 0.1 * jax.random.normal(ks[4], (3, 3, in_channels, out_channels), jnp.float32)
    p["wout"] = 0.1 * jax.random.normal(ks[5], (5 * out_channels, out_channels), jnp.float32)

    for i, name in enumerate(["1", "2", "3", "4", "5", "out"]):
        s, b = bn_fold(ks[6 + 4 * i], ks[7 + 4 * i], ks[8 + 4 * i], ks[9 + 4 * i])
        p["s" + name] = s
        p["b" + name] = b
    return p


# --------------------------- pure-JAX reference ------------------------------
def aspp_reference(x_nchw, params):
    x = jnp.transpose(x_nchw, (0, 2, 3, 1)).astype(jnp.float32)
    N, H, W, _ = x.shape

    def bnrelu(v, s, b):
        return jnp.maximum(v * s + b, 0.0)

    pooled = jnp.mean(x, axis=(1, 2), keepdims=True)
    y1 = bnrelu(jnp.einsum("nhwc,cd->nhwd", pooled, params["w1"]), params["s1"], params["b1"])
    y1 = jnp.broadcast_to(y1, (N, H, W, y1.shape[-1]))
    y2 = bnrelu(jnp.einsum("nhwc,cd->nhwd", x, params["w2"]), params["s2"], params["b2"])

    def dil(w, d, s, b):
        z = jax.lax.conv_general_dilated(
            x, w, (1, 1), ((d, d), (d, d)), rhs_dilation=(d, d),
            dimension_numbers=("NHWC", "HWIO", "NHWC"))
        return bnrelu(z, s, b)

    y3 = dil(params["w3"], 6, params["s3"], params["b3"])
    y4 = dil(params["w4"], 12, params["s4"], params["b4"])
    y5 = dil(params["w5"], 18, params["s5"], params["b5"])
    y = jnp.concatenate([y1, y2, y3, y4, y5], axis=-1)
    out = bnrelu(jnp.einsum("nhwc,cd->nhwd", y, params["wout"]), params["sout"], params["bout"])
    return jnp.transpose(out, (0, 3, 1, 2))


# --------------------------------- main --------------------------------------
if __name__ == "__main__":
    N, Cin, H, W = 2, 8, 16, 16
    Cout = 64

    key = jax.random.PRNGKey(0)
    kx, kp = jax.random.split(key)
    x = jax.random.normal(kx, (N, Cin, H, W), jnp.float32)           # NCHW like PyTorch
    params = init_params(kp, Cin, Cout)

    out = jax.block_until_ready(aspp_forward(x, params))
    ref = jax.block_until_ready(aspp_reference(x, params))

    assert out.shape == (N, Cout, H, W), out.shape
    # bf16 activations/weights (f32 accumulation) -> looser tolerance than pure f32.
    np.testing.assert_allclose(np.asarray(out), np.asarray(ref), rtol=3e-2, atol=3e-2)
    print("KERNEL_OK")
</pallas_src>

<mosaic_0001>
module attributes {stable_mosaic.version = 11 : i64} {
  func.func @_aspp_kernel(%arg0: i32, %arg1: i32, %arg2: memref<1x1x8x868xbf16, #tpu.memory_space<vmem>>, %arg3: memref<64x8xbf16, #tpu.memory_space<vmem>>, %arg4: memref<9x64x8xbf16, #tpu.memory_space<vmem>>, %arg5: memref<9x64x8xbf16, #tpu.memory_space<vmem>>, %arg6: memref<9x64x8xbf16, #tpu.memory_space<vmem>>, %arg7: memref<64x256xbf16, #tpu.memory_space<vmem>>, %arg8: memref<64x1xf32, #tpu.memory_space<vmem>>, %arg9: memref<64x1xf32, #tpu.memory_space<vmem>>, %arg10: memref<64x1xf32, #tpu.memory_space<vmem>>, %arg11: memref<64x1xf32, #tpu.memory_space<vmem>>, %arg12: memref<64x1xf32, #tpu.memory_space<vmem>>, %arg13: memref<64x1xf32, #tpu.memory_space<vmem>>, %arg14: memref<64x1xf32, #tpu.memory_space<vmem>>, %arg15: memref<64x1xf32, #tpu.memory_space<vmem>>, %arg16: memref<64x1xf32, #tpu.memory_space<vmem>>, %arg17: memref<1x64x1xf32, #tpu.memory_space<vmem>>, %arg18: memref<1x64x256xf32, #tpu.memory_space<vmem>>) attributes {dimension_semantics = [#tpu.dimension_semantics<parallel>, #tpu.dimension_semantics<parallel>], iteration_bounds = array<i64: 2, 1>, scalar_prefetch = 0 : i64, scratch_operands = 0 : i64, tpu.core_type = #tpu.core_type<tc>, window_params = [{transform_indices = @transform_0, window_bounds = array<i64: 1, 1, 8, 868>}, {pipeline_mode = #tpu.pipeline_mode<synchronous>, transform_indices = @transform_1, window_bounds = array<i64: 64, 8>}, {pipeline_mode = #tpu.pipeline_mode<synchronous>, transform_indices = @transform_2, window_bounds = array<i64: 9, 64, 8>}, {pipeline_mode = #tpu.pipeline_mode<synchronous>, transform_indices = @transform_3, window_bounds = array<i64: 9, 64, 8>}, {pipeline_mode = #tpu.pipeline_mode<synchronous>, transform_indices = @transform_4, window_bounds = array<i64: 9, 64, 8>}, {pipeline_mode = #tpu.pipeline_mode<synchronous>, transform_indices = @transform_5, window_bounds = array<i64: 64, 256>}, {pipeline_mode = #tpu.pipeline_mode<synchronous>, transform_indices = @transform_6, window_bounds = array<i64: 64, 1>}, {pipeline_mode = #tpu.pipeline_mode<synchronous>, transform_indices = @transform_7, window_bounds = array<i64: 64, 1>}, {pipeline_mode = #tpu.pipeline_mode<synchronous>, transform_indices = @transform_8, window_bounds = array<i64: 64, 1>}, {pipeline_mode = #tpu.pipeline_mode<synchronous>, transform_indices = @transform_9, window_bounds = array<i64: 64, 1>}, {pipeline_mode = #tpu.pipeline_mode<synchronous>, transform_indices = @transform_10, window_bounds = array<i64: 64, 1>}, {pipeline_mode = #tpu.pipeline_mode<synchronous>, transform_indices = @transform_11, window_bounds = array<i64: 64, 1>}, {pipeline_mode = #tpu.pipeline_mode<synchronous>, transform_indices = @transform_12, window_bounds = array<i64: 64, 1>}, {pipeline_mode = #tpu.pipeline_mode<synchronous>, transform_indices = @transform_13, window_bounds = array<i64: 64, 1>}, {pipeline_mode = #tpu.pipeline_mode<synchronous>, transform_indices = @transform_14, window_bounds = array<i64: 64, 1>}, {transform_indices = @transform_15, window_bounds = array<i64: 1, 64, 1>}, {transform_indices = @transform_16, window_bounds = array<i64: 1, 64, 256>}]} {
    %c256_i32 = arith.constant 256 : i32
    %0 = arith.muli %arg1, %c256_i32 : i32
    %1 = tpu.iota {dimensions = array<i32: 1>} : vector<1x256xi32>
    %2 = vector.broadcast %0 : i32 to vector<1x256xi32>
    %3 = arith.addi %2, %1 : vector<1x256xi32>
    %c16_i32 = arith.constant 16 : i32
    %c0_i32 = arith.constant 0 : i32
    %4 = arith.cmpi eq, %c16_i32, %c0_i32 : i32
    %c1_i32 = arith.constant 1 : i32
    %5 = arith.select %4, %c1_i32, %c16_i32 : i32
    %6 = vector.broadcast %5 : i32 to vector<1x256xi32>
    %7 = arith.remsi %3, %6 : vector<1x256xi32>
    %c0_i32_0 = arith.constant 0 : i32
    %8 = vector.broadcast %c0_i32_0 : i32 to vector<1x256xi32>
    %9 = arith.cmpi ne, %7, %8 : vector<1x256xi32>
    %c0_i32_1 = arith.constant 0 : i32
    %10 = vector.broadcast %c0_i32_1 : i32 to vector<1x256xi32>
    %11 = arith.cmpi slt, %7, %10 : vector<1x256xi32>
    %c0_i32_2 = arith.constant 0 : i32
    %12 = arith.cmpi slt, %5, %c0_i32_2 : i32
    %13 = vector.broadcast %12 : i1 to vector<1x256xi1>
    %14 = vector.broadcast %13 : vector<1x256xi1> to vector<1x256xi1>
    %15 = arith.xori %11, %14 : vector<1x256xi1>
    %16 = arith.andi %15, %9 : vector<1x256xi1>
    %17 = vector.broadcast %5 : i32 to vector<1x256xi32>
    %18 = arith.addi %7, %17 : vector<1x256xi32>
    %19 = arith.select %16, %18, %7 : vector<1x256xi1>, vector<1x256xi32>
    %c0 = arith.constant 0 : index
    %c0_3 = arith.constant 0 : index
    %c0_4 = arith.constant 0 : index
    %c306 = arith.constant 306 : index
    %20 = vector.load %arg2[%c0, %c0_3, %c0_4, %c306] : memref<1x1x8x868xbf16, #tpu.memory_space<vmem>>, vector<1x1x8x256xbf16>
    %21 = vector.shape_cast %20 : vector<1x1x8x256xbf16> to vector<8x256xbf16>
    %c0_5 = arith.constant 0 : index
    %c0_6 = arith.constant 0 : index
    %22 = vector.load %arg3[%c0_5, %c0_6] : memref<64x8xbf16, #tpu.memory_space<vmem>>, vector<64x8xbf16>
    %cst = arith.constant dense<0.000000e+00> : vector<64x256xf32>
    %23 = tpu.matmul %22, %21, %cst {dimension_numbers = #tpu.dot_dimension_numbers<[1], [0], [0], [1], [0, 0, 1, 1], [], []>} : vector<64x8xbf16>, vector<8x256xbf16>, vector<64x256xf32> -> vector<64x256xf32>
    %c0_7 = arith.constant 0 : index
    %c0_8 = arith.constant 0 : index
    %24 = vector.load %arg8[%c0_7, %c0_8] : memref<64x1xf32, #tpu.memory_space<vmem>>, vector<64x1xf32>
    %25 = vector.broadcast %24 : vector<64x1xf32> to vector<64x256xf32>
    %26 = arith.mulf %23, %25 : vector<64x256xf32>
    %c0_9 = arith.constant 0 : index
    %c0_10 = arith.constant 0 : index
    %27 = vector.load %arg9[%c0_9, %c0_10] : memref<64x1xf32, #tpu.memory_space<vmem>>, vector<64x1xf32>
    %28 = vector.broadcast %27 : vector<64x1xf32> to vector<64x256xf32>
    %29 = arith.addf %26, %28 : vector<64x256xf32>
    %cst_11 = arith.constant 0.000000e+00 : f32
    %30 = vector.broadcast %cst_11 : f32 to vector<64x256xf32>
    %31 = arith.maximumf %29, %30 : vector<64x256xf32>
    %c0_12 = arith.constant 0 : index
    %c0_13 = arith.constant 0 : index
    %c0_14 = arith.constant 0 : index
    %c204 = arith.constant 204 : index
    %32 = vector.load %arg2[%c0_12, %c0_13, %c0_14, %c204] : memref<1x1x8x868xbf16, #tpu.memory_space<vmem>>, vector<1x1x8x256xbf16>
    %33 = vector.shape_cast %32 : vector<1x1x8x256xbf16> to vector<8x256xbf16>
    %c-6_i32 = arith.constant -6 : i32
    %34 = vector.broadcast %c-6_i32 : i32 to vector<1x256xi32>
    %35 = arith.addi %19, %34 : vector<1x256xi32>
    %c0_i32_15 = arith.constant 0 : i32
    %36 = vector.broadcast %c0_i32_15 : i32 to vector<1x256xi32>
    %37 = arith.cmpi sge, %35, %36 : vector<1x256xi32>
    %c-6_i32_16 = arith.constant -6 : i32
    %38 = vector.broadcast %c-6_i32_16 : i32 to vector<1x256xi32>
    %39 = arith.addi %19, %38 : vector<1x256xi32>
    %c16_i32_17 = arith.constant 16 : i32
    %40 = vector.broadcast %c16_i32_17 : i32 to vector<1x256xi32>
    %41 = arith.cmpi slt, %39, %40 : vector<1x256xi32>
    %42 = arith.andi %37, %41 : vector<1x256xi1>
    %cst_18 = arith.constant 0.000000e+00 : bf16
    %43 = vector.broadcast %cst_18 : bf16 to vector<8x256xbf16>
    %44 = vector.shape_cast %42 : vector<1x256xi1> to vector<1x256xi1>
    %45 = vector.broadcast %44 : vector<1x256xi1> to vector<8x256xi1>
    %46 = arith.select %45, %33, %43 : vector<8x256xi1>, vector<8x256xbf16>
    %c0_19 = arith.constant 0 : index
    %c0_20 = arith.constant 0 : index
    %c0_21 = arith.constant 0 : index
    %47 = vector.load %arg4[%c0_19, %c0_20, %c0_21] : memref<9x64x8xbf16, #tpu.memory_space<vmem>>, vector<1x64x8xbf16>
    %48 = vector.shape_cast %47 : vector<1x64x8xbf16> to vector<64x8xbf16>
    %cst_22 = arith.constant dense<0.000000e+00> : vector<64x256xf32>
    %49 = tpu.matmul %48, %46, %cst_22 {dimension_numbers = #tpu.dot_dimension_numbers<[1], [0], [0], [1], [0, 0, 1, 1], [], []>} : vector<64x8xbf16>, vector<8x256xbf16>, vector<64x256xf32> -> vector<64x256xf32>
    %c0_23 = arith.constant 0 : index
    %c0_24 = arith.constant 0 : index
    %c0_25 = arith.constant 0 : index
    %c210 = arith.constant 210 : index
    %50 = vector.load %arg2[%c0_23, %c0_24, %c0_25, %c210] : memref<1x1x8x868xbf16, #tpu.memory_space<vmem>>, vector<1x1x8x256xbf16>
    %51 = vector.shape_cast %50 : vector<1x1x8x256xbf16> to vector<8x256xbf16>
    %c1 = arith.constant 1 : index
    %c0_26 = arith.constant 0 : index
    %c0_27 = arith.constant 0 : index
    %52 = vector.load %arg4[%c1, %c0_26, %c0_27] : memref<9x64x8xbf16, #tpu.memory_space<vmem>>, vector<1x64x8xbf16>
    %53 = vector.shape_cast %52 : vector<1x64x8xbf16> to vector<64x8xbf16>
    %cst_28 = arith.constant dense<0.000000e+00> : vector<64x256xf32>
    %54 = tpu.matmul %53, %51, %cst_28 {dimension_numbers = #tpu.dot_dimension_numbers<[1], [0], [0], [1], [0, 0, 1, 1], [], []>} : vector<64x8xbf16>, vector<8x256xbf16>, vector<64x256xf32> -> vector<64x256xf32>
    %55 = arith.addf %49, %54 : vector<64x256xf32>
    %c0_29 = arith.constant 0 : index
    %c0_30 = arith.constant 0 : index
    %c0_31 = arith.constant 0 : index
    %c216 = arith.constant 216 : index
    %56 = vector.load %arg2[%c0_29, %c0_30, %c0_31, %c216] : memref<1x1x8x868xbf16, #tpu.memory_space<vmem>>, vector<1x1x8x256xbf16>
    %57 = vector.shape_cast %56 : vector<1x1x8x256xbf16> to vector<8x256xbf16>
    %c6_i32 = arith.constant 6 : i32
    %58 = vector.broadcast %c6_i32 : i32 to vector<1x256xi32>
    %59 = arith.addi %19, %58 : vector<1x256xi32>
    %c0_i32_32 = arith.constant 0 : i32
    %60 = vector.broadcast %c0_i32_32 : i32 to vector<1x256xi32>
    %61 = arith.cmpi sge, %59, %60 : vector<1x256xi32>
    %c6_i32_33 = arith.constant 6 : i32
    %62 = vector.broadcast %c6_i32_33 : i32 to vector<1x256xi32>
    %63 = arith.addi %19, %62 : vector<1x256xi32>
    %c16_i32_34 = arith.constant 16 : i32
    %64 = vector.broadcast %c16_i32_34 : i32 to vector<1x256xi32>
    %65 = arith.cmpi slt, %63, %64 : vector<1x256xi32>
    %66 = arith.andi %61, %65 : vector<1x256xi1>
    %cst_35 = arith.constant 0.000000e+00 : bf16
    %67 = vector.broadcast %cst_35 : bf16 to vector<8x256xbf16>
    %68 = vector.shape_cast %66 : vector<1x256xi1> to vector<1x256xi1>
    %69 = vector.broadcast %68 : vector<1x256xi1> to vector<8x256xi1>
    %70 = arith.select %69, %57, %67 : vector<8x256xi1>, vector<8x256xbf16>
    %c2 = arith.constant 2 : index
    %c0_36 = arith.constant 0 : index
    %c0_37 = arith.constant 0 : index
    %71 = vector.load %arg4[%c2, %c0_36, %c0_37] : memref<9x64x8xbf16, #tpu.memory_space<vmem>>, vector<1x64x8xbf16>
    %72 = vector.shape_cast %71 : vector<1x64x8xbf16> to vector<64x8xbf16>
    %cst_38 = arith.constant dense<0.000000e+00> : vector<64x256xf32>
    %73 = tpu.matmul %72, %70, %cst_38 {dimension_numbers = #tpu.dot_dimension_numbers<[1], [0], [0], [1], [0, 0, 1, 1], [], []>} : vector<64x8xbf16>, vector<8x256xbf16>, vector<64x256xf32> -> vector<64x256xf32>
    %74 = arith.addf %55, %73 : vector<64x256xf32>
    %c0_39 = arith.constant 0 : index
    %c0_40 = arith.constant 0 : index
    %c0_41 = arith.constant 0 : index
    %c300 = arith.constant 300 : index
    %75 = vector.load %arg2[%c0_39, %c0_40, %c0_41, %c300] : memref<1x1x8x868xbf16, #tpu.memory_space<vmem>>, vector<1x1x8x256xbf16>
    %76 = vector.shape_cast %75 : vector<1x1x8x256xbf16> to vector<8x256xbf16>
    %c-6_i32_42 = arith.constant -6 : i32
    %77 = vector.broadcast %c-6_i32_42 : i32 to vector<1x256xi32>
    %78 = arith.addi %19, %77 : vector<1x256xi32>
    %c0_i32_43 = arith.constant 0 : i32
    %79 = vector.broadcast %c0_i32_43 : i32 to vector<1x256xi32>
    %80 = arith.cmpi sge, %78, %79 : vector<1x256xi32>
    %c-6_i32_44 = arith.constant -6 : i32
    %81 = vector.broadcast %c-6_i32_44 : i32 to vector<1x256xi32>
    %82 = arith.addi %19, %81 : vector<1x256xi32>
    %c16_i32_45 = arith.constant 16 : i32
    %83 = vector.broadcast %c16_i32_45 : i32 to vector<1x256xi32>
    %84 = arith.cmpi slt, %82, %83 : vector<1x256xi32>
    %85 = arith.andi %80, %84 : vector<1x256xi1>
    %cst_46 = arith.constant 0.000000e+00 : bf16
    %86 = vector.broadcast %cst_46 : bf16 to vector<8x256xbf16>
    %87 = vector.shape_cast %85 : vector<1x256xi1> to vector<1x256xi1>
    %88 = vector.broadcast %87 : vector<1x256xi1> to vector<8x256xi1>
    %89 = arith.select %88, %76, %86 : vector<8x256xi1>, vector<8x256xbf16>
    %c3 = arith.constant 3 : index
    %c0_47 = arith.constant 0 : index
    %c0_48 = arith.constant 0 : index
    %90 = vector.load %arg4[%c3, %c0_47, %c0_48] : memref<9x64x8xbf16, #tpu.memory_space<vmem>>, vector<1x64x8xbf16>
    %91 = vector.shape_cast %90 : vector<1x64x8xbf16> to vector<64x8xbf16>
    %cst_49 = arith.constant dense<0.000000e+00> : vector<64x256xf32>
    %92 = tpu.matmul %91, %89, %cst_49 {dimension_numbers = #tpu.dot_dimension_numbers<[1], [0], [0], [1], [0, 0, 1, 1], [], []>} : vector<64x8xbf16>, vector<8x256xbf16>, vector<64x256xf32> -> vector<64x256xf32>
    %93 = arith.addf %74, %92 : vector<64x256xf32>
    %c0_50 = arith.constant 0 : index
    %c0_51 = arith.constant 0 : index
    %c0_52 = arith.constant 0 : index
    %c306_53 = arith.constant 306 : index
    %94 = vector.load %arg2[%c0_50, %c0_51, %c0_52, %c306_53] : memref<1x1x8x868xbf16, #tpu.memory_space<vmem>>, vector<1x1x8x256xbf16>
    %95 = vector.shape_cast %94 : vector<1x1x8x256xbf16> to vector<8x256xbf16>
    %c4 = arith.constant 4 : index
    %c0_54 = arith.constant 0 : index
    %c0_55 = arith.constant 0 : index
    %96 = vector.load %arg4[%c4, %c0_54, %c0_55] : memref<9x64x8xbf16, #tpu.memory_space<vmem>>, vector<1x64x8xbf16>
    %97 = vector.shape_cast %96 : vector<1x64x8xbf16> to vector<64x8xbf16>
    %cst_56 = arith.constant dense<0.000000e+00> : vector<64x256xf32>
    %98 = tpu.matmul %97, %95, %cst_56 {dimension_numbers = #tpu.dot_dimension_numbers<[1], [0], [0], [1], [0, 0, 1, 1], [], []>} : vector<64x8xbf16>, vector<8x256xbf16>, vector<64x256xf32> -> vector<64x256xf32>
    %99 = arith.addf %93, %98 : vector<64x256xf32>
    %c0_57 = arith.constant 0 : index
    %c0_58 = arith.constant 0 : index
    %c0_59 = arith.constant 0 : index
    %c312 = arith.constant 312 : index
    %100 = vector.load %arg2[%c0_57, %c0_58, %c0_59, %c312] : memref<1x1x8x868xbf16, #tpu.memory_space<vmem>>, vector<1x1x8x256xbf16>
    %101 = vector.shape_cast %100 : vector<1x1x8x256xbf16> to vector<8x256xbf16>
    %c6_i32_60 = arith.constant 6 : i32
    %102 = vector.broadcast %c6_i32_60 : i32 to vector<1x256xi32>
    %103 = arith.addi %19, %102 : vector<1x256xi32>
    %c0_i32_61 = arith.constant 0 : i32
    %104 = vector.broadcast %c0_i32_61 : i32 to vector<1x256xi32>
    %105 = arith.cmpi sge, %103, %104 : vector<1x256xi32>
    %c6_i32_62 = arith.constant 6 : i32
    %106 = vector.broadcast %c6_i32_62 : i32 to vector<1x256xi32>
    %107 = arith.addi %19, %106 : vector<1x256xi32>
    %c16_i32_63 = arith.constant 16 : i32
    %108 = vector.broadcast %c16_i32_63 : i32 to vector<1x256xi32>
    %109 = arith.cmpi slt, %107, %108 : vector<1x256xi32>
    %110 = arith.andi %105, %109 : vector<1x256xi1>
    %cst_64 = arith.constant 0.000000e+00 : bf16
    %111 = vector.broadcast %cst_64 : bf16 to vector<8x256xbf16>
    %112 = vector.shape_cast %110 : vector<1x256xi1> to vector<1x256xi1>
    %113 = vector.broadcast %112 : vector<1x256xi1> to vector<8x256xi1>
    %114 = arith.select %113, %101, %111 : vector<8x256xi1>, vector<8x256xbf16>
    %c5 = arith.constant 5 : index
    %c0_65 = arith.constant 0 : index
    %c0_66 = arith.constant 0 : index
    %115 = vector.load %arg4[%c5, %c0_65, %c0_66] : memref<9x64x8xbf16, #tpu.memory_space<vmem>>, vector<1x64x8xbf16>
    %116 = vector.shape_cast %115 : vector<1x64x8xbf16> to vector<64x8xbf16>
    %cst_67 = arith.constant dense<0.000000e+00> : vector<64x256xf32>
    %117 = tpu.matmul %116, %114, %cst_67 {dimension_numbers = #tpu.dot_dimension_numbers<[1], [0], [0], [1], [0, 0, 1, 1], [], []>} : vector<64x8xbf16>, vector<8x256xbf16>, vector<64x256xf32> -> vector<64x256xf32>
    %118 = arith.addf %99, %117 : vector<64x256xf32>
    %c0_68 = arith.constant 0 : index
    %c0_69 = arith.constant 0 : index
    %c0_70 = arith.constant 0 : index
    %c396 = arith.constant 396 : index
    %119 = vector.load %arg2[%c0_68, %c0_69, %c0_70, %c396] : memref<1x1x8x868xbf16, #tpu.memory_space<vmem>>, vector<1x1x8x256xbf16>
    %120 = vector.shape_cast %119 : vector<1x1x8x256xbf16> to vector<8x256xbf16>
    %c-6_i32_71 = arith.constant -6 : i32
    %121 = vector.broadcast %c-6_i32_71 : i32 to vector<1x256xi32>
    %122 = arith.addi %19, %121 : vector<1x256xi32>
    %c0_i32_72 = arith.constant 0 : i32
    %123 = vector.broadcast %c0_i32_72 : i32 to vector<1x256xi32>
    %124 = arith.cmpi sge, %122, %123 : vector<1x256xi32>
    %c-6_i32_73 = arith.constant -6 : i32
    %125 = vector.broadcast %c-6_i32_73 : i32 to vector<1x256xi32>
    %126 = arith.addi %19, %125 : vector<1x256xi32>
    %c16_i32_74 = arith.constant 16 : i32
    %127 = vector.broadcast %c16_i32_74 : i32 to vector<1x256xi32>
    %128 = arith.cmpi slt, %126, %127 : vector<1x256xi32>
    %129 = arith.andi %124, %128 : vector<1x256xi1>
    %cst_75 = arith.constant 0.000000e+00 : bf16
    %130 = vector.broadcast %cst_75 : bf16 to vector<8x256xbf16>
    %131 = vector.shape_cast %129 : vector<1x256xi1> to vector<1x256xi1>
    %132 = vector.broadcast %131 : vector<1x256xi1> to vector<8x256xi1>
    %133 = arith.select %132, %120, %130 : vector<8x256xi1>, vector<8x256xbf16>
    %c6 = arith.constant 6 : index
    %c0_76 = arith.constant 0 : index
    %c0_77 = arith.constant 0 : index
    %134 = vector.load %arg4[%c6, %c0_76, %c0_77] : memref<9x64x8xbf16, #tpu.memory_space<vmem>>, vector<1x64x8xbf16>
    %135 = vector.shape_cast %134 : vector<1x64x8xbf16> to vector<64x8xbf16>
    %cst_78 = arith.constant dense<0.000000e+00> : vector<64x256xf32>
    %136 = tpu.matmul %135, %133, %cst_78 {dimension_numbers = #tpu.dot_dimension_numbers<[1], [0], [0], [1], [0, 0, 1, 1], [], []>} : vector<64x8xbf16>, vector<8x256xbf16>, vector<64x256xf32> -> vector<64x256xf32>
    %137 = arith.addf %118, %136 : vector<64x256xf32>
    %c0_79 = arith.constant 0 : index
    %c0_80 = arith.constant 0 : index
    %c0_81 = arith.constant 0 : index
    %c402 = arith.constant 402 : index
    %138 = vector.load %arg2[%c0_79, %c0_80, %c0_81, %c402] : memref<1x1x8x868xbf16, #tpu.memory_space<vmem>>, vector<1x1x8x256xbf16>
    %139 = vector.shape_cast %138 : vector<1x1x8x256xbf16> to vector<8x256xbf16>
    %c7 = arith.constant 7 : index
    %c0_82 = arith.constant 0 : index
    %c0_83 = arith.constant 0 : index
    %140 = vector.load %arg4[%c7, %c0_82, %c0_83] : memref<9x64x8xbf16, #tpu.memory_space<vmem>>, vector<1x64x8xbf16>
    %141 = vector.shape_cast %140 : vector<1x64x8xbf16> to vector<64x8xbf16>
    %cst_84 = arith.constant dense<0.000000e+00> : vector<64x256xf32>
    %142 = tpu.matmul %141, %139, %cst_84 {dimension_numbers = #tpu.dot_dimension_numbers<[1], [0], [0], [1], [0, 0, 1, 1], [], []>} : vector<64x8xbf16>, vector<8x256xbf16>, vector<64x256xf32> -> vector<64x256xf32>
    %143 = arith.addf %137, %142 : vector<64x256xf32>
    %c0_85 = arith.constant 0 : index
    %c0_86 = arith.constant 0 : index
    %c0_87 = arith.constant 0 : index
    %c408 = arith.constant 408 : index
    %144 = vector.load %arg2[%c0_85, %c0_86, %c0_87, %c408] : memref<1x1x8x868xbf16, #tpu.memory_space<vmem>>, vector<1x1x8x256xbf16>
    %145 = vector.shape_cast %144 : vector<1x1x8x256xbf16> to vector<8x256xbf16>
    %c6_i32_88 = arith.constant 6 : i32
    %146 = vector.broadcast %c6_i32_88 : i32 to vector<1x256xi32>
    %147 = arith.addi %19, %146 : vector<1x256xi32>
    %c0_i32_89 = arith.constant 0 : i32
    %148 = vector.broadcast %c0_i32_89 : i32 to vector<1x256xi32>
    %149 = arith.cmpi sge, %147, %148 : vector<1x256xi32>
    %c6_i32_90 = arith.constant 6 : i32
    %150 = vector.broadcast %c6_i32_90 : i32 to vector<1x256xi32>
    %151 = arith.addi %19, %150 : vector<1x256xi32>
    %c16_i32_91 = arith.constant 16 : i32
    %152 = vector.broadcast %c16_i32_91 : i32 to vector<1x256xi32>
    %153 = arith.cmpi slt, %151, %152 : vector<1x256xi32>
    %154 = arith.andi %149, %153 : vector<1x256xi1>
    %cst_92 = arith.constant 0.000000e+00 : bf16
    %155 = vector.broadcast %cst_92 : bf16 to vector<8x256xbf16>
    %156 = vector.shape_cast %154 : vector<1x256xi1> to vector<1x256xi1>
    %157 = vector.broadcast %156 : vector<1x256xi1> to vector<8x256xi1>
    %158 = arith.select %157, %145, %155 : vector<8x256xi1>, vector<8x256xbf16>
    %c8 = arith.constant 8 : index
    %c0_93 = arith.constant 0 : index
    %c0_94 = arith.constant 0 : index
    %159 = vector.load %arg4[%c8, %c0_93, %c0_94] : memref<9x64x8xbf16, #tpu.memory_space<vmem>>, vector<1x64x8xbf16>
    %160 = vector.shape_cast %159 : vector<1x64x8xbf16> to vector<64x8xbf16>
    %cst_95 = arith.constant dense<0.000000e+00> : vector<64x256xf32>
    %161 = tpu.matmul %160, %158, %cst_95 {dimension_numbers = #tpu.dot_dimension_numbers<[1], [0], [0], [1], [0, 0, 1, 1], [], []>} : vector<64x8xbf16>, vector<8x256xbf16>, vector<64x256xf32> -> vector<64x256xf32>
    %162 = arith.addf %143, %161 : vector<64x256xf32>
    %c0_96 = arith.constant 0 : index
    %c0_97 = arith.constant 0 : index
    %163 = vector.load %arg10[%c0_96, %c0_97] : memref<64x1xf32, #tpu.memory_space<vmem>>, vector<64x1xf32>
    %164 = vector.broadcast %163 : vector<64x1xf32> to vector<64x256xf32>
    %165 = arith.mulf %162, %164 : vector<64x256xf32>
    %c0_98 = arith.constant 0 : index
    %c0_99 = arith.constant 0 : index
    %166 = vector.load %arg11[%c0_98, %c0_99] : memref<64x1xf32, #tpu.memory_space<vmem>>, vector<64x1xf32>
    %167 = vector.broadcast %166 : vector<64x1xf32> to vector<64x256xf32>
    %168 = arith.addf %165, %167 : vector<64x256xf32>
    %cst_100 = arith.constant 0.000000e+00 : f32
    %169 = vector.broadcast %cst_100 : f32 to vector<64x256xf32>
    %170 = arith.maximumf %168, %169 : vector<64x256xf32>
    %c0_101 = arith.constant 0 : index
    %c0_102 = arith.constant 0 : index
    %c0_103 = arith.constant 0 : index
    %c102 = arith.constant 102 : index
    %171 = vector.load %arg2[%c0_101, %c0_102, %c0_103, %c102] : memref<1x1x8x868xbf16, #tpu.memory_space<vmem>>, vector<1x1x8x256xbf16>
    %172 = vector.shape_cast %171 : vector<1x1x8x256xbf16> to vector<8x256xbf16>
    %c-12_i32 = arith.constant -12 : i32
    %173 = vector.broadcast %c-12_i32 : i32 to vector<1x256xi32>
    %174 = arith.addi %19, %173 : vector<1x256xi32>
    %c0_i32_104 = arith.constant 0 : i32
    %175 = vector.broadcast %c0_i32_104 : i32 to vector<1x256xi32>
    %176 = arith.cmpi sge, %174, %175 : vector<1x256xi32>
    %c-12_i32_105 = arith.constant -12 : i32
    %177 = vector.broadcast %c-12_i32_105 : i32 to vector<1x256xi32>
    %178 = arith.addi %19, %177 : vector<1x256xi32>
    %c16_i32_106 = arith.constant 16 : i32
    %179 = vector.broadcast %c16_i32_106 : i32 to vector<1x256xi32>
    %180 = arith.cmpi slt, %178, %179 : vector<1x256xi32>
    %181 = arith.andi %176, %180 : vector<1x256xi1>
    %cst_107 = arith.constant 0.000000e+00 : bf16
    %182 = vector.broadcast %cst_107 : bf16 to vector<8x256xbf16>
    %183 = vector.shape_cast %181 : vector<1x256xi1> to vector<1x256xi1>
    %184 = vector.broadcast %183 : vector<1x256xi1> to vector<8x256xi1>
    %185 = arith.select %184, %172, %182 : vector<8x256xi1>, vector<8x256xbf16>
    %c0_108 = arith.constant 0 : index
    %c0_109 = arith.constant 0 : index
    %c0_110 = arith.constant 0 : index
    %186 = vector.load %arg5[%c0_108, %c0_109, %c0_110] : memref<9x64x8xbf16, #tpu.memory_space<vmem>>, vector<1x64x8xbf16>
    %187 = vector.shape_cast %186 : vector<1x64x8xbf16> to vector<64x8xbf16>
    %cst_111 = arith.constant dense<0.000000e+00> : vector<64x256xf32>
    %188 = tpu.matmul %187, %185, %cst_111 {dimension_numbers = #tpu.dot_dimension_numbers<[1], [0], [0], [1], [0, 0, 1, 1], [], []>} : vector<64x8xbf16>, vector<8x256xbf16>, vector<64x256xf32> -> vector<64x256xf32>
    %c0_112 = arith.constant 0 : index
    %c0_113 = arith.constant 0 : index
    %c0_114 = arith.constant 0 : index
    %c114 = arith.constant 114 : index
    %189 = vector.load %arg2[%c0_112, %c0_113, %c0_114, %c114] : memref<1x1x8x868xbf16, #tpu.memory_space<vmem>>, vector<1x1x8x256xbf16>
    %190 = vector.shape_cast %189 : vector<1x1x8x256xbf16> to vector<8x256xbf16>
    %c1_115 = arith.constant 1 : index
    %c0_116 = arith.constant 0 : index
    %c0_117 = arith.constant 0 : index
    %191 = vector.load %arg5[%c1_115, %c0_116, %c0_117] : memref<9x64x8xbf16, #tpu.memory_space<vmem>>, vector<1x64x8xbf16>
    %192 = vector.shape_cast %191 : vector<1x64x8xbf16> to vector<64x8xbf16>
    %cst_118 = arith.constant dense<0.000000e+00> : vector<64x256xf32>
    %193 = tpu.matmul %192, %190, %cst_118 {dimension_numbers = #tpu.dot_dimension_numbers<[1], [0], [0], [1], [0, 0, 1, 1], [], []>} : vector<64x8xbf16>, vector<8x256xbf16>, vector<64x256xf32> -> vector<64x256xf32>
    %194 = arith.addf %188, %193 : vector<64x256xf32>
    %c0_119 = arith.constant 0 : index
    %c0_120 = arith.constant 0 : index
    %c0_121 = arith.constant 0 : index
    %c126 = arith.constant 126 : index
    %195 = vector.load %arg2[%c0_119, %c0_120, %c0_121, %c126] : memref<1x1x8x868xbf16, #tpu.memory_space<vmem>>, vector<1x1x8x256xbf16>
    %196 = vector.shape_cast %195 : vector<1x1x8x256xbf16> to vector<8x256xbf16>
    %c12_i32 = arith.constant 12 : i32
    %197 = vector.broadcast %c12_i32 : i32 to vector<1x256xi32>
    %198 = arith.addi %19, %197 : vector<1x256xi32>
    %c0_i32_122 = arith.constant 0 : i32
    %199 = vector.broadcast %c0_i32_122 : i32 to vector<1x256xi32>
    %200 = arith.cmpi sge, %198, %199 : vector<1x256xi32>
    %c12_i32_123 = arith.constant 12 : i32
    %201 = vector.broadcast %c12_i32_123 : i32 to vector<1x256xi32>
    %202 = arith.addi %19, %201 : vector<1x256xi32>
    %c16_i32_124 = arith.constant 16 : i32
    %203 = vector.broadcast %c16_i32_124 : i32 to vector<1x256xi32>
    %204 = arith.cmpi slt, %202, %203 : vector<1x256xi32>
    %205 = arith.andi %200, %204 : vector<1x256xi1>
    %cst_125 = arith.constant 0.000000e+00 : bf16
    %206 = vector.broadcast %cst_125 : bf16 to vector<8x256xbf16>
    %207 = vector.shape_cast %205 : vector<1x256xi1> to vector<1x256xi1>
    %208 = vector.broadcast %207 : vector<1x256xi1> to vector<8x256xi1>
    %209 = arith.select %208, %196, %206 : vector<8x256xi1>, vector<8x256xbf16>
    %c2_126 = arith.constant 2 : index
    %c0_127 = arith.constant 0 : index
    %c0_128 = arith.constant 0 : index
    %210 = vector.load %arg5[%c2_126, %c0_127, %c0_128] : memref<9x64x8xbf16, #tpu.memory_space<vmem>>, vector<1x64x8xbf16>
    %211 = vector.shape_cast %210 : vector<1x64x8xbf16> to vector<64x8xbf16>
    %cst_129 = arith.constant dense<0.000000e+00> : vector<64x256xf32>
    %212 = tpu.matmul %211, %209, %cst_129 {dimension_numbers = #tpu.dot_dimension_numbers<[1], [0], [0], [1], [0, 0, 1, 1], [], []>} : vector<64x8xbf16>, vector<8x256xbf16>, vector<64x256xf32> -> vector<64x256xf32>
    %213 = arith.addf %194, %212 : vector<64x256xf32>
    %c0_130 = arith.constant 0 : index
    %c0_131 = arith.constant 0 : index
    %c0_132 = arith.constant 0 : index
    %c294 = arith.constant 294 : index
    %214 = vector.load %arg2[%c0_130, %c0_131, %c0_132, %c294] : memref<1x1x8x868xbf16, #tpu.memory_space<vmem>>, vector<1x1x8x256xbf16>
    %215 = vector.shape_cast %214 : vector<1x1x8x256xbf16> to vector<8x256xbf16>
    %c-12_i32_133 = arith.constant -12 : i32
    %216 = vector.broadcast %c-12_i32_133 : i32 to vector<1x256xi32>
    %217 = arith.addi %19, %216 : vector<1x256xi32>
    %c0_i32_134 = arith.constant 0 : i32
    %218 = vector.broadcast %c0_i32_134 : i32 to vector<1x256xi32>
    %219 = arith.cmpi sge, %217, %218 : vector<1x256xi32>
    %c-12_i32_135 = arith.constant -12 : i32
    %220 = vector.broadcast %c-12_i32_135 : i32 to vector<1x256xi32>
    %221 = arith.addi %19, %220 : vector<1x256xi32>
    %c16_i32_136 = arith.constant 16 : i32
    %222 = vector.broadcast %c16_i32_136 : i32 to vector<1x256xi32>
    %223 = arith.cmpi slt, %221, %222 : vector<1x256xi32>
    %224 = arith.andi %219, %223 : vector<1x256xi1>
    %cst_137 = arith.constant 0.000000e+00 : bf16
    %225 = vector.broadcast %cst_137 : bf16 to vector<8x256xbf16>
    %226 = vector.shape_cast %224 : vector<1x256xi1> to vector<1x256xi1>
    %227 = vector.broadcast %226 : vector<1x256xi1> to vector<8x256xi1>
    %228 = arith.select %227, %215, %225 : vector<8x256xi1>, vector<8x256xbf16>
    %c3_138 = arith.constant 3 : index
    %c0_139 = arith.constant 0 : index
    %c0_140 = arith.constant 0 : index
    %229 = vector.load %arg5[%c3_138, %c0_139, %c0_140] : memref<9x64x8xbf16, #tpu.memory_space<vmem>>, vector<1x64x8xbf16>
    %230 = vector.shape_cast %229 : vector<1x64x8xbf16> to vector<64x8xbf16>
    %cst_141 = arith.constant dense<0.000000e+00> : vector<64x256xf32>
    %231 = tpu.matmul %230, %228, %cst_141 {dimension_numbers = #tpu.dot_dimension_numbers<[1], [0], [0], [1], [0, 0, 1, 1], [], []>} : vector<64x8xbf16>, vector<8x256xbf16>, vector<64x256xf32> -> vector<64x256xf32>
    %232 = arith.addf %213, %231 : vector<64x256xf32>
    %c0_142 = arith.constant 0 : index
    %c0_143 = arith.constant 0 : index
    %c0_144 = arith.constant 0 : index
    %c306_145 = arith.constant 306 : index
    %233 = vector.load %arg2[%c0_142, %c0_143, %c0_144, %c306_145] : memref<1x1x8x868xbf16, #tpu.memory_space<vmem>>, vector<1x1x8x256xbf16>
    %234 = vector.shape_cast %233 : vector<1x1x8x256xbf16> to vector<8x256xbf16>
    %c4_146 = arith.constant 4 : index
    %c0_147 = arith.constant 0 : index
    %c0_148 = arith.constant 0 : index
    %235 = vector.load %arg5[%c4_146, %c0_147, %c0_148] : memref<9x64x8xbf16, #tpu.memory_space<vmem>>, vector<1x64x8xbf16>
    %236 = vector.shape_cast %235 : vector<1x64x8xbf16> to vector<64x8xbf16>
    %cst_149 = arith.constant dense<0.000000e+00> : vector<64x256xf32>
    %237 = tpu.matmul %236, %234, %cst_149 {dimension_numbers = #tpu.dot_dimension_numbers<[1], [0], [0], [1], [0, 0, 1, 1], [], []>} : vector<64x8xbf16>, vector<8x256xbf16>, vector<64x256xf32> -> vector<64x256xf32>
    %238 = arith.addf %232, %237 : vector<64x256xf32>
    %c0_150 = arith.constant 0 : index
    %c0_151 = arith.constant 0 : index
    %c0_152 = arith.constant 0 : index
    %c318 = arith.constant 318 : index
    %239 = vector.load %arg2[%c0_150, %c0_151, %c0_152, %c318] : memref<1x1x8x868xbf16, #tpu.memory_space<vmem>>, vector<1x1x8x256xbf16>
    %240 = vector.shape_cast %239 : vector<1x1x8x256xbf16> to vector<8x256xbf16>
    %c12_i32_153 = arith.constant 12 : i32
    %241 = vector.broadcast %c12_i32_153 : i32 to vector<1x256xi32>
    %242 = arith.addi %19, %241 : vector<1x256xi32>
    %c0_i32_154 = arith.constant 0 : i32
    %243 = vector.broadcast %c0_i32_154 : i32 to vector<1x256xi32>
    %244 = arith.cmpi sge, %242, %243 : vector<1x256xi32>
    %c12_i32_155 = arith.constant 12 : i32
    %245 = vector.broadcast %c12_i32_155 : i32 to vector<1x256xi32>
    %246 = arith.addi %19, %245 : vector<1x256xi32>
    %c16_i32_156 = arith.constant 16 : i32
    %247 = vector.broadcast %c16_i32_156 : i32 to vector<1x256xi32>
    %248 = arith.cmpi slt, %246, %247 : vector<1x256xi32>
    %249 = arith.andi %244, %248 : vector<1x256xi1>
    %cst_157 = arith.constant 0.000000e+00 : bf16
    %250 = vector.broadcast %cst_157 : bf16 to vector<8x256xbf16>
    %251 = vector.shape_cast %249 : vector<1x256xi1> to vector<1x256xi1>
    %252 = vector.broadcast %251 : vector<1x256xi1> to vector<8x256xi1>
    %253 = arith.select %252, %240, %250 : vector<8x256xi1>, vector<8x256xbf16>
    %c5_158 = arith.constant 5 : index
    %c0_159 = arith.constant 0 : index
    %c0_160 = arith.constant 0 : index
    %254 = vector.load %arg5[%c5_158, %c0_159, %c0_160] : memref<9x64x8xbf16, #tpu.memory_space<vmem>>, vector<1x64x8xbf16>
    %255 = vector.shape_cast %254 : vector<1x64x8xbf16> to vector<64x8xbf16>
    %cst_161 = arith.constant dense<0.000000e+00> : vector<64x256xf32>
    %256 = tpu.matmul %255, %253, %cst_161 {dimension_numbers = #tpu.dot_dimension_numbers<[1], [0], [0], [1], [0, 0, 1, 1], [], []>} : vector<64x8xbf16>, vector<8x256xbf16>, vector<64x256xf32> -> vector<64x256xf32>
    %257 = arith.addf %238, %256 : vector<64x256xf32>
    %c0_162 = arith.constant 0 : index
    %c0_163 = arith.constant 0 : index
    %c0_164 = arith.constant 0 : index
    %c486 = arith.constant 486 : index
    %258 = vector.load %arg2[%c0_162, %c0_163, %c0_164, %c486] : memref<1x1x8x868xbf16, #tpu.memory_space<vmem>>, vector<1x1x8x256xbf16>
    %259 = vector.shape_cast %258 : vector<1x1x8x256xbf16> to vector<8x256xbf16>
    %c-12_i32_165 = arith.constant -12 : i32
    %260 = vector.broadcast %c-12_i32_165 : i32 to vector<1x256xi32>
    %261 = arith.addi %19, %260 : vector<1x256xi32>
    %c0_i32_166 = arith.constant 0 : i32
    %262 = vector.broadcast %c0_i32_166 : i32 to vector<1x256xi32>
    %263 = arith.cmpi sge, %261, %262 : vector<1x256xi32>
    %c-12_i32_167 = arith.constant -12 : i32
    %264 = vector.broadcast %c-12_i32_167 : i32 to vector<1x256xi32>
    %265 = arith.addi %19, %264 : vector<1x256xi32>
    %c16_i32_168 = arith.constant 16 : i32
    %266 = vector.broadcast %c16_i32_168 : i32 to vector<1x256xi32>
    %267 = arith.cmpi slt, %265, %266 : vector<1x256xi32>
    %268 = arith.andi %263, %267 : vector<1x256xi1>
    %cst_169 = arith.constant 0.000000e+00 : bf16
    %269 = vector.broadcast %cst_169 : bf16 to vector<8x256xbf16>
    %270 = vector.shape_cast %268 : vector<1x256xi1> to vector<1x256xi1>
    %271 = vector.broadcast %270 : vector<1x256xi1> to vector<8x256xi1>
    %272 = arith.select %271, %259, %269 : vector<8x256xi1>, vector<8x256xbf16>
    %c6_170 = arith.constant 6 : index
    %c0_171 = arith.constant 0 : index
    %c0_172 = arith.constant 0 : index
    %273 = vector.load %arg5[%c6_170, %c0_171, %c0_172] : memref<9x64x8xbf16, #tpu.memory_space<vmem>>, vector<1x64x8xbf16>
    %274 = vector.shape_cast %273 : vector<1x64x8xbf16> to vector<64x8xbf16>
    %cst_173 = arith.constant dense<0.000000e+00> : vector<64x256xf32>
    %275 = tpu.matmul %274, %272, %cst_173 {dimension_numbers = #tpu.dot_dimension_numbers<[1], [0], [0], [1], [0, 0, 1, 1], [], []>} : vector<64x8xbf16>, vector<8x256xbf16>, vector<64x256xf32> -> vector<64x256xf32>
    %276 = arith.addf %257, %275 : vector<64x256xf32>
    %c0_174 = arith.constant 0 : index
    %c0_175 = arith.constant 0 : index
    %c0_176 = arith.constant 0 : index
    %c498 = arith.constant 498 : index
    %277 = vector.load %arg2[%c0_174, %c0_175, %c0_176, %c498] : memref<1x1x8x868xbf16, #tpu.memory_space<vmem>>, vector<1x1x8x256xbf16>
    %278 = vector.shape_cast %277 : vector<1x1x8x256xbf16> to vector<8x256xbf16>
    %c7_177 = arith.constant 7 : index
    %c0_178 = arith.constant 0 : index
    %c0_179 = arith.constant 0 : index
    %279 = vector.load %arg5[%c7_177, %c0_178, %c0_179] : memref<9x64x8xbf16, #tpu.memory_space<vmem>>, vector<1x64x8xbf16>
    %280 = vector.shape_cast %279 : vector<1x64x8xbf16> to vector<64x8xbf16>
    %cst_180 = arith.constant dense<0.000000e+00> : vector<64x256xf32>
    %281 = tpu.matmul %280, %278, %cst_180 {dimension_numbers = #tpu.dot_dimension_numbers<[1], [0], [0], [1], [0, 0, 1, 1], [], []>} : vector<64x8xbf16>, vector<8x256xbf16>, vector<64x256xf32> -> vector<64x256xf32>
    %282 = arith.addf %276, %281 : vector<64x256xf32>
    %c0_181 = arith.constant 0 : index
    %c0_182 = arith.constant 0 : index
    %c0_183 = arith.constant 0 : index
    %c510 = arith.constant 510 : index
    %283 = vector.load %arg2[%c0_181, %c0_182, %c0_183, %c510] : memref<1x1x8x868xbf16, #tpu.memory_space<vmem>>, vector<1x1x8x256xbf16>
    %284 = vector.shape_cast %283 : vector<1x1x8x256xbf16> to vector<8x256xbf16>
    %c12_i32_184 = arith.constant 12 : i32
    %285 = vector.broadcast %c12_i32_184 : i32 to vector<1x256xi32>
    %286 = arith.addi %19, %285 : vector<1x256xi32>
    %c0_i32_185 = arith.constant 0 : i32
    %287 = vector.broadcast %c0_i32_185 : i32 to vector<1x256xi32>
    %288 = arith.cmpi sge, %286, %287 : vector<1x256xi32>
    %c12_i32_186 = arith.constant 12 : i32
    %289 = vector.broadcast %c12_i32_186 : i32 to vector<1x256xi32>
    %290 = arith.addi %19, %289 : vector<1x256xi32>
    %c16_i32_187 = arith.constant 16 : i32
    %291 = vector.broadcast %c16_i32_187 : i32 to vector<1x256xi32>
    %292 = arith.cmpi slt, %290, %291 : vector<1x256xi32>
    %293 = arith.andi %288, %292 : vector<1x256xi1>
    %cst_188 = arith.constant 0.000000e+00 : bf16
    %294 = vector.broadcast %cst_188 : bf16 to vector<8x256xbf16>
    %295 = vector.shape_cast %293 : vector<1x256xi1> to vector<1x256xi1>
    %296 = vector.broadcast %295 : vector<1x256xi1> to vector<8x256xi1>
    %297 = arith.select %296, %284, %294 : vector<8x256xi1>, vector<8x256xbf16>
    %c8_189 = arith.constant 8 : index
    %c0_190 = arith.constant 0 : index
    %c0_191 = arith.constant 0 : index
    %298 = vector.load %arg5[%c8_189, %c0_190, %c0_191] : memref<9x64x8xbf16, #tpu.memory_space<vmem>>, vector<1x64x8xbf16>
    %299 = vector.shape_cast %298 : vector<1x64x8xbf16> to vector<64x8xbf16>
    %cst_192 = arith.constant dense<0.000000e+00> : vector<64x256xf32>
    %300 = tpu.matmul %299, %297, %cst_192 {dimension_numbers = #tpu.dot_dimension_numbers<[1], [0], [0], [1], [0, 0, 1, 1], [], []>} : vector<64x8xbf16>, vector<8x256xbf16>, vector<64x256xf32> -> vector<64x256xf32>
    %301 = arith.addf %282, %300 : vector<64x256xf32>
    %c0_193 = arith.constant 0 : index
    %c0_194 = arith.constant 0 : index
    %302 = vector.load %arg12[%c0_193, %c0_194] : memref<64x1xf32, #tpu.memory_space<vmem>>, vector<64x1xf32>
    %303 = vector.broadcast %302 : vector<64x1xf32> to vector<64x256xf32>
    %304 = arith.mulf %301, %303 : vector<64x256xf32>
    %c0_195 = arith.constant 0 : index
    %c0_196 = arith.constant 0 : index
    %305 = vector.load %arg13[%c0_195, %c0_196] : memref<64x1xf32, #tpu.memory_space<vmem>>, vector<64x1xf32>
    %306 = vector.broadcast %305 : vector<64x1xf32> to vector<64x256xf32>
    %307 = arith.addf %304, %306 : vector<64x256xf32>
    %cst_197 = arith.constant 0.000000e+00 : f32
    %308 = vector.broadcast %cst_197 : f32 to vector<64x256xf32>
    %309 = arith.maximumf %307, %308 : vector<64x256xf32>
    %c0_198 = arith.constant 0 : index
    %c0_199 = arith.constant 0 : index
    %c0_200 = arith.constant 0 : index
    %c0_201 = arith.constant 0 : index
    %310 = vector.load %arg2[%c0_198, %c0_199, %c0_200, %c0_201] : memref<1x1x8x868xbf16, #tpu.memory_space<vmem>>, vector<1x1x8x256xbf16>
    %311 = vector.shape_cast %310 : vector<1x1x8x256xbf16> to vector<8x256xbf16>
    %c-18_i32 = arith.constant -18 : i32
    %312 = vector.broadcast %c-18_i32 : i32 to vector<1x256xi32>
    %313 = arith.addi %19, %312 : vector<1x256xi32>
    %c0_i32_202 = arith.constant 0 : i32
    %314 = vector.broadcast %c0_i32_202 : i32 to vector<1x256xi32>
    %315 = arith.cmpi sge, %313, %314 : vector<1x256xi32>
    %c-18_i32_203 = arith.constant -18 : i32
    %316 = vector.broadcast %c-18_i32_203 : i32 to vector<1x256xi32>
    %317 = arith.addi %19, %316 : vector<1x256xi32>
    %c16_i32_204 = arith.constant 16 : i32
    %318 = vector.broadcast %c16_i32_204 : i32 to vector<1x256xi32>
    %319 = arith.cmpi slt, %317, %318 : vector<1x256xi32>
    %320 = arith.andi %315, %319 : vector<1x256xi1>
    %cst_205 = arith.constant 0.000000e+00 : bf16
    %321 = vector.broadcast %cst_205 : bf16 to vector<8x256xbf16>
    %322 = vector.shape_cast %320 : vector<1x256xi1> to vector<1x256xi1>
    %323 = vector.broadcast %322 : vector<1x256xi1> to vector<8x256xi1>
    %324 = arith.select %323, %311, %321 : vector<8x256xi1>, vector<8x256xbf16>
    %c0_206 = arith.constant 0 : index
    %c0_207 = arith.constant 0 : index
    %c0_208 = arith.constant 0 : index
    %325 = vector.load %arg6[%c0_206, %c0_207, %c0_208] : memref<9x64x8xbf16, #tpu.memory_space<vmem>>, vector<1x64x8xbf16>
    %326 = vector.shape_cast %325 : vector<1x64x8xbf16> to vector<64x8xbf16>
    %cst_209 = arith.constant dense<0.000000e+00> : vector<64x256xf32>
    %327 = tpu.matmul %326, %324, %cst_209 {dimension_numbers = #tpu.dot_dimension_numbers<[1], [0], [0], [1], [0, 0, 1, 1], [], []>} : vector<64x8xbf16>, vector<8x256xbf16>, vector<64x256xf32> -> vector<64x256xf32>
    %c0_210 = arith.constant 0 : index
    %c0_211 = arith.constant 0 : index
    %c0_212 = arith.constant 0 : index
    %c18 = arith.constant 18 : index
    %328 = vector.load %arg2[%c0_210, %c0_211, %c0_212, %c18] : memref<1x1x8x868xbf16, #tpu.memory_space<vmem>>, vector<1x1x8x256xbf16>
    %329 = vector.shape_cast %328 : vector<1x1x8x256xbf16> to vector<8x256xbf16>
    %c1_213 = arith.constant 1 : index
    %c0_214 = arith.constant 0 : index
    %c0_215 = arith.constant 0 : index
    %330 = vector.load %arg6[%c1_213, %c0_214, %c0_215] : memref<9x64x8xbf16, #tpu.memory_space<vmem>>, vector<1x64x8xbf16>
    %331 = vector.shape_cast %330 : vector<1x64x8xbf16> to vector<64x8xbf16>
    %cst_216 = arith.constant dense<0.000000e+00> : vector<64x256xf32>
    %332 = tpu.matmul %331, %329, %cst_216 {dimension_numbers = #tpu.dot_dimension_numbers<[1], [0], [0], [1], [0, 0, 1, 1], [], []>} : vector<64x8xbf16>, vector<8x256xbf16>, vector<64x256xf32> -> vector<64x256xf32>
    %333 = arith.addf %327, %332 : vector<64x256xf32>
    %c0_217 = arith.constant 0 : index
    %c0_218 = arith.constant 0 : index
    %c0_219 = arith.constant 0 : index
    %c36 = arith.constant 36 : index
    %334 = vector.load %arg2[%c0_217, %c0_218, %c0_219, %c36] : memref<1x1x8x868xbf16, #tpu.memory_space<vmem>>, vector<1x1x8x256xbf16>
    %335 = vector.shape_cast %334 : vector<1x1x8x256xbf16> to vector<8x256xbf16>
    %c18_i32 = arith.constant 18 : i32
    %336 = vector.broadcast %c18_i32 : i32 to vector<1x256xi32>
    %337 = arith.addi %19, %336 : vector<1x256xi32>
    %c0_i32_220 = arith.constant 0 : i32
    %338 = vector.broadcast %c0_i32_220 : i32 to vector<1x256xi32>
    %339 = arith.cmpi sge, %337, %338 : vector<1x256xi32>
    %c18_i32_221 = arith.constant 18 : i32
    %340 = vector.broadcast %c18_i32_221 : i32 to vector<1x256xi32>
    %341 = arith.addi %19, %340 : vector<1x256xi32>
    %c16_i32_222 = arith.constant 16 : i32
    %342 = vector.broadcast %c16_i32_222 : i32 to vector<1x256xi32>
    %343 = arith.cmpi slt, %341, %342 : vector<1x256xi32>
    %344 = arith.andi %339, %343 : vector<1x256xi1>
    %cst_223 = arith.constant 0.000000e+00 : bf16
    %345 = vector.broadcast %cst_223 : bf16 to vector<8x256xbf16>
    %346 = vector.shape_cast %344 : vector<1x256xi1> to vector<1x256xi1>
    %347 = vector.broadcast %346 : vector<1x256xi1> to vector<8x256xi1>
    %348 = arith.select %347, %335, %345 : vector<8x256xi1>, vector<8x256xbf16>
    %c2_224 = arith.constant 2 : index
    %c0_225 = arith.constant 0 : index
    %c0_226 = arith.constant 0 : index
    %349 = vector.load %arg6[%c2_224, %c0_225, %c0_226] : memref<9x64x8xbf16, #tpu.memory_space<vmem>>, vector<1x64x8xbf16>
    %350 = vector.shape_cast %349 : vector<1x64x8xbf16> to vector<64x8xbf16>
    %cst_227 = arith.constant dense<0.000000e+00> : vector<64x256xf32>
    %351 = tpu.matmul %350, %348, %cst_227 {dimension_numbers = #tpu.dot_dimension_numbers<[1], [0], [0], [1], [0, 0, 1, 1], [], []>} : vector<64x8xbf16>, vector<8x256xbf16>, vector<64x256xf32> -> vector<64x256xf32>
    %352 = arith.addf %333, %351 : vector<64x256xf32>
    %c0_228 = arith.constant 0 : index
    %c0_229 = arith.constant 0 : index
    %c0_230 = arith.constant 0 : index
    %c288 = arith.constant 288 : index
    %353 = vector.load %arg2[%c0_228, %c0_229, %c0_230, %c288] : memref<1x1x8x868xbf16, #tpu.memory_space<vmem>>, vector<1x1x8x256xbf16>
    %354 = vector.shape_cast %353 : vector<1x1x8x256xbf16> to vector<8x256xbf16>
    %c-18_i32_231 = arith.constant -18 : i32
    %355 = vector.broadcast %c-18_i32_231 : i32 to vector<1x256xi32>
    %356 = arith.addi %19, %355 : vector<1x256xi32>
    %c0_i32_232 = arith.constant 0 : i32
    %357 = vector.broadcast %c0_i32_232 : i32 to vector<1x256xi32>
    %358 = arith.cmpi sge, %356, %357 : vector<1x256xi32>
    %c-18_i32_233 = arith.constant -18 : i32
    %359 = vector.broadcast %c-18_i32_233 : i32 to vector<1x256xi32>
    %360 = arith.addi %19, %359 : vector<1x256xi32>
    %c16_i32_234 = arith.constant 16 : i32
    %361 = vector.broadcast %c16_i32_234 : i32 to vector<1x256xi32>
    %362 = arith.cmpi slt, %360, %361 : vector<1x256xi32>
    %363 = arith.andi %358, %362 : vector<1x256xi1>
    %cst_235 = arith.constant 0.000000e+00 : bf16
    %364 = vector.broadcast %cst_235 : bf16 to vector<8x256xbf16>
    %365 = vector.shape_cast %363 : vector<1x256xi1> to vector<1x256xi1>
    %366 = vector.broadcast %365 : vector<1x256xi1> to vector<8x256xi1>
    %367 = arith.select %366, %354, %364 : vector<8x256xi1>, vector<8x256xbf16>
    %c3_236 = arith.constant 3 : index
    %c0_237 = arith.constant 0 : index
    %c0_238 = arith.constant 0 : index
    %368 = vector.load %arg6[%c3_236, %c0_237, %c0_238] : memref<9x64x8xbf16, #tpu.memory_space<vmem>>, vector<1x64x8xbf16>
    %369 = vector.shape_cast %368 : vector<1x64x8xbf16> to vector<64x8xbf16>
    %cst_239 = arith.constant dense<0.000000e+00> : vector<64x256xf32>
    %370 = tpu.matmul %369, %367, %cst_239 {dimension_numbers = #tpu.dot_dimension_numbers<[1], [0], [0], [1], [0, 0, 1, 1], [], []>} : vector<64x8xbf16>, vector<8x256xbf16>, vector<64x256xf32> -> vector<64x256xf32>
    %371 = arith.addf %352, %370 : vector<64x256xf32>
    %c0_240 = arith.constant 0 : index
    %c0_241 = arith.constant 0 : index
    %c0_242 = arith.constant 0 : index
    %c306_243 = arith.constant 306 : index
    %372 = vector.load %arg2[%c0_240, %c0_241, %c0_242, %c306_243] : memref<1x1x8x868xbf16, #tpu.memory_space<vmem>>, vector<1x1x8x256xbf16>
    %373 = vector.shape_cast %372 : vector<1x1x8x256xbf16> to vector<8x256xbf16>
    %c4_244 = arith.constant 4 : index
    %c0_245 = arith.constant 0 : index
    %c0_246 = arith.constant 0 : index
    %374 = vector.load %arg6[%c4_244, %c0_245, %c0_246] : memref<9x64x8xbf16, #tpu.memory_space<vmem>>, vector<1x64x8xbf16>
    %375 = vector.shape_cast %374 : vector<1x64x8xbf16> to vector<64x8xbf16>
    %cst_247 = arith.constant dense<0.000000e+00> : vector<64x256xf32>
    %376 = tpu.matmul %375, %373, %cst_247 {dimension_numbers = #tpu.dot_dimension_numbers<[1], [0], [0], [1], [0, 0, 1, 1], [], []>} : vector<64x8xbf16>, vector<8x256xbf16>, vector<64x256xf32> -> vector<64x256xf32>
    %377 = arith.addf %371, %376 : vector<64x256xf32>
    %c0_248 = arith.constant 0 : index
    %c0_249 = arith.constant 0 : index
    %c0_250 = arith.constant 0 : index
    %c324 = arith.constant 324 : index
    %378 = vector.load %arg2[%c0_248, %c0_249, %c0_250, %c324] : memref<1x1x8x868xbf16, #tpu.memory_space<vmem>>, vector<1x1x8x256xbf16>
    %379 = vector.shape_cast %378 : vector<1x1x8x256xbf16> to vector<8x256xbf16>
    %c18_i32_251 = arith.constant 18 : i32
    %380 = vector.broadcast %c18_i32_251 : i32 to vector<1x256xi32>
    %381 = arith.addi %19, %380 : vector<1x256xi32>
    %c0_i32_252 = arith.constant 0 : i32
    %382 = vector.broadcast %c0_i32_252 : i32 to vector<1x256xi32>
    %383 = arith.cmpi sge, %381, %382 : vector<1x256xi32>
    %c18_i32_253 = arith.constant 18 : i32
    %384 = vector.broadcast %c18_i32_253 : i32 to vector<1x256xi32>
    %385 = arith.addi %19, %384 : vector<1x256xi32>
    %c16_i32_254 = arith.constant 16 : i32
    %386 = vector.broadcast %c16_i32_254 : i32 to vector<1x256xi32>
    %387 = arith.cmpi slt, %385, %386 : vector<1x256xi32>
    %388 = arith.andi %383, %387 : vector<1x256xi1>
    %cst_255 = arith.constant 0.000000e+00 : bf16
    %389 = vector.broadcast %cst_255 : bf16 to vector<8x256xbf16>
    %390 = vector.shape_cast %388 : vector<1x256xi1> to vector<1x256xi1>
    %391 = vector.broadcast %390 : vector<1x256xi1> to vector<8x256xi1>
    %392 = arith.select %391, %379, %389 : vector<8x256xi1>, vector<8x256xbf16>
    %c5_256 = arith.constant 5 : index
    %c0_257 = arith.constant 0 : index
    %c0_258 = arith.constant 0 : index
    %393 = vector.load %arg6[%c5_256, %c0_257, %c0_258] : memref<9x64x8xbf16, #tpu.memory_space<vmem>>, vector<1x64x8xbf16>
    %394 = vector.shape_cast %393 : vector<1x64x8xbf16> to vector<64x8xbf16>
    %cst_259 = arith.constant dense<0.000000e+00> : vector<64x256xf32>
    %395 = tpu.matmul %394, %392, %cst_259 {dimension_numbers = #tpu.dot_dimension_numbers<[1], [0], [0], [1], [0, 0, 1, 1], [], []>} : vector<64x8xbf16>, vector<8x256xbf16>, vector<64x256xf32> -> vector<64x256xf32>
    %396 = arith.addf %377, %395 : vector<64x256xf32>
    %c0_260 = arith.constant 0 : index
    %c0_261 = arith.constant 0 : index
    %c0_262 = arith.constant 0 : index
    %c576 = arith.constant 576 : index
    %397 = vector.load %arg2[%c0_260, %c0_261, %c0_262, %c576] : memref<1x1x8x868xbf16, #tpu.memory_space<vmem>>, vector<1x1x8x256xbf16>
    %398 = vector.shape_cast %397 : vector<1x1x8x256xbf16> to vector<8x256xbf16>
    %c-18_i32_263 = arith.constant -18 : i32
    %399 = vector.broadcast %c-18_i32_263 : i32 to vector<1x256xi32>
    %400 = arith.addi %19, %399 : vector<1x256xi32>
    %c0_i32_264 = arith.constant 0 : i32
    %401 = vector.broadcast %c0_i32_264 : i32 to vector<1x256xi32>
    %402 = arith.cmpi sge, %400, %401 : vector<1x256xi32>
    %c-18_i32_265 = arith.constant -18 : i32
    %403 = vector.broadcast %c-18_i32_265 : i32 to vector<1x256xi32>
    %404 = arith.addi %19, %403 : vector<1x256xi32>
    %c16_i32_266 = arith.constant 16 : i32
    %405 = vector.broadcast %c16_i32_266 : i32 to vector<1x256xi32>
    %406 = arith.cmpi slt, %404, %405 : vector<1x256xi32>
    %407 = arith.andi %402, %406 : vector<1x256xi1>
    %cst_267 = arith.constant 0.000000e+00 : bf16
    %408 = vector.broadcast %cst_267 : bf16 to vector<8x256xbf16>
    %409 = vector.shape_cast %407 : vector<1x256xi1> to vector<1x256xi1>
    %410 = vector.broadcast %409 : vector<1x256xi1> to vector<8x256xi1>
    %411 = arith.select %410, %398, %408 : vector<8x256xi1>, vector<8x256xbf16>
    %c6_268 = arith.constant 6 : index
    %c0_269 = arith.constant 0 : index
    %c0_270 = arith.constant 0 : index
    %412 = vector.load %arg6[%c6_268, %c0_269, %c0_270] : memref<9x64x8xbf16, #tpu.memory_space<vmem>>, vector<1x64x8xbf16>
    %413 = vector.shape_cast %412 : vector<1x64x8xbf16> to vector<64x8xbf16>
    %cst_271 = arith.constant dense<0.000000e+00> : vector<64x256xf32>
    %414 = tpu.matmul %413, %411, %cst_271 {dimension_numbers = #tpu.dot_dimension_numbers<[1], [0], [0], [1], [0, 0, 1, 1], [], []>} : vector<64x8xbf16>, vector<8x256xbf16>, vector<64x256xf32> -> vector<64x256xf32>
    %415 = arith.addf %396, %414 : vector<64x256xf32>
    %c0_272 = arith.constant 0 : index
    %c0_273 = arith.constant 0 : index
    %c0_274 = arith.constant 0 : index
    %c594 = arith.constant 594 : index
    %416 = vector.load %arg2[%c0_272, %c0_273, %c0_274, %c594] : memref<1x1x8x868xbf16, #tpu.memory_space<vmem>>, vector<1x1x8x256xbf16>
    %417 = vector.shape_cast %416 : vector<1x1x8x256xbf16> to vector<8x256xbf16>
    %c7_275 = arith.constant 7 : index
    %c0_276 = arith.constant 0 : index
    %c0_277 = arith.constant 0 : index
    %418 = vector.load %arg6[%c7_275, %c0_276, %c0_277] : memref<9x64x8xbf16, #tpu.memory_space<vmem>>, vector<1x64x8xbf16>
    %419 = vector.shape_cast %418 : vector<1x64x8xbf16> to vector<64x8xbf16>
    %cst_278 = arith.constant dense<0.000000e+00> : vector<64x256xf32>
    %420 = tpu.matmul %419, %417, %cst_278 {dimension_numbers = #tpu.dot_dimension_numbers<[1], [0], [0], [1], [0, 0, 1, 1], [], []>} : vector<64x8xbf16>, vector<8x256xbf16>, vector<64x256xf32> -> vector<64x256xf32>
    %421 = arith.addf %415, %420 : vector<64x256xf32>
    %c0_279 = arith.constant 0 : index
    %c0_280 = arith.constant 0 : index
    %c0_281 = arith.constant 0 : index
    %c612 = arith.constant 612 : index
    %422 = vector.load %arg2[%c0_279, %c0_280, %c0_281, %c612] : memref<1x1x8x868xbf16, #tpu.memory_space<vmem>>, vector<1x1x8x256xbf16>
    %423 = vector.shape_cast %422 : vector<1x1x8x256xbf16> to vector<8x256xbf16>
    %c18_i32_282 = arith.constant 18 : i32
    %424 = vector.broadcast %c18_i32_282 : i32 to vector<1x256xi32>
    %425 = arith.addi %19, %424 : vector<1x256xi32>
    %c0_i32_283 = arith.constant 0 : i32
    %426 = vector.broadcast %c0_i32_283 : i32 to vector<1x256xi32>
    %427 = arith.cmpi sge, %425, %426 : vector<1x256xi32>
    %c18_i32_284 = arith.constant 18 : i32
    %428 = vector.broadcast %c18_i32_284 : i32 to vector<1x256xi32>
    %429 = arith.addi %19, %428 : vector<1x256xi32>
    %c16_i32_285 = arith.constant 16 : i32
    %430 = vector.broadcast %c16_i32_285 : i32 to vector<1x256xi32>
    %431 = arith.cmpi slt, %429, %430 : vector<1x256xi32>
    %432 = arith.andi %427, %431 : vector<1x256xi1>
    %cst_286 = arith.constant 0.000000e+00 : bf16
    %433 = vector.broadcast %cst_286 : bf16 to vector<8x256xbf16>
    %434 = vector.shape_cast %432 : vector<1x256xi1> to vector<1x256xi1>
    %435 = vector.broadcast %434 : vector<1x256xi1> to vector<8x256xi1>
    %436 = arith.select %435, %423, %433 : vector<8x256xi1>, vector<8x256xbf16>
    %c8_287 = arith.constant 8 : index
    %c0_288 = arith.constant 0 : index
    %c0_289 = arith.constant 0 : index
    %437 = vector.load %arg6[%c8_287, %c0_288, %c0_289] : memref<9x64x8xbf16, #tpu.memory_space<vmem>>, vector<1x64x8xbf16>
    %438 = vector.shape_cast %437 : vector<1x64x8xbf16> to vector<64x8xbf16>
    %cst_290 = arith.constant dense<0.000000e+00> : vector<64x256xf32>
    %439 = tpu.matmul %438, %436, %cst_290 {dimension_numbers = #tpu.dot_dimension_numbers<[1], [0], [0], [1], [0, 0, 1, 1], [], []>} : vector<64x8xbf16>, vector<8x256xbf16>, vector<64x256xf32> -> vector<64x256xf32>
    %440 = arith.addf %421, %439 : vector<64x256xf32>
    %c0_291 = arith.constant 0 : index
    %c0_292 = arith.constant 0 : index
    %441 = vector.load %arg14[%c0_291, %c0_292] : memref<64x1xf32, #tpu.memory_space<vmem>>, vector<64x1xf32>
    %442 = vector.broadcast %441 : vector<64x1xf32> to vector<64x256xf32>
    %443 = arith.mulf %440, %442 : vector<64x256xf32>
    %c0_293 = arith.constant 0 : index
    %c0_294 = arith.constant 0 : index
    %444 = vector.load %arg15[%c0_293, %c0_294] : memref<64x1xf32, #tpu.memory_space<vmem>>, vector<64x1xf32>
    %445 = vector.broadcast %444 : vector<64x1xf32> to vector<64x256xf32>
    %446 = arith.addf %443, %445 : vector<64x256xf32>
    %cst_295 = arith.constant 0.000000e+00 : f32
    %447 = vector.broadcast %cst_295 : f32 to vector<64x256xf32>
    %448 = arith.maximumf %446, %447 : vector<64x256xf32>
    %449 = tpu.concatenate %31, %170, %309, %448 in 0 : vector<64x256xf32>, vector<64x256xf32>, vector<64x256xf32>, vector<64x256xf32> -> vector<256x256xf32>
    %450 = arith.truncf %449 : vector<256x256xf32> to vector<256x256xbf16>
    %c0_296 = arith.constant 0 : index
    %c0_297 = arith.constant 0 : index
    %451 = vector.load %arg7[%c0_296, %c0_297] : memref<64x256xbf16, #tpu.memory_space<vmem>>, vector<64x256xbf16>
    %cst_298 = arith.constant dense<0.000000e+00> : vector<64x256xf32>
    %452 = tpu.matmul %451, %450, %cst_298 {dimension_numbers = #tpu.dot_dimension_numbers<[1], [0], [0], [1], [0, 0, 1, 1], [], []>} : vector<64x256xbf16>, vector<256x256xbf16>, vector<64x256xf32> -> vector<64x256xf32>
    %c0_299 = arith.constant 0 : index
    %c0_300 = arith.constant 0 : index
    %453 = vector.load %arg16[%c0_299, %c0_300] : memref<64x1xf32, #tpu.memory_space<vmem>>, vector<64x1xf32>
    %454 = vector.broadcast %453 : vector<64x1xf32> to vector<64x256xf32>
    %455 = arith.mulf %452, %454 : vector<64x256xf32>
    %c0_301 = arith.constant 0 : index
    %c0_302 = arith.constant 0 : index
    %c0_303 = arith.constant 0 : index
    %456 = vector.load %arg17[%c0_301, %c0_302, %c0_303] : memref<1x64x1xf32, #tpu.memory_space<vmem>>, vector<1x64x1xf32>
    %457 = vector.shape_cast %456 : vector<1x64x1xf32> to vector<64x1xf32>
    %458 = vector.broadcast %457 : vector<64x1xf32> to vector<64x256xf32>
    %459 = arith.addf %455, %458 : vector<64x256xf32>
    %cst_304 = arith.constant 0.000000e+00 : f32
    %460 = vector.broadcast %cst_304 : f32 to vector<64x256xf32>
    %461 = arith.maximumf %459, %460 : vector<64x256xf32>
    %c0_305 = arith.constant 0 : index
    %c0_306 = arith.constant 0 : index
    %c0_307 = arith.constant 0 : index
    %462 = vector.load %arg18[%c0_305, %c0_306, %c0_307] : memref<1x64x256xf32, #tpu.memory_space<vmem>>, vector<1x64x256xf32>
    %463 = vector.shape_cast %462 : vector<1x64x256xf32> to vector<64x256xf32>
    %464 = vector.shape_cast %461 : vector<64x256xf32> to vector<1x64x256xf32>
    tpu.vector_store %arg18[%c0_305, %c0_306, %c0_307], %464 {strides = array<i32>} : memref<1x64x256xf32, #tpu.memory_space<vmem>>, vector<1x64x256xf32>,
    return
  }
  func.func @transform_0(%arg0: i32, %arg1: i32) -> (i32, i32, i32, i32) {
    %c0_i32 = arith.constant 0 : i32
    %c0_i32_0 = arith.constant 0 : i32
    %c0_i32_1 = arith.constant 0 : i32
    return %arg0, %arg1, %c0_i32, %c0_i32_0 : i32, i32, i32, i32
  }
  func.func @transform_1(%arg0: i32, %arg1: i32) -> (i32, i32) {
    %c0_i32 = arith.constant 0 : i32
    %c0_i32_0 = arith.constant 0 : i32
    %c0_i32_1 = arith.constant 0 : i32
    return %c0_i32, %c0_i32_0 : i32, i32
  }
  func.func @transform_2(%arg0: i32, %arg1: i32) -> (i32, i32, i32) {
    %c0_i32 = arith.constant 0 : i32
    %c0_i32_0 = arith.constant 0 : i32
    %c0_i32_1 = arith.constant 0 : i32
    %c0_i32_2 = arith.constant 0 : i32
    return %c0_i32, %c0_i32_0, %c0_i32_1 : i32, i32, i32
  }
  func.func @transform_3(%arg0: i32, %arg1: i32) -> (i32, i32, i32) {
    %c0_i32 = arith.constant 0 : i32
    %c0_i32_0 = arith.constant 0 : i32
    %c0_i32_1 = arith.constant 0 : i32
    %c0_i32_2 = arith.constant 0 : i32
    return %c0_i32, %c0_i32_0, %c0_i32_1 : i32, i32, i32
  }
  func.func @transform_4(%arg0: i32, %arg1: i32) -> (i32, i32, i32) {
    %c0_i32 = arith.constant 0 : i32
    %c0_i32_0 = arith.constant 0 : i32
    %c0_i32_1 = arith.constant 0 : i32
    %c0_i32_2 = arith.constant 0 : i32
    return %c0_i32, %c0_i32_0, %c0_i32_1 : i32, i32, i32
  }
  func.func @transform_5(%arg0: i32, %arg1: i32) -> (i32, i32) {
    %c0_i32 = arith.constant 0 : i32
    %c0_i32_0 = arith.constant 0 : i32
    %c0_i32_1 = arith.constant 0 : i32
    return %c0_i32, %c0_i32_0 : i32, i32
  }
  func.func @transform_6(%arg0: i32, %arg1: i32) -> (i32, i32) {
    %c0_i32 = arith.constant 0 : i32
    %c0_i32_0 = arith.constant 0 : i32
    %c0_i32_1 = arith.constant 0 : i32
    return %c0_i32, %c0_i32_0 : i32, i32
  }
  func.func @transform_7(%arg0: i32, %arg1: i32) -> (i32, i32) {
    %c0_i32 = arith.constant 0 : i32
    %c0_i32_0 = arith.constant 0 : i32
    %c0_i32_1 = arith.constant 0 : i32
    return %c0_i32, %c0_i32_0 : i32, i32
  }
  func.func @transform_8(%arg0: i32, %arg1: i32) -> (i32, i32) {
    %c0_i32 = arith.constant 0 : i32
    %c0_i32_0 = arith.constant 0 : i32
    %c0_i32_1 = arith.constant 0 : i32
    return %c0_i32, %c0_i32_0 : i32, i32
  }
  func.func @transform_9(%arg0: i32, %arg1: i32) -> (i32, i32) {
    %c0_i32 = arith.constant 0 : i32
    %c0_i32_0 = arith.constant 0 : i32
    %c0_i32_1 = arith.constant 0 : i32
    return %c0_i32, %c0_i32_0 : i32, i32
  }
  func.func @transform_10(%arg0: i32, %arg1: i32) -> (i32, i32) {
    %c0_i32 = arith.constant 0 : i32
    %c0_i32_0 = arith.constant 0 : i32
    %c0_i32_1 = arith.constant 0 : i32
    return %c0_i32, %c0_i32_0 : i32, i32
  }
  func.func @transform_11(%arg0: i32, %arg1: i32) -> (i32, i32) {
    %c0_i32 = arith.constant 0 : i32
    %c0_i32_0 = arith.constant 0 : i32
    %c0_i32_1 = arith.constant 0 : i32
    return %c0_i32, %c0_i32_0 : i32, i32
  }
  func.func @transform_12(%arg0: i32, %arg1: i32) -> (i32, i32) {
    %c0_i32 = arith.constant 0 : i32
    %c0_i32_0 = arith.constant 0 : i32
    %c0_i32_1 = arith.constant 0 : i32
    return %c0_i32, %c0_i32_0 : i32, i32
  }
  func.func @transform_13(%arg0: i32, %arg1: i32) -> (i32, i32) {
    %c0_i32 = arith.constant 0 : i32
    %c0_i32_0 = arith.constant 0 : i32
    %c0_i32_1 = arith.constant 0 : i32
    return %c0_i32, %c0_i32_0 : i32, i32
  }
  func.func @transform_14(%arg0: i32, %arg1: i32) -> (i32, i32) {
    %c0_i32 = arith.constant 0 : i32
    %c0_i32_0 = arith.constant 0 : i32
    %c0_i32_1 = arith.constant 0 : i32
    return %c0_i32, %c0_i32_0 : i32, i32
  }
  func.func @transform_15(%arg0: i32, %arg1: i32) -> (i32, i32, i32) {
    %c0_i32 = arith.constant 0 : i32
    %c0_i32_0 = arith.constant 0 : i32
    %c0_i32_1 = arith.constant 0 : i32
    return %arg0, %c0_i32, %c0_i32_0 : i32, i32, i32
  }
  func.func @transform_16(%arg0: i32, %arg1: i32) -> (i32, i32, i32) {
    %c0_i32 = arith.constant 0 : i32
    %c0_i32_0 = arith.constant 0 : i32
    return %arg0, %c0_i32, %arg1 : i32, i32, i32
  }
}

</mosaic_0001>

<bundles_post_ra>
// kernel: tpu_custom_call.1
= control target key start
LH: loop header
LB: loop body
LE: loop exit
PB: predicated region body
PF: predicated region fallthrough
CT: control target
= control target key end

     0   :  { %s9036_s0 = inlined_call_operand.vmem [shape: bf16[2,1,8,868], index: 0, kind: input, shape index: {}]   ;;  %s9037_s1 = inlined_call_operand.vmem [shape: bf16[64,8], index: 1, kind: input, shape index: {}]   ;;  %s9038_s2 = inlined_call_operand.vmem [shape: bf16[9,64,8], index: 2, kind: input, shape index: {}]   ;;  %s9039_s3 = inlined_call_operand.vmem [shape: bf16[9,64,8], index: 3, kind: input, shape index: {}]   ;;  %s9040_s4 = inlined_call_operand.vmem [shape: bf16[9,64,8], index: 4, kind: input, shape index: {}]   ;;  %s9041_s5 = inlined_call_operand.vmem [shape: bf16[64,256], index: 5, kind: input, shape index: {}]   ;;  %s9042_s6 = inlined_call_operand.vmem [shape: f32[64,1], index: 6, kind: input, shape index: {}]   ;;  %s9043_s7 = inlined_call_operand.vmem [shape: f32[64,1], index: 7, kind: input, shape index: {}]   ;;  %s9044_s8 = inlined_call_operand.vmem [shape: f32[64,1], index: 8, kind: input, shape index: {}]   ;;  %s9045_s9 = inlined_call_operand.vmem [shape: f32[64,1], index: 9, kind: input, shape index: {}]   ;;  %s9046_s10 = inlined_call_operand.vmem [shape: f32[64,1], index: 10, kind: input, shape index: {}]   ;;  %s9047_s11 = inlined_call_operand.vmem [shape: f32[64,1], index: 11, kind: input, shape index: {}]   ;;  %s9048_s12 = inlined_call_operand.vmem [shape: f32[64,1], index: 12, kind: input, shape index: {}]   ;;  %s9049_s13 = inlined_call_operand.vmem [shape: f32[64,1], index: 13, kind: input, shape index: {}]   ;;  %s9050_s14 = inlined_call_operand.vmem [shape: f32[64,1], index: 14, kind: input, shape index: {}]   ;;  %s9051_s15 = inlined_call_operand.vmem [shape: f32[2,64,1], index: 15, kind: input, shape index: {}]   ;;  %s9052_s16 = inlined_call_operand.hbm [shape: f32[2,64,256], index: 16, kind: output, shape index: {}]  }
   0x1   :  { %9078 = sst [smem:[#allocation54_spill]] %s9036_s0 }
   0x2   :  { %9079 = sst [smem:[#allocation55_spill]] %s9037_s1 }
   0x3   :  { %9080 = sst [smem:[#allocation56_spill]] %s9038_s2 }
   0x4   :  { %9081 = sst [smem:[#allocation57_spill]] %s9039_s3 }
   0x5   :  { %21 = vsyncpa [#allocation3], 0 }
   0x6   :  { %23 = vsyncpa [#allocation3 + $0x1], 0  ;;  %s6881_s21 = smov 0   ;;  %s6883_s22 = smov 0  }
   0x7   :  { %s6885_s23 = smov 0   ;;  %s6887_s24 = smov 0  }
   0x8   :  { %s6889_s25 = smov 0   ;;  %s6891_s26 = smov 0  }
   0x9 LB: > { %9082 = sst [smem:[#allocation5_spill]] %s6752_s25  ;;  %s5904_s27 = sadd.s32 4294967295, %s6756_s26   ;;  %s6756_s26 = sphi %s6891_s26, %s29_s26   ;;  %s6752_s25 = sphi %s6889_s25, %s9265_s25   ;;  %s6748_s24 = sphi %s6887_s24, %s9264_s24   ;;  %s6744_s23 = sphi %s6885_s23, %s9268_s23   ;;  %s6740_s22 = sphi %s6883_s22, %s9267_s22   ;;  %s6736_s21 = sphi %s6881_s21, %s9266_s21  }
   0xa   : > { %s5905_s28 = sadd.s32 4294967294, %s6756_s26   ;;  %s41_s29 = sadd.s32 1, %s6752_s25 }
   0xb   : > { %s398_s30 = sadd.s32 1, %s6744_s23  ;;  %p43_p0 = scmp.ge.s32.totalorder %s41_s29, 2 }
   0xc   : > { %p408_p1 = scmp.ne.s32.totalorder %s6744_s23, %s6740_s22  ;;  %p409_p2 = scmp.eq.s32.totalorder %s5904_s27, 1 }
   0xd   : > { %p414_p3 = scmp.ne.s32.totalorder %s6740_s22, %s6736_s21  ;;  %s9270_s29 = smov (%p43_p0, %s41_s29), 0 }
   0xe   : > { %9083 = sst [smem:[#allocation6_spill]] %s9270_s29  ;;  %p6921_p4 = por %p409_p2, %p408_p1 }
   0xf   : > { %p415_p5 = scmp.eq.s32.totalorder %s5905_s28, 1  ;;  %s393_s17 = ssub.s32 %s6752_s25, %s9270_s29 }
  0x10   : > { %p5908_p6 = scmp.ge.s32.totalorder %s6756_s26, 1  ;;  %p396_p7 = scmp.eq.s32.totalorder %s393_s17, 0 }
  0x11   : > { %p6928_p8 = por %p415_p5, %p414_p3  ;;  %p495_p9 = scmp.lt.s32.totalorder %s6756_s26, 3 }
  0x12   : > { %s6934_s19 = scalar_select %p396_p7, %s6744_s23, %s398_s30  }
  0x13   : > { %p496_p10 = pnand %p5908_p6, %p495_p9 }
  0x14   : > { %9086 = sst [smem:[#allocation7_spill]] %s6934_s19 }
  0x15   : > { %499 = sbr.rel (%p496_p10) target bundleno = 1337 (0x539), region = 84 }
  0x1a   : > { %v573_v0 = vlaneseq  ;;  %p554_p11 = scmp.lt.s32.totalorder %s6748_s24, 1  ;;  %v9065_v1 = vmov 0   ;;  %s9087_s17 = sld [smem:[#allocation54_spill]]  ;;  %vm906_vm12 = vcmask 621568   ;;  %vm647_vm13 = vcmask 637952  }
  0x1b   : > { %702 = vmatprep.mubr.bf16.mxu1 %v9065_v1  ;;  %1144 = vmatprep.mubr.bf16.mxu0 %v9065_v1  ;;  %s6759_s25 = smov 78   ;;  %s6761_s28 = smov 88   ;;  %vm1202_vm14 = vcmask 719872  }
  0x1c   : > { %v574_v2 = vand.u32 127, %v573_v0  ;;  %s6940_s20 = scalar_select %p554_p11, %s6748_s24, 1  ;;  %6533 = vset.pattern.permute.xlu1 %v9065_v1  ;;  %6534 = vset.pattern.permute.xlu0 %v9065_v1 }
  0x1d   : > { %s6762_s30 = smov 44   ;;  %s9092_s1 = sld [smem:[#allocation55_spill]] }
  0x1e   : > { %v575_v3 = vadd.s32 128, %v574_v2  ;;  %v583_v4 = vand.u32 15, %v574_v2  ;;  %s6440_s27 = smul.u32 28, %s6940_s20  ;;  %s9093_s2 = sld [smem:[#allocation56_spill]] }
  0x1f   : > { %s6781_s19 = smov 90   ;;  %s9114_s3 = sld [smem:[#allocation57_spill]] }
  0x20   : > { %v590_v5 = vand.u32 15, %v575_v3  ;;  %v889_v6 = vadd.s32 4294967290, %v583_v4  ;;  %s6948_s29 = scalar_lea.vmem %s9087_s17, %s6440_s27  ;;  %v1185_v7 = vadd.s32 6, %v583_v4  ;;  %s6760_s27 = smov 76   ;;  %v2440_v22 = vadd.s32 4294967284, %v583_v4 }
  0x21   : > { %v6951_v8 = vld [vmem:[%s6948_s29 + $0x8] sm:$0xff]  ;;  %v6959_v14 = vld [vmem:[%s6948_s29 + $0x10] sm:$0xf]  ;;  %s9055_s17 = smov 46   ;;  %v2736_v25 = vadd.s32 12, %v583_v4 }
  0x22   : > { %v890_v9 = vadd.s32 4294967290, %v590_v5  ;;  %vm891_vm0 = vcmp.ge.s32.totalorder %v889_v6, 0  ;;  %v5917_v10 = vcombine.low %v6951_v8, %v6951_v8  ;;  %v1186_v11 = vadd.s32 6, %v590_v5  ;;  %v887_v15 = vld [vmem:[%s6948_s29 + $0x4] sm:$0xff]  ;;  %v6969_v19 = vld [vmem:[%s6948_s29 + $0xc] sm:$0xf] }
  0x23   : > { %vm1189_vm1 = vcmp.lt.s32.totalorder %v1185_v7, 16  ;;  %v5918_v12 = vcombine.high %v6951_v8, %v6951_v8  ;;  %v5919_v17 = vcombine.low %v6959_v14, %v6959_v14  ;;  %v5938_v18 = vcombine.high %v887_v15, %v887_v15  ;;  %v6541_v52 = vld [vmem:[%s9092_s1] sm:$0xff]   ;;  %v6542_v7 = vld [vmem:[%s9092_s1 + $0x8] sm:$0xff]  }
  0x24   : > { %vm892_vm2 = vcmp.ge.s32.totalorder %v890_v9, 0  ;;  %641 = vrot.lane.b32.xlu1 %v5917_v10, %s6759_s25  ;;  %vm1190_vm3 = vcmp.lt.s32.totalorder %v1186_v11, 16  ;;  %v5937_v20 = vcombine.low %v887_v15, %v887_v15  ;;  %v5939_v21 = vcombine.low %v6969_v19, %v6969_v19 }
  0x25   : > { %vm901_vm4 = vmpackc.low %vm892_vm2, %vm891_vm0  ;;  %v2441_v23 = vadd.s32 4294967284, %v590_v5  ;;  %vm2442_vm6 = vcmp.ge.s32.totalorder %v2440_v22, 0  ;;  %v2737_v26 = vadd.s32 12, %v590_v5  ;;  %vm2740_vm9 = vcmp.lt.s32.totalorder %v2736_v25, 16  ;;  %v6544_v22 = vld [vmem:[%s9092_s1 + $0x18] sm:$0xff]  }
  0x26   : > { %v902_v13 = vsel %vm901_vm4, 65537, %v9065_v1  ;;  %vm1197_vm5 = vmpackc.low %vm1190_vm3, %vm1189_vm1  ;;  %vm663_vm1 = vcmask 1043456   ;;  %vm1364_vm2 = vcmask 359424  }
  0x27   : > { %903 = vrot.lane.b32.xlu0 %v902_v13, %s6760_s27  ;;  %v6963_v16 = vsel %vm1197_vm5, 65537, %v9065_v1  ;;  %s6764_s27 = smov 56   ;;  %vm2443_vm7 = vcmp.ge.s32.totalorder %v2441_v23, 0  ;;  %vm2741_vm10 = vcmp.lt.s32.totalorder %v2737_v26, 16 }
  0x28   : > { %643 = vrot.lane.b32.xlu1 %v5918_v12, %s6759_s25  ;;  %vm6977_vm8 = vmpackc.low %vm2443_vm7, %vm2442_vm6  ;;  %vm963_vm6 = vcmask 375808  }
  0x29   : > { %vm6981_vm11 = vmpackc.low %vm2741_vm10, %vm2740_vm9  ;;  %vm650_vm9 = vcmask 64512   ;;  %vm1656_vm10 = vcmask 457728  }
  0x2a   : > { %v7044_v25 = vsel %vm6981_vm11, 65537, %v9065_v1  ;;  %vm1251_vm11 = vcmask 326656  }
  0x2b   : > { %1199 = vrot.lane.b32.xlu0 %v6963_v16, %s6761_s28  ;;  %s6766_s28 = smov 52  }
  0x2c   : > { %1361 = vrot.lane.b32.xlu1 %v902_v13, %s6762_s30  ;;  %s6769_s30 = smov 72  }
  0x2f   : > { %645 = vrot.lane.b32.xlu0 %v5919_v17, %s6759_s25  ;;  %s6765_s25 = smov 12   ;;  %v7022_v17 = vld [vmem:[%s6948_s29 + $0x14] sm:$0xf] }
  0x30   : > { %959 = vrot.lane.b32.xlu1 %v5938_v18, %s9055_s17  ;;  %v2453_v18 = vsel %vm6977_vm8, 65537, %v9065_v1  ;;  %v7050_v26 = vcombine.low %v7022_v17, %v7022_v17  ;;  %vm1091_vm8 = vcmask 424960  }
  0x33   : > { %957 = vrot.lane.b32.xlu0 %v5937_v20, %s9055_s17 }
  0x34   : > { %1653 = vrot.lane.b32.xlu1 %v6963_v16, %s6764_s27  ;;  %s9120_s27 = smov 110  }
  0x37   : > { %961 = vrot.lane.b32.xlu0 %v5939_v21, %s9055_s17  ;;  %s6770_s17 = smov 24  }
  0x38   : > { %1817 = vrot.lane.b32.xlu1 %v902_v13, %s6765_s25  ;;  %s6767_s25 = smov 40   ;;  %v7016_v13 = vld [vmem:[%s6948_s29 + $0xc] sm:$0xff] }
  0x39   : > { %v7037_v24 = vcombine.low %v7016_v13, %v7016_v13  ;;  %v7058_v27 = vcombine.high %v7016_v13, %v7016_v13 }
  0x96   : > { %v642_v28 = vpop.permute.xlu1 %641 }
  0x99   : > { %v904_v29 = vpop.permute.xlu0 %903 }
  0x9a   : > { %v905_v30 = vrot.slane %v904_v29, 4  ;;  %v644_v31 = vpop.permute.xlu1 %643 }
  0x9b   : > { %v648_v37 = vsel %vm647_vm13, %v642_v28, %v644_v31  ;;  %v6545_v28 = vld [vmem:[%s9093_s2 + $0x20] sm:$0xff]  }
  0x9c   : > { %v907_v32 = vsel %vm906_vm12, %v905_v30, %v904_v29  ;;  %vm909_vm15 = vcmp.ne.s16.totalorder %v905_v30, 0  ;;  %v6988_v45 = vsel %vm663_vm1, %v648_v37, 0  ;;  %v6546_v29 = vld [vmem:[%s9093_s2 + $0x28] sm:$0xff]   ;;  %v6548_v30 = vld [vmem:[%s9093_s2 + $0x30] sm:$0xff]  }
  0x9d   : > { %vm908_vm0 = vcmp.ne.s16.totalorder %v907_v32, 0  ;;  %v1200_v33 = vpop.permute.xlu0 %1199  ;;  %v911_v34 = vsel %vm909_vm15, %v6969_v19, 0 }
  0x9e   : > { %v910_v35 = vsel %vm908_vm0, %v887_v15, 0  ;;  %v1201_v36 = vrot.slane %v1200_v33, 4  ;;  %v5951_v38 = vcombine.low %v911_v34, %v911_v34  ;;  %v1362_v39 = vpop.permute.xlu1 %1361 }
  0x9f   : > { %v5950_v40 = vcombine.high %v910_v35, %v910_v35  ;;  %v1363_v41 = vrot.slane %v1362_v39, 4  ;;  %v5949_v48 = vcombine.low %v910_v35, %v910_v35 }
  0xa0   : > { %v1203_v42 = vsel %vm1202_vm14, %v1201_v36, %v1200_v33  ;;  %1089 = vrot.lane.b32.xlu0 %v5951_v38, %s6766_s28  ;;  %vm1205_vm7 = vcmp.ne.s16.totalorder %v1201_v36, 0 }
  0xa1   : > { %vm1204_vm3 = vcmp.ne.s16.totalorder %v1203_v42, 0  ;;  %v646_v43 = vpop.permute.xlu0 %645  ;;  %1087 = vrot.lane.b32.xlu1 %v5950_v40, %s6766_s28  ;;  %v1365_v44 = vsel %vm1364_vm2, %v1363_v41, %v1362_v39  ;;  %vm1367_vm5 = vcmp.ne.s16.totalorder %v1363_v41, 0  ;;  %v1207_v59 = vsel %vm1205_vm7, %v6969_v19, 0  ;;  %v6552_v39 = vld [vmem:[%s9093_s2] sm:$0xff]  }
  0xa2   : > { %v1206_v46 = vsel %vm1204_vm3, %v887_v15, 0  ;;  %v6991_v47 = vsel %vm647_vm13, %v644_v31, %v646_v43  ;;  %vm1366_vm4 = vcmp.ne.s16.totalorder %v1365_v44, 0  ;;  %v960_v49 = vpop.permute.xlu1 %959  ;;  %v1369_v56 = vsel %vm1367_vm5, %v6959_v14, 0  ;;  %v6543_v15 = vld [vmem:[%s9092_s1 + $0x10] sm:$0xff]   ;;  %v6551_v31 = vld [vmem:[%s9093_s2 + $0x38] sm:$0xff]   ;;  %s6782_s1 = smov 66  }
  0xa3   : > { %5920 = vmatprep.subr.msk.bf16.mxu1 %vm663_vm1, %v6991_v47  ;;  %v1368_v50 = vsel %vm1366_vm4, %v6951_v8, 0  ;;  %v5970_v51 = vcombine.high %v1206_v46, %v1206_v46  ;;  %v5969_v55 = vcombine.low %v1206_v46, %v1206_v46  ;;  %v5991_v61 = vcombine.low %v1369_v56, %v1369_v56 }
  0xa4   : > { %1085 = vrot.lane.b32.xlu0 %v5949_v48, %s6766_s28  ;;  %685 = vmatpush1.bf16.msra.mxu1 %v6988_v45  ;;  %v5989_v53 = vcombine.low %v1368_v50, %v1368_v50  ;;  %s6768_s28 = smov 84   ;;  %v5971_v0 = vcombine.low %v1207_v59, %v1207_v59  ;;  %vm1820_vm13 = vcmask 97280   ;;  %v5990_v10 = vcombine.high %v1368_v50, %v1368_v50  ;;  %v6564_v59 = vld [vmem:[%s9093_s2 + $0x48] sm:$0xff]  }
  0xa5   : > { %1247 = vrot.lane.b32.xlu1 %v5970_v51, %s6767_s25  ;;  %v958_v54 = vpop.permute.xlu0 %957  ;;  %vm1413_vm2 = vcmask 687104   ;;  %v6557_v51 = vld [vmem:[%s9093_s2 + $0x8] sm:$0xff]   ;;  %vm2135_vm3 = vcmask 195584   ;;  %vm2457_vm5 = vcmask 834560  }
  0xa6   : > { %v1654_v57 = vpop.permute.xlu1 %1653  ;;  %v964_v58 = vsel %vm963_vm6, %v958_v54, %v960_v49 }
  0xa7   : > { %v1655_v60 = vrot.slane %v1654_v57, 4  ;;  %5921 = vmatmul.mubr.msk.bf16.vlgmr.msra.gmra.mxu1 %vm650_vm9, %v6541_v52  ;;  %v979_v62 = vsel %vm663_vm1, %v964_v58, 0 }
  0xa8   : > { %1245 = vrot.lane.b32.xlu0 %v5969_v55, %s6767_s25  ;;  %712 = vmatprep.mubr.bf16.mxu1 %v9065_v1 }
  0xa9   : > { %1407 = vrot.lane.b32.xlu1 %v5989_v53, %s6768_s28  ;;  %vm1659_vm12 = vcmp.ne.s16.totalorder %v1655_v60, 0  ;;  %v962_v63 = vpop.permute.xlu0 %961  ;;  %v1657_v2 = vsel %vm1656_vm10, %v1655_v60, %v1654_v57  ;;  %vm1705_vm10 = vcmask 588800  }
  0xaa   : > { %v1818_v3 = vpop.permute.xlu1 %1817  ;;  %v1661_v4 = vsel %vm1659_vm12, %v6959_v14, 0  ;;  %v965_v5 = vsel %vm963_vm6, %v960_v49, %v962_v63  ;;  %vm1658_vm14 = vcmp.ne.s16.totalorder %v1657_v2, 0  ;;  %v6553_v49 = vld [vmem:[%s9093_s2 + $0x40] sm:$0xff]   ;;  %v6558_v2 = vld [vmem:[%s9093_s2 + $0x10] sm:$0xff]  }
  0xab   : > { %v1819_v6 = vrot.slane %v1818_v3, 4  ;;  %5940 = vmatprep.subr.msk.bf16.mxu1 %vm663_vm1, %v965_v5  ;;  %v6028_v9 = vcombine.low %v1661_v4, %v1661_v4  ;;  %v1660_v12 = vsel %vm1658_vm14, %v6951_v8, 0  ;;  %v2438_v63 = vld [vmem:[%s6948_s29] sm:$0xff] }
  0xac   : > { %1249 = vrot.lane.b32.xlu0 %v5971_v0, %s6767_s25  ;;  %999 = vmatpush1.bf16.msra.mxu1 %v979_v62  ;;  %v6026_v14 = vcombine.low %v1660_v12, %v1660_v12  ;;  %v6027_v21 = vcombine.high %v1660_v12, %v1660_v12  ;;  %s6772_s25 = smov 116  }
  0xad   : > { %1411 = vrot.lane.b32.xlu1 %v5991_v61, %s6768_s28  ;;  %v1821_v11 = vsel %vm1820_vm13, %v1819_v6, %v1818_v3  ;;  %vm1823_vm0 = vcmp.ne.s16.totalorder %v1819_v6, 0  ;;  %vm1869_vm13 = vcmask 949248  }
  0xae   : > { %vm1822_vm15 = vcmp.ne.s16.totalorder %v1821_v11, 0  ;;  %v1825_v20 = vsel %vm1823_vm0, %v7022_v17, 0  ;;  %v2439_v11 = vld [vmem:[%s6948_s29 + $0x8] sm:$0xf] }
  0xaf   : > { %5922 = vmatmul.mubr.msk.bf16.gmra.mxu1 %vm650_vm9, %v6542_v7  ;;  %v1824_v8 = vsel %vm1822_vm15, %v7016_v13, 0  ;;  %vm2753_vm15 = vcmask 1031168  }
  0xb0   : > { %1409 = vrot.lane.b32.xlu0 %v5990_v10, %s6768_s28  ;;  %722 = vmatprep.mubr.bf16.mxu1 %v9065_v1  ;;  %v6046_v19 = vcombine.low %v1824_v8, %v1824_v8  ;;  %s6771_s28 = smov 102   ;;  %v6047_v23 = vcombine.high %v1824_v8, %v1824_v8  ;;  %v6566_v8 = vld [vmem:[%s9093_s2 + $0x50] sm:$0xff]  }
  0xb1   : > { %1703 = vrot.lane.b32.xlu1 %v6028_v9, %s6769_s30  ;;  %v7122_v9 = vcombine.low %v2438_v63, %v2438_v63 }
  0xb4   : > { %2132 = vrot.lane.b32.xlu0 %v6963_v16, %s6770_s17  ;;  %v6048_v16 = vcombine.low %v1825_v20, %v1825_v20  ;;  %s6775_s17 = smov 38  }
  0xb5   : > { %1699 = vrot.lane.b32.xlu1 %v6026_v14, %s6769_s30 }
  0xb7   : > { %5923 = vmatmul.mubr.msk.bf16.gmra.mxu1 %vm650_vm9, %v6543_v15 }
  0xb8   : > { %2454 = vrot.lane.b32.xlu0 %v2453_v18, %s6771_s28  ;;  %732 = vmatprep.mubr.bf16.mxu1 %v9065_v1  ;;  %s9057_s28 = smov 110  }
  0xb9   : > { %1863 = vrot.lane.b32.xlu1 %v6046_v19, %s6772_s25  ;;  %v7137_v19 = vcombine.high %v2438_v63, %v2438_v63 }
  0xbc   : > { %1701 = vrot.lane.b32.xlu0 %v6027_v21, %s6769_s30  ;;  %s6778_s30 = smov 62  }
  0xbd   : > { %1867 = vrot.lane.b32.xlu1 %v6048_v16, %s6772_s25  ;;  %v6559_v16 = vld [vmem:[%s9093_s2 + $0x18] sm:$0xff]  }
  0xbf   : > { %5924 = vmatmul.mubr.msk.bf16.gmra.mxu1 %vm650_vm9, %v6544_v22 }
  0xc0   : > { %1865 = vrot.lane.b32.xlu0 %v6047_v23, %s6772_s25  ;;  %1016 = vmatprep.mubr.bf16.mxu1 %v9065_v1  ;;  %s6774_s25 = smov 126  }
  0xc1   : > { %2016 = vrot.lane.b32.xlu1 %v7037_v24, %s9057_s28 }
  0xc4   : > { %2750 = vrot.lane.b32.xlu0 %v7044_v25, %s6774_s25  ;;  %s9059_s25 = smov 14  }
  0xc5   : > { %2020 = vrot.lane.b32.xlu1 %v7050_v26, %s9057_s28 }
  0xc7   : > { %5941 = vmatmul.mubr.msk.bf16.vlgmr.msra.gmra.mxu1 %vm650_vm9, %v6545_v28 }
  0xc8   : > { %1026 = vmatprep.mubr.bf16.mxu1 %v9065_v1  ;;  %2018 = vrot.lane.b32.xlu0 %v7058_v27, %s9057_s28  ;;  %s6776_s28 = smov 104  }
  0xcc   : > { %2912 = vrot.lane.b32.xlu0 %v2453_v18, %s6775_s17  ;;  %v7135_v18 = vcombine.low %v2439_v11, %v2439_v11  ;;  %s9063_s17 = smov 26  }
  0xcf   : > { %5942 = vmatmul.mubr.msk.bf16.gmra.mxu1 %vm650_vm9, %v6546_v29 }
  0xd0   : > { %1036 = vmatprep.mubr.bf16.mxu1 %v9065_v1 }
  0xd7   : > { %5943 = vmatmul.mubr.msk.bf16.gmra.mxu1 %vm650_vm9, %v6548_v30 }
  0xd8   : > { %1046 = vmatprep.mubr.bf16.mxu1 %v9065_v1 }
  0xdf   : > { %5944 = vmatmul.mubr.msk.bf16.gmra.mxu1 %vm650_vm9, %v6551_v31 }
  0xe0   : > { %1304 = vmatprep.mubr.bf16.mxu1 %v9065_v1 }
 0x112   : > { %v1090_v32 = vpop.permute.xlu0 %1089 }
 0x113   : > { %v1088_v33 = vpop.permute.xlu1 %1087 }
 0x114   : > { %v1093_v34 = vsel %vm1091_vm8, %v1088_v33, %v1090_v32 }
 0x115   : > { %5952 = vmatprep.subr.msk.bf16.mxu0 %vm663_vm1, %v1093_v34 }
 0x116   : > { %v1086_v35 = vpop.permute.xlu0 %1085 }
 0x117   : > { %v1248_v36 = vpop.permute.xlu1 %1247  ;;  %v1092_v37 = vsel %vm1091_vm8, %v1086_v35, %v1088_v33  ;;  %v6568_v33 = vld [vmem:[%s9093_s2 + $0x58] sm:$0xff]   ;;  %v6592_v35 = vld [vmem:[%s9114_s3] sm:$0xff]  }
 0x118   : > { %v1107_v38 = vsel %vm663_vm1, %v1092_v37, 0 }
 0x119   : > { %1127 = vmatpush1.bf16.msra.mxu0 %v1107_v38 }
 0x11a   : > { %v1246_v40 = vpop.permute.xlu0 %1245 }
 0x11b   : > { %v1408_v41 = vpop.permute.xlu1 %1407  ;;  %v1252_v42 = vsel %vm1251_vm11, %v1246_v40, %v1248_v36 }
 0x11c   : > { %5953 = vmatmul.mubr.msk.bf16.vlgmr.msra.gmra.mxu0 %vm650_vm9, %v6552_v39  ;;  %v1267_v48 = vsel %vm663_vm1, %v1252_v42, 0 }
 0x11d   : > { %1154 = vmatprep.mubr.bf16.mxu0 %v9065_v1 }
 0x11e   : > { %v1250_v43 = vpop.permute.xlu0 %1249 }
 0x11f   : > { %v1253_v44 = vsel %vm1251_vm11, %v1248_v36, %v1250_v43  ;;  %v1412_v46 = vpop.permute.xlu1 %1411  ;;  %vm2022_vm11 = vcmask 900096  }
 0x120   : > { %5972 = vmatprep.subr.msk.bf16.mxu1 %vm663_vm1, %v1253_v44 }
 0x121   : > { %1287 = vmatpush1.bf16.msra.mxu1 %v1267_v48 }
 0x122   : > { %v1410_v50 = vpop.permute.xlu0 %1409  ;;  %6009 = vmatprep.subr.msk.bf16.mxu1 %vm663_vm1, %v6991_v47 }
 0x123   : > { %v1414_v52 = vsel %vm1413_vm2, %v1408_v41, %v1410_v50  ;;  %v1415_v53 = vsel %vm1413_vm2, %v1410_v50, %v1412_v46  ;;  %v1704_v54 = vpop.permute.xlu1 %1703  ;;  %vm2915_vm2 = vcmask 310272  }
 0x124   : > { %5992 = vmatprep.subr.msk.bf16.mxu0 %vm663_vm1, %v1415_v53  ;;  %5973 = vmatmul.mubr.msk.bf16.vlgmr.msra.gmra.mxu1 %vm650_vm9, %v6553_v49  ;;  %v1429_v55 = vsel %vm663_vm1, %v1414_v52, 0  ;;  %v6570_v52 = vld [vmem:[%s9093_s2 + $0x80] sm:$0xff]  }
 0x125   : > { %1449 = vmatpush1.bf16.msra.mxu0 %v1429_v55  ;;  %1579 = vmatpush1.bf16.msra.mxu1 %v6988_v45 }
 0x126   : > { %v2133_v56 = vpop.permute.xlu0 %2132  ;;  %5954 = vmatmul.mubr.msk.bf16.gmra.mxu0 %vm650_vm9, %v6557_v51  ;;  %1314 = vmatprep.mubr.bf16.mxu1 %v9065_v1 }
 0x127   : > { %v2134_v57 = vrot.slane %v2133_v56, 4  ;;  %1164 = vmatprep.mubr.bf16.mxu0 %v9065_v1  ;;  %v7105_v58 = vpop.permute.xlu1 %1699 }
 0x129   : > { %v2136_v60 = vsel %vm2135_vm3, %v2134_v57, %v2133_v56  ;;  %vm2138_vm7 = vcmp.ne.s16.totalorder %v2134_v57, 0  ;;  %v6561_v56 = vld [vmem:[%s9093_s2 + $0x68] sm:$0xff]  }
 0x12a   : > { %vm2137_vm4 = vcmp.ne.s16.totalorder %v2136_v60, 0  ;;  %v2455_v61 = vpop.permute.xlu0 %2454  ;;  %v2140_v7 = vsel %vm2138_vm7, %v7022_v17, 0  ;;  %v7207_v57 = vld [vmem:[%s6948_s29 + $0x8] sm:$0xff]  ;;  %vm2514_vm7 = vcmask 113664  }
 0x12b   : > { %v2139_v62 = vsel %vm2137_vm4, %v7016_v13, 0  ;;  %v2456_v0 = vrot.slane %v2455_v61, 4  ;;  %v7115_v3 = vpop.permute.xlu1 %1863  ;;  %v6088_v15 = vcombine.low %v2140_v7, %v2140_v7 }
 0x12c   : > { %v6087_v4 = vcombine.high %v2139_v62, %v2139_v62  ;;  %v6086_v5 = vcombine.low %v2139_v62, %v2139_v62  ;;  %5974 = vmatmul.mubr.msk.bf16.gmra.mxu1 %vm650_vm9, %v6564_v59  ;;  %v7211_v59 = vld [vmem:[%s6948_s29 + $0x10] sm:$0xf] }
 0x12d   : > { %v7118_v6 = vsel %vm2457_vm5, %v2456_v0, %v2455_v61  ;;  %1324 = vmatprep.mubr.bf16.mxu1 %v9065_v1  ;;  %vm7145_vm14 = vcmp.ne.s16.totalorder %v2456_v0, 0  ;;  %v6572_v0 = vld [vmem:[%s9093_s2 + $0x88] sm:$0xff]   ;;  %vm2184_vm5 = vcmask 850944  }
 0x12e   : > { %2180 = vrot.lane.b32.xlu0 %v6087_v4, %s6776_s28  ;;  %2178 = vrot.lane.b32.xlu1 %v6086_v5, %s6776_s28  ;;  %v1702_v10 = vpop.permute.xlu0 %1701  ;;  %vm2459_vm12 = vcmp.ne.s16.totalorder %v7118_v6, 0  ;;  %v2462_v32 = vsel %vm7145_vm14, %v2439_v11, 0  ;;  %v6563_v4 = vld [vmem:[%s9093_s2 + $0x78] sm:$0xff]  }
 0x12f   : > { %5955 = vmatmul.mubr.msk.bf16.gmra.mxu0 %vm650_vm9, %v6558_v2  ;;  %v1707_v12 = vsel %vm1705_vm10, %v1702_v10, %v1704_v54  ;;  %v1868_v14 = vpop.permute.xlu1 %1867  ;;  %v2461_v21 = vsel %vm2459_vm12, %v2438_v63, 0  ;;  %v6120_v37 = vcombine.low %v2462_v32, %v2462_v32  ;;  %v1706_v38 = vsel %vm1705_vm10, %v7105_v58, %v1702_v10  ;;  %v6562_v2 = vld [vmem:[%s9093_s2 + $0x70] sm:$0xff]   ;;  %v6576_v5 = vld [vmem:[%s9093_s2 + $0x98] sm:$0xff]   ;;  %v6565_v10 = vld [vmem:[%s9093_s2 + $0xa0] sm:$0xff]  }
 0x130   : > { %1174 = vmatprep.mubr.bf16.mxu0 %v9065_v1  ;;  %6029 = vmatprep.subr.msk.bf16.mxu0 %vm663_vm1, %v1707_v12  ;;  %v6118_v30 = vcombine.low %v2461_v21, %v2461_v21  ;;  %v6119_v36 = vcombine.high %v2461_v21, %v2461_v21  ;;  %v1721_v43 = vsel %vm663_vm1, %v1706_v38, 0  ;;  %v6578_v12 = vld [vmem:[%s9093_s2 + $0xc0] sm:$0xff]   ;;  %v6569_v21 = vld [vmem:[%s9093_s2 + $0xb0] sm:$0xff]   ;;  %v6584_v32 = vld [vmem:[%s9093_s2 + $0xd8] sm:$0xff]   ;;  %vm3207_vm10 = vcmask 506880  }
 0x131   : > { %v6575_v38 = vld [vmem:[%s9093_s2 + $0xe8] sm:$0xff]  }
 0x132   : > { %2508 = vrot.lane.b32.xlu0 %v7122_v9, %s9059_s25  ;;  %2182 = vrot.lane.b32.xlu1 %v6088_v15, %s6776_s28  ;;  %v1866_v20 = vpop.permute.xlu0 %1865  ;;  %s9118_s28 = smov 14  }
 0x133   : > { %v1871_v22 = vsel %vm1869_vm13, %v1866_v20, %v1868_v14  ;;  %v7152_v28 = vpop.permute.xlu1 %2016  ;;  %v1870_v50 = vsel %vm1869_vm13, %v7115_v3, %v1866_v20  ;;  %v6574_v3 = vld [vmem:[%s9093_s2 + $0x90] sm:$0xff]   ;;  %v6567_v14 = vld [vmem:[%s9093_s2 + $0xa8] sm:$0xff]   ;;  %vm2642_vm13 = vcmask 211968  }
 0x134   : > { %5975 = vmatmul.mubr.msk.bf16.gmra.mxu1 %vm650_vm9, %v6566_v8  ;;  %6049 = vmatprep.subr.msk.bf16.mxu1 %vm663_vm1, %v1871_v22  ;;  %v1885_v55 = vsel %vm663_vm1, %v1870_v50, 0  ;;  %v6580_v8 = vld [vmem:[%s9093_s2 + $0xc8] sm:$0xff]  }
 0x135   : > { %1334 = vmatprep.mubr.bf16.mxu1 %v9065_v1 }
 0x136   : > { %2512 = vrot.lane.b32.xlu0 %v7135_v18, %s9059_s25  ;;  %2510 = vrot.lane.b32.xlu1 %v7137_v19, %s9059_s25  ;;  %v2751_v29 = vpop.permute.xlu0 %2750  ;;  %s9119_s25 = smov 2  }
 0x137   : > { %v2752_v31 = vrot.slane %v2751_v29, 4  ;;  %5956 = vmatmul.mubr.msk.bf16.gmra.mxu0 %vm650_vm9, %v6559_v16  ;;  %v2021_v42 = vpop.permute.xlu1 %2020 }
 0x138   : > { %1466 = vmatprep.mubr.bf16.mxu0 %v9065_v1 }
 0x139   : > { %v7165_v34 = vsel %vm2753_vm15, %v2752_v31, %v2751_v29  ;;  %vm7167_vm0 = vcmp.ne.s16.totalorder %v2752_v31, 0  ;;  %v6571_v29 = vld [vmem:[%s9093_s2 + $0xb8] sm:$0xff]  }
 0x13a   : > { %3204 = vrot.lane.b32.xlu1 %v7044_v25, %s6778_s30  ;;  %vm2755_vm8 = vcmp.ne.s16.totalorder %v7165_v34, 0  ;;  %2636 = vrot.lane.b32.xlu0 %v6118_v30, %s9063_s17  ;;  %v7176_v39 = vpop.permute.xlu0 %2018  ;;  %v2758_v41 = vsel %vm7167_vm0, %v2439_v11, 0  ;;  %v6560_v25 = vld [vmem:[%s9093_s2 + $0x60] sm:$0xff]   ;;  %s9061_s30 = smov 2  }
 0x13b   : > { %v2757_v40 = vsel %vm2755_vm8, %v2438_v63, 0  ;;  %v6140_v44 = vcombine.low %v2758_v41, %v2758_v41  ;;  %v2024_v48 = vsel %vm2022_vm11, %v7176_v39, %v2021_v42  ;;  %v2023_v7 = vsel %vm2022_vm11, %v7152_v28, %v7176_v39  ;;  %v6582_v28 = vld [vmem:[%s9093_s2 + $0xd0] sm:$0xff]  }
 0x13c   : > { %5976 = vmatmul.mubr.msk.bf16.gmra.mxu1 %vm650_vm9, %v6568_v33  ;;  %v6139_v46 = vcombine.high %v2757_v40, %v2757_v40  ;;  %v6138_v54 = vcombine.low %v2757_v40, %v2757_v40  ;;  %v2038_v11 = vsel %vm663_vm1, %v2023_v7, 0  ;;  %v6573_v33 = vld [vmem:[%s9093_s2 + $0xe0] sm:$0xff]   ;;  %v6577_v41 = vld [vmem:[%s9093_s2 + $0xf0] sm:$0xff]  }
 0x13d   : > { %1596 = vmatprep.mubr.bf16.mxu1 %v9065_v1 }
 0x13e   : > { %2638 = vrot.lane.b32.xlu1 %v6119_v36, %s9063_s17  ;;  %2640 = vrot.lane.b32.xlu0 %v6120_v37, %s9063_s17  ;;  %v2913_v49 = vpop.permute.xlu0 %2912  ;;  %s9117_s17 = smov 26  }
 0x13f   : > { %5993 = vmatmul.mubr.msk.bf16.vlgmr.msra.gmra.mxu0 %vm650_vm9, %v6560_v25  ;;  %v2914_v51 = vrot.slane %v2913_v49, 4 }
 0x140   : > { %1476 = vmatprep.mubr.bf16.mxu0 %v9065_v1  ;;  %1741 = vmatpush1.bf16.msra.mxu0 %v1721_v43  ;;  %v6579_v43 = vld [vmem:[%s9093_s2 + $0xf8] sm:$0xff]  }
 0x141   : > { %6069 = vmatprep.subr.msk.bf16.mxu0 %vm663_vm1, %v2024_v48  ;;  %v2916_v53 = vsel %vm2915_vm2, %v2914_v51, %v2913_v49  ;;  %vm2918_vm3 = vcmp.ne.s16.totalorder %v2914_v51, 0 }
 0x142   : > { %2800 = vrot.lane.b32.xlu1 %v6140_v44, %s9061_s30  ;;  %2798 = vrot.lane.b32.xlu0 %v6139_v46, %s9061_s30  ;;  %vm2917_vm4 = vcmp.ne.s16.totalorder %v2916_v53, 0  ;;  %v2920_v60 = vsel %vm2918_vm3, %v7211_v59, 0  ;;  %vm2802_vm3 = vcmask 15360  }
 0x143   : > { %v2919_v58 = vsel %vm2917_vm4, %v7207_v57, 0  ;;  %v6160_v62 = vcombine.low %v2920_v60, %v2920_v60  ;;  %v6586_v60 = vld [vmem:[%s9093_s2 + $0x100] sm:$0xff]  }
 0x144   : > { %6010 = vmatmul.mubr.msk.bf16.vlgmr.msra.gmra.mxu1 %vm650_vm9, %v6570_v52  ;;  %v6158_v61 = vcombine.low %v2919_v58, %v2919_v58  ;;  %v6159_v63 = vcombine.high %v2919_v58, %v2919_v58 }
 0x145   : > { %1606 = vmatprep.mubr.bf16.mxu1 %v9065_v1  ;;  %1905 = vmatpush1.bf16.msra.mxu1 %v1885_v55 }
 0x146   : > { %2796 = vrot.lane.b32.xlu1 %v6138_v54, %s9061_s30  ;;  %2958 = vrot.lane.b32.xlu0 %v6158_v61, %s6781_s19  ;;  %s6786_s30 = smov 68  }
 0x147   : > { %5994 = vmatmul.mubr.msk.bf16.gmra.mxu0 %vm650_vm9, %v6561_v56 }
 0x148   : > { %1486 = vmatprep.mubr.bf16.mxu0 %v9065_v1 }
 0x14a   : > { %2962 = vrot.lane.b32.xlu0 %v6160_v62, %s6781_s19  ;;  %2960 = vrot.lane.b32.xlu1 %v6159_v63, %s6781_s19  ;;  %s6788_s19 = smov 92  }
 0x14c   : > { %6011 = vmatmul.mubr.msk.bf16.gmra.mxu1 %vm650_vm9, %v6572_v0 }
 0x14d   : > { %1616 = vmatprep.mubr.bf16.mxu1 %v9065_v1 }
 0x14f   : > { %5995 = vmatmul.mubr.msk.bf16.gmra.mxu0 %vm650_vm9, %v6562_v2 }
 0x150   : > { %1496 = vmatprep.mubr.bf16.mxu0 %v9065_v1 }
 0x154   : > { %6012 = vmatmul.mubr.msk.bf16.gmra.mxu1 %vm650_vm9, %v6574_v3 }
 0x155   : > { %1626 = vmatprep.mubr.bf16.mxu1 %v9065_v1 }
 0x157   : > { %5996 = vmatmul.mubr.msk.bf16.gmra.mxu0 %vm650_vm9, %v6563_v4  ;;  %v6581_v4 = vld [vmem:[%s9114_s3 + $0x20] sm:$0xff]  }
 0x158   : > { %1758 = vmatprep.mubr.bf16.mxu0 %v9065_v1 }
 0x15c   : > { %6013 = vmatmul.mubr.msk.bf16.gmra.mxu1 %vm650_vm9, %v6576_v5 }
 0x15d   : > { %1922 = vmatprep.mubr.bf16.mxu1 %v9065_v1 }
 0x15f   : > { %6030 = vmatmul.mubr.msk.bf16.vlgmr.msra.gmra.mxu0 %vm650_vm9, %v6565_v10 }
 0x160   : > { %1768 = vmatprep.mubr.bf16.mxu0 %v9065_v1  ;;  %2058 = vmatpush1.bf16.msra.mxu0 %v2038_v11 }
 0x164   : > { %6050 = vmatmul.mubr.msk.bf16.vlgmr.msra.gmra.mxu1 %vm650_vm9, %v6578_v12  ;;  %v6588_v12 = vld [vmem:[%s9093_s2 + $0x108] sm:$0xff]  }
 0x165   : > { %1932 = vmatprep.mubr.bf16.mxu1 %v9065_v1 }
 0x167   : > { %6031 = vmatmul.mubr.msk.bf16.gmra.mxu0 %vm650_vm9, %v6567_v14  ;;  %v7262_v15 = vpop.f32.mrf.mxu1 }
 0x168   : > { %9098 = vst [vmem:[#allocation8_spill] sm:$0xff] %v7262_v15  ;;  %1778 = vmatprep.mubr.bf16.mxu0 %v9065_v1 }
 0x169   : > { %v7268_v20 = vpop.f32.mrf.mxu1 }
 0x16a   : > { %9099 = vst [vmem:[#allocation9_spill] sm:$0xff] %v7268_v20 }
 0x16b   : > { %v7273_v16 = vpop.f32.mrf.mxu1 }
 0x16c   : > { %9100 = vst [vmem:[#allocation10_spill] sm:$0xff] %v7273_v16  ;;  %6051 = vmatmul.mubr.msk.bf16.gmra.mxu1 %vm650_vm9, %v6580_v8 }
 0x16d   : > { %1942 = vmatprep.mubr.bf16.mxu1 %v9065_v1  ;;  %v7278_v22 = vpop.f32.mrf.mxu1 }
 0x16e   : > { %9101 = vst [vmem:[#allocation11_spill] sm:$0xff] %v7278_v22 }
 0x16f   : > { %6032 = vmatmul.mubr.msk.bf16.gmra.mxu0 %vm650_vm9, %v6569_v21  ;;  %v7287_v30 = vpop.f32.mrf.mxu1 }
 0x170   : > { %1788 = vmatprep.mubr.bf16.mxu0 %v9065_v1  ;;  %9102 = vst [vmem:[#allocation12_spill] sm:$0xff] %v7287_v30 }
 0x171   : > { %v7292_v31 = vpop.f32.mrf.mxu1 }
 0x172   : > { %9103 = vst [vmem:[#allocation13_spill] sm:$0xff] %v7292_v31 }
 0x173   : > { %v7301_v36 = vpop.f32.mrf.mxu1 }
 0x174   : > { %6052 = vmatmul.mubr.msk.bf16.gmra.mxu1 %vm650_vm9, %v6582_v28  ;;  %9104 = vst [vmem:[#allocation14_spill] sm:$0xff] %v7301_v36 }
 0x175   : > { %1952 = vmatprep.mubr.bf16.mxu1 %v9065_v1  ;;  %v7306_v37 = vpop.f32.mrf.mxu1 }
 0x176   : > { %9105 = vst [vmem:[#allocation15_spill] sm:$0xff] %v7306_v37 }
 0x177   : > { %6033 = vmatmul.mubr.msk.bf16.gmra.mxu0 %vm650_vm9, %v6571_v29  ;;  %v7312_v39 = vpop.f32.mrf.mxu1 }
 0x178   : > { %2075 = vmatprep.mubr.bf16.mxu0 %v9065_v1  ;;  %9106 = vst [vmem:[#allocation16_spill] sm:$0xff] %v7312_v39 }
 0x179   : > { %v7315_v40 = vpop.f32.mrf.mxu1 }
 0x17a   : > { %9107 = vst [vmem:[#allocation17_spill] sm:$0xff] %v7315_v40 }
 0x17b   : > { %v7321_v25 = vpop.f32.mrf.mxu1 }
 0x17c   : > { %6053 = vmatmul.mubr.msk.bf16.gmra.mxu1 %vm650_vm9, %v6584_v32  ;;  %9108 = vst [vmem:[#allocation18_spill] sm:$0xff] %v7321_v25 }
 0x17d   : > { %2237 = vmatprep.mubr.bf16.mxu1 %v9065_v1  ;;  %v7324_v42 = vpop.f32.mrf.mxu1 }
 0x17e   : > { %9109 = vst [vmem:[#allocation19_spill] sm:$0xff] %v7324_v42 }
 0x17f   : > { %6070 = vmatmul.mubr.msk.bf16.vlgmr.msra.gmra.mxu0 %vm650_vm9, %v6573_v33  ;;  %v7330_v44 = vpop.f32.mrf.mxu1 }
 0x180   : > { %2085 = vmatprep.mubr.bf16.mxu0 %v9065_v1  ;;  %9110 = vst [vmem:[#allocation20_spill] sm:$0xff] %v7330_v44 }
 0x181   : > { %v7333_v46 = vpop.f32.mrf.mxu1 }
 0x182   : > { %9111 = vst [vmem:[#allocation21_spill] sm:$0xff] %v7333_v46 }
 0x183   : > { %v7336_v48 = vpop.f32.mrf.mxu1 }
 0x184   : > { %9112 = vst [vmem:[#allocation22_spill] sm:$0xff] %v7336_v48 }
 0x185   : > { %v7338_v49 = vpop.f32.mrf.mxu1 }
 0x186   : > { %9113 = vst [vmem:[#allocation23_spill] sm:$0xff] %v7338_v49 }
 0x187   : > { %6071 = vmatmul.mubr.msk.bf16.gmra.mxu0 %vm650_vm9, %v6575_v38  ;;  %v7340_v53 = vpop.f32.mrf.mxu1 }
 0x188   : > { %2095 = vmatprep.mubr.bf16.mxu0 %v9065_v1 }
 0x189   : > { %v7347_v61 = vpop.f32.mrf.mxu1 }
 0x18b   : > { %v7358_v5 = vpop.f32.mrf.mxu1 }
 0x18d   : > { %v7365_v8 = vpop.f32.mrf.mxu1 }
 0x18f   : > { %6072 = vmatmul.mubr.msk.bf16.gmra.mxu0 %vm650_vm9, %v6577_v41 }
 0x190   : > { %2105 = vmatprep.mubr.bf16.mxu0 %v9065_v1 }
 0x197   : > { %6073 = vmatmul.mubr.msk.bf16.gmra.mxu0 %vm650_vm9, %v6579_v43  ;;  %v6583_v43 = vld [vmem:[%s9114_s3 + $0x28] sm:$0xff]  }
 0x198   : > { %2567 = vmatprep.mubr.bf16.mxu0 %v9065_v1 }
 0x1a0   : > { %v2181_v50 = vpop.permute.xlu0 %2180  ;;  %v2179_v51 = vpop.permute.xlu1 %2178 }
 0x1a1   : > { %v2185_v52 = vsel %vm2184_vm5, %v2179_v51, %v2181_v50  ;;  %v3367_v51 = vsel %vm7145_vm14, %v7022_v17, 0  ;;  %vm6783_vm14 = vmmov 0  }
 0x1a2   : > { %v2200_v58 = vsel %vm663_vm1, %v2185_v52, 0  ;;  %vm7386_vm4 = vmpackc.low %vm6783_vm14, %vm6783_vm14 }
 0x1a4   : > { %v2509_v54 = vpop.permute.xlu0 %2508  ;;  %v2183_v55 = vpop.permute.xlu1 %2182 }
 0x1a5   : > { %v2186_v56 = vsel %vm2184_vm5, %v2181_v50, %v2183_v55  ;;  %vm2964_vm5 = vcmask 736256  }
 0x1a6   : > { %6089 = vmatprep.subr.msk.bf16.mxu1 %vm663_vm1, %v2186_v56 }
 0x1a7   : > { %2220 = vmatpush1.bf16.msra.mxu1 %v2200_v58 }
 0x1a8   : > { %v2513_v62 = vpop.permute.xlu0 %2512  ;;  %v2511_v63 = vpop.permute.xlu1 %2510 }
 0x1a9   : > { %v2515_v0 = vsel %vm2514_vm7, %v2509_v54, %v2511_v63  ;;  %v2516_v2 = vsel %vm2514_vm7, %v2511_v63, %v2513_v62  ;;  %v7381_v54 = vpop.f32.mrf.mxu1  ;;  %v6590_v63 = vld [vmem:[%s9093_s2 + $0x110] sm:$0xff]  }
 0x1aa   : > { %6109 = vmatprep.subr.msk.bf16.mxu0 %vm663_vm1, %v2516_v2  ;;  %v2530_v3 = vsel %vm663_vm1, %v2515_v0, 0  ;;  %6090 = vmatmul.mubr.msk.bf16.vlgmr.msra.gmra.mxu1 %vm650_vm9, %v6586_v60  ;;  %v6217_v60 = vcombine.low %v3367_v51, %v3367_v51 }
 0x1ab   : > { %2550 = vmatpush1.bf16.msra.mxu0 %v2530_v3  ;;  %2247 = vmatprep.mubr.bf16.mxu1 %v9065_v1  ;;  %v7394_v0 = vpop.f32.mrf.mxu1 }
 0x1ac   : > { %v3205_v7 = vpop.permute.xlu1 %3204  ;;  %v2637_v10 = vpop.permute.xlu0 %2636 }
 0x1ad   : > { %v3206_v11 = vrot.slane %v3205_v7, 4 }
 0x1ae   : > { %6110 = vmatmul.mubr.msk.bf16.vlgmr.msra.gmra.mxu0 %vm650_vm9, %v6581_v4 }
 0x1af   : > { %v3208_v14 = vsel %vm3207_vm10, %v3206_v11, %v3205_v7  ;;  %2577 = vmatprep.mubr.bf16.mxu0 %v9065_v1  ;;  %vm3210_vm2 = vcmp.ne.s16.totalorder %v3206_v11, 0  ;;  %v7401_v7 = vsel %vm7386_vm4, 65537, %v9065_v1  ;;  %v6585_v11 = vld [vmem:[%s9114_s3 + $0x30] sm:$0xff]  }
 0x1b0   : > { %vm3209_vm15 = vcmp.ne.s16.totalorder %v3208_v14, 0  ;;  %v2639_v21 = vpop.permute.xlu1 %2638  ;;  %v2641_v28 = vpop.permute.xlu0 %2640  ;;  %v3212_v52 = vsel %vm3210_vm2, %v7211_v59, 0  ;;  %vm4701_vm2 = vcmask 556032  }
 0x1b1   : > { %v3211_v29 = vsel %vm3209_vm15, %v7207_v57, 0  ;;  %v2643_v32 = vsel %vm2642_vm13, %v2637_v10, %v2639_v21  ;;  %v2644_v33 = vsel %vm2642_vm13, %v2639_v21, %v2641_v28  ;;  %v6197_v62 = vcombine.low %v3212_v52, %v3212_v52  ;;  %v7412_v14 = vpop.f32.mrf.mxu1 }
 0x1b2   : > { %v6196_v38 = vcombine.high %v3211_v29, %v3211_v29  ;;  %v6195_v41 = vcombine.low %v3211_v29, %v3211_v29  ;;  %6091 = vmatmul.mubr.msk.bf16.gmra.mxu1 %vm650_vm9, %v6588_v12  ;;  %6121 = vmatprep.subr.msk.bf16.mxu1 %vm663_vm1, %v2644_v33  ;;  %v2658_v50 = vsel %vm663_vm1, %v2643_v32, 0  ;;  %v3366_v12 = vsel %vm2459_vm12, %v7016_v13, 0  ;;  %v6591_v33 = vld [vmem:[%s9093_s2 + $0x118] sm:$0xff]  }
 0x1b3   : > { %2257 = vmatprep.mubr.bf16.mxu1 %v9065_v1  ;;  %2678 = vmatpush1.bf16.msra.mxu1 %v2658_v50  ;;  %v6215_v6 = vcombine.low %v3366_v12, %v3366_v12  ;;  %v6216_v32 = vcombine.high %v3366_v12, %v3366_v12  ;;  %vm3256_vm12 = vcmask 539648  }
 0x1b4   : > { %3252 = vrot.lane.b32.xlu0 %v6196_v38, %s6782_s1  ;;  %3250 = vrot.lane.b32.xlu1 %v6195_v41, %s6782_s1  ;;  %v2801_v55 = vpop.permute.xlu1 %2800  ;;  %v2799_v56 = vpop.permute.xlu0 %2798  ;;  %v6587_v38 = vld [vmem:[%s9114_s3 + $0x38] sm:$0xff]   ;;  %v3665_v41 = vsel %vm7167_vm0, %v7022_v17, 0  ;;  %v3664_v17 = vsel %vm2755_vm8, %v7016_v13, 0  ;;  %vm4246_vm0 = vcmask 293888  }
 0x1b5   : > { %v2804_v58 = vsel %vm2802_vm3, %v2799_v56, %v2801_v55  ;;  %v6254_v51 = vcombine.low %v3665_v41, %v3665_v41  ;;  %v6252_v52 = vcombine.low %v3664_v17, %v3664_v17  ;;  %v6589_v55 = vld [vmem:[%s9114_s3 + $0x40] sm:$0xff]   ;;  %v6253_v34 = vcombine.high %v3664_v17, %v3664_v17 }
 0x1b6   : > { %6111 = vmatmul.mubr.msk.bf16.gmra.mxu0 %vm650_vm9, %v6583_v43  ;;  %6141 = vmatprep.subr.msk.bf16.mxu0 %vm663_vm1, %v2804_v58 }
 0x1b7   : > { %2587 = vmatprep.mubr.bf16.mxu0 %v9065_v1 }
 0x1b8   : > { %3409 = vrot.lane.b32.xlu0 %v6217_v60, %s9117_s17  ;;  %3254 = vrot.lane.b32.xlu1 %v6197_v62, %s6782_s1  ;;  %v2797_v2 = vpop.permute.xlu1 %2796  ;;  %v2959_v3 = vpop.permute.xlu0 %2958  ;;  %s6784_s1 = smov 36  }
 0x1b9   : > { %v2803_v4 = vsel %vm2802_vm3, %v2797_v2, %v2799_v56  ;;  %v6593_v56 = vld [vmem:[%s9114_s3 + $0x8] sm:$0xff]  }
 0x1ba   : > { %v2818_v10 = vsel %vm663_vm1, %v2803_v4, 0  ;;  %6092 = vmatmul.mubr.msk.bf16.gmra.mxu1 %vm650_vm9, %v6590_v63 }
 0x1bb   : > { %2838 = vmatpush1.bf16.msra.mxu0 %v2818_v10  ;;  %2267 = vmatprep.mubr.bf16.mxu1 %v9065_v1 }
 0x1bc   : > { %3549 = vrot.lane.b32.xlu0 %v7037_v24, %s9118_s28  ;;  %4243 = vrot.lane.b32.xlu1 %v7401_v7, %s6784_s1  ;;  %v2963_v21 = vpop.permute.xlu0 %2962  ;;  %v2961_v28 = vpop.permute.xlu1 %2960  ;;  %s6787_s1 = smov 64  }
 0x1bd   : > { %6178 = vmatprep.subr.msk.bf16.mxu0 %vm663_vm1, %v6991_v47  ;;  %v2966_v29 = vsel %vm2964_vm5, %v2961_v28, %v2963_v21  ;;  %v7428_v24 = vpop.f32.mrf.mxu1  ;;  %v2965_v50 = vsel %vm2964_vm5, %v2959_v3, %v2961_v28  ;;  %v6597_v3 = vld [vmem:[%s9114_s3 + $0x18] sm:$0xff]  }
 0x1be   : > { %6112 = vmatmul.mubr.msk.bf16.gmra.mxu0 %vm650_vm9, %v6585_v11  ;;  %6161 = vmatprep.subr.msk.bf16.mxu1 %vm663_vm1, %v2966_v29  ;;  %v6598_v21 = vld [vmem:[%s9114_s3 + $0x58] sm:$0xff]  }
 0x1bf   : > { %2597 = vmatprep.mubr.bf16.mxu0 %v9065_v1  ;;  %v7442_v43 = vpop.f32.mrf.mxu1 }
 0x1c0   : > { %3405 = vrot.lane.b32.xlu0 %v6215_v6, %s9117_s17  ;;  %3407 = vrot.lane.b32.xlu1 %v6216_v32, %s9117_s17  ;;  %s6791_s17 = smov 60  }
 0x1c2   : > { %6093 = vmatmul.mubr.msk.bf16.gmra.mxu1 %vm650_vm9, %v6591_v33 }
 0x1c3   : > { %2695 = vmatprep.mubr.bf16.mxu1 %v9065_v1 }
 0x1c4   : > { %3553 = vrot.lane.b32.xlu0 %v7050_v26, %s9118_s28  ;;  %3551 = vrot.lane.b32.xlu1 %v7058_v27, %s9118_s28  ;;  %s6785_s28 = smov 32   ;;  %v7455_v26 = vpop.f32.mrf.mxu1  ;;  %v2980_v27 = vsel %vm663_vm1, %v2965_v50, 0 }
 0x1c6   : > { %6113 = vmatmul.mubr.msk.bf16.gmra.mxu0 %vm650_vm9, %v6587_v38  ;;  %v7466_v13 = vpop.f32.mrf.mxu1 }
 0x1c7   : > { %2855 = vmatprep.mubr.bf16.mxu0 %v9065_v1 }
 0x1c8   : > { %3707 = vrot.lane.b32.xlu0 %v6254_v51, %s9119_s25  ;;  %4406 = vrot.lane.b32.xlu1 %v7401_v7, %s6785_s28  ;;  %v7477_v58 = vpop.f32.mrf.mxu1  ;;  %s6790_s28 = smov 100  }
 0x1ca   : > { %6122 = vmatmul.mubr.msk.bf16.vlgmr.msra.gmra.mxu1 %vm650_vm9, %v6592_v35  ;;  %v7487_v60 = vpop.f32.mrf.mxu1 }
 0x1cb   : > { %2705 = vmatprep.mubr.bf16.mxu1 %v9065_v1  ;;  %3000 = vmatpush1.bf16.msra.mxu1 %v2980_v27 }
 0x1cc   : > { %3703 = vrot.lane.b32.xlu0 %v6252_v52, %s9119_s25  ;;  %4014 = vrot.lane.b32.xlu1 %v7122_v9, %s9120_s27  ;;  %v6594_v9 = vld [vmem:[%s9114_s3 + $0x48] sm:$0xff]   ;;  %v7496_v62 = vpop.f32.mrf.mxu1 }
 0x1ce   : > { %6142 = vmatmul.mubr.msk.bf16.vlgmr.msra.gmra.mxu0 %vm650_vm9, %v6589_v55  ;;  %v7503_v63 = vpop.f32.mrf.mxu1 }
 0x1cf   : > { %3130 = vmatpush1.bf16.msra.mxu0 %v6988_v45  ;;  %2865 = vmatprep.mubr.bf16.mxu0 %v9065_v1 }
 0x1d0   : > { %3705 = vrot.lane.b32.xlu1 %v6253_v34, %s9119_s25  ;;  %4016 = vrot.lane.b32.xlu0 %v7137_v19, %s9120_s27  ;;  %v6595_v19 = vld [vmem:[%s9114_s3 + $0x10] sm:$0xff]   ;;  %v7510_v10 = vpop.f32.mrf.mxu1 }
 0x1d2   : > { %6123 = vmatmul.mubr.msk.bf16.gmra.mxu1 %vm650_vm9, %v6593_v56 }
 0x1d3   : > { %2715 = vmatprep.mubr.bf16.mxu1 %v9065_v1 }
 0x1d4   : > { %4698 = vrot.lane.b32.xlu0 %v7401_v7, %s6786_s30  ;;  %4018 = vrot.lane.b32.xlu1 %v7135_v18, %s9120_s27  ;;  %v6596_v18 = vld [vmem:[%s9114_s3 + $0x50] sm:$0xff]   ;;  %s6789_s30 = smov 96   ;;  %s6792_s27 = smov 28  }
 0x1d6   : > { %6143 = vmatmul.mubr.msk.bf16.gmra.mxu0 %vm650_vm9, %v6594_v9 }
 0x1d7   : > { %2875 = vmatprep.mubr.bf16.mxu0 %v9065_v1 }
 0x1d8   : > { %4862 = vrot.lane.b32.xlu1 %v7401_v7, %s6787_s1 }
 0x1da   : > { %6124 = vmatmul.mubr.msk.bf16.gmra.mxu1 %vm650_vm9, %v6595_v19  ;;  %v6601_v19 = vld [vmem:[%s9114_s3 + $0x68] sm:$0xff]  }
 0x1db   : > { %2725 = vmatprep.mubr.bf16.mxu1 %v9065_v1 }
 0x1dc   : > { %v1146_v2 = vpop.f32.mrf.mxu0 }
 0x1dd   : > { %v1147_v12 = vadd.f32 %v1146_v2, %v7340_v53  ;;  %v6599_v53 = vld [vmem:[%s9114_s3 + $0x60] sm:$0xff]  }
 0x1de   : > { %6144 = vmatmul.mubr.msk.bf16.gmra.mxu0 %vm650_vm9, %v6596_v18  ;;  %v1148_v4 = vpop.f32.mrf.mxu0 }
 0x1df   : > { %2885 = vmatprep.mubr.bf16.mxu0 %v9065_v1  ;;  %v1149_v29 = vadd.f32 %v1148_v4, %v7347_v61 }
 0x1e0   : > { %v1150_v11 = vpop.f32.mrf.mxu0 }
 0x1e1   : > { %v1151_v33 = vadd.f32 %v1150_v11, %v7358_v5  ;;  %v6600_v5 = vld [vmem:[%s9114_s3 + $0x80] sm:$0xff]  }
 0x1e2   : > { %6125 = vmatmul.mubr.msk.bf16.gmra.mxu1 %vm650_vm9, %v6597_v3  ;;  %v7517_v28 = vpop.f32.mrf.mxu0 }
 0x1e3   : > { %3017 = vmatprep.mubr.bf16.mxu1 %v9065_v1 }
 0x1e4   : > { %v1306_v6 = vpop.f32.mrf.mxu1 }
 0x1e5   : > { %v7521_v32 = vadd.f32 %v1306_v6, %v1147_v12 }
 0x1e6   : > { %6145 = vmatmul.mubr.msk.bf16.gmra.mxu0 %vm650_vm9, %v6598_v21  ;;  %v1308_v38 = vpop.f32.mrf.mxu1  ;;  %v1156_v41 = vpop.f32.mrf.mxu0 }
 0x1e7   : > { %3147 = vmatprep.mubr.bf16.mxu0 %v9065_v1  ;;  %v7529_v50 = vadd.f32 %v1308_v38, %v1149_v29  ;;  %v1157_v17 = vadd.f32 %v1156_v41, %v7381_v54  ;;  %v6603_v41 = vld [vmem:[%s9114_s3 + $0x70] sm:$0xff]  }
 0x1e8   : > { %v1310_v51 = vpop.f32.mrf.mxu1  ;;  %v1158_v35 = vpop.f32.mrf.mxu0 }
 0x1e9   : > { %v7531_v61 = vadd.f32 %v1310_v51, %v1151_v33  ;;  %v1159_v55 = vadd.f32 %v1158_v35, %v7394_v0 }
 0x1ea   : > { %6162 = vmatmul.mubr.msk.bf16.vlgmr.msra.gmra.mxu1 %vm650_vm9, %v6599_v53  ;;  %v7538_v27 = vpop.f32.mrf.mxu1  ;;  %v1160_v52 = vpop.f32.mrf.mxu0 }
 0x1eb   : > { %9121 = vst [vmem:[#allocation24_spill] sm:$0xff] %v7538_v27  ;;  %3027 = vmatprep.mubr.bf16.mxu1 %v9065_v1  ;;  %v1161_v54 = vadd.f32 %v1160_v52, %v7412_v14  ;;  %v6602_v14 = vld [vmem:[%s9114_s3 + $0x88] sm:$0xff]  }
 0x1ec   : > { %v1316_v34 = vpop.f32.mrf.mxu1  ;;  %v7542_v56 = vpop.f32.mrf.mxu0 }
 0x1ed   : > { %v7544_v9 = vadd.f32 %v1316_v34, %v1157_v17 }
 0x1ee   : > { %6179 = vmatmul.mubr.msk.bf16.vlgmr.msra.gmra.mxu0 %vm650_vm9, %v6600_v5  ;;  %v1318_v18 = vpop.f32.mrf.mxu1 }
 0x1ef   : > { %3157 = vmatprep.mubr.bf16.mxu0 %v9065_v1  ;;  %v7552_v2 = vadd.f32 %v1318_v18, %v1159_v55  ;;  %v1166_v3 = vpop.f32.mrf.mxu0 }
 0x1f0   : > { %v1320_v0 = vpop.f32.mrf.mxu1  ;;  %v1167_v11 = vadd.f32 %v1166_v3, %v7442_v43 }
 0x1f1   : > { %v7554_v4 = vadd.f32 %v1320_v0, %v1161_v54  ;;  %v1168_v12 = vpop.f32.mrf.mxu0 }
 0x1f2   : > { %6163 = vmatmul.mubr.msk.bf16.gmra.mxu1 %vm650_vm9, %v6601_v19  ;;  %v7561_v21 = vpop.f32.mrf.mxu1  ;;  %v1169_v29 = vadd.f32 %v1168_v12, %v7455_v26 }
 0x1f3   : > { %3037 = vmatprep.mubr.bf16.mxu1 %v9065_v1  ;;  %v1170_v6 = vpop.f32.mrf.mxu0 }
 0x1f4   : > { %v1326_v33 = vpop.f32.mrf.mxu1  ;;  %v1171_v38 = vadd.f32 %v1170_v6, %v7466_v13  ;;  %v6604_v13 = vld [vmem:[%s9114_s3 + $0x90] sm:$0xff]  }
 0x1f5   : > { %v7565_v53 = vadd.f32 %v1326_v33, %v1167_v11  ;;  %v7568_v43 = vpop.f32.mrf.mxu0 }
 0x1f6   : > { %6180 = vmatmul.mubr.msk.bf16.gmra.mxu0 %vm650_vm9, %v6602_v14  ;;  %v1328_v51 = vpop.f32.mrf.mxu1 }
 0x1f7   : > { %3167 = vmatprep.mubr.bf16.mxu0 %v9065_v1  ;;  %v1354_v35 = vadd.f32 %v1328_v51, %v1169_v29  ;;  %v1176_v17 = vpop.f32.mrf.mxu0 }
 0x1f8   : > { %v1330_v26 = vpop.f32.mrf.mxu1  ;;  %v1177_v52 = vadd.f32 %v1176_v17, %v7487_v60  ;;  %v6605_v60 = vld [vmem:[%s9114_s3 + $0x78] sm:$0xff]  }
 0x1f9   : > { %v1355_v5 = vadd.f32 %v1330_v26, %v1171_v38  ;;  %v1178_v55 = vpop.f32.mrf.mxu0 }
 0x1fa   : > { %6164 = vmatmul.mubr.msk.bf16.gmra.mxu1 %vm650_vm9, %v6603_v41  ;;  %v7580_v34 = vpop.f32.mrf.mxu1  ;;  %v1179_v54 = vadd.f32 %v1178_v55, %v7496_v62 }
 0x1fb   : > { %3047 = vmatprep.mubr.bf16.mxu1 %v9065_v1  ;;  %v1180_v19 = vpop.f32.mrf.mxu0 }
 0x1fc   : > { %v1336_v18 = vpop.f32.mrf.mxu1  ;;  %v1181_v0 = vadd.f32 %v1180_v19, %v7503_v63  ;;  %v6606_v63 = vld [vmem:[%s9114_s3 + $0x98] sm:$0xff]  }
 0x1fd   : > { %v1357_v3 = vadd.f32 %v1336_v18, %v1177_v52  ;;  %v7585_v11 = vpop.f32.mrf.mxu0 }
 0x1fe   : > { %6181 = vmatmul.mubr.msk.bf16.gmra.mxu0 %vm650_vm9, %v6604_v13  ;;  %v1338_v12 = vpop.f32.mrf.mxu1 }
 0x1ff   : > { %3177 = vmatprep.mubr.bf16.mxu0 %v9065_v1  ;;  %v1358_v14 = vadd.f32 %v1338_v12, %v1179_v54  ;;  %v1468_v29 = vpop.f32.mrf.mxu0 }
 0x200   : > { %v1340_v6 = vpop.f32.mrf.mxu1  ;;  %v1507_v62 = vadd.f32 %v1468_v29, %v7521_v32 }
 0x201   : > { %v1359_v33 = vadd.f32 %v1340_v6, %v1181_v0  ;;  %v1470_v38 = vpop.f32.mrf.mxu0 }
 0x202   : > { %6165 = vmatmul.mubr.msk.bf16.gmra.mxu1 %vm650_vm9, %v6605_v60  ;;  %v7597_v41 = vpop.f32.mrf.mxu1  ;;  %v1508_v51 = vadd.f32 %v1470_v38, %v7529_v50 }
 0x203   : > { %3309 = vmatprep.mubr.bf16.mxu1 %v9065_v1  ;;  %v1472_v17 = vpop.f32.mrf.mxu0 }
 0x204   : > { %v1598_v26 = vpop.f32.mrf.mxu1  ;;  %v1509_v52 = vadd.f32 %v1472_v17, %v7531_v61 }
 0x205   : > { %v1637_v55 = vadd.f32 %v1598_v26, %v1507_v62  ;;  %v7602_v32 = vpop.f32.mrf.mxu0 }
 0x206   : > { %9122 = vst [vmem:[#allocation25_spill] sm:$0xff] %v7602_v32  ;;  %6182 = vmatmul.mubr.msk.bf16.gmra.mxu0 %vm650_vm9, %v6606_v63  ;;  %v1600_v13 = vpop.f32.mrf.mxu1 }
 0x207   : > { %3463 = vmatprep.mubr.bf16.mxu0 %v9065_v1  ;;  %v1638_v54 = vadd.f32 %v1600_v13, %v1508_v51  ;;  %v1478_v19 = vpop.f32.mrf.mxu0 }
 0x208   : > { %v1602_v18 = vpop.f32.mrf.mxu1  ;;  %v1511_v0 = vadd.f32 %v1478_v19, %v7544_v9 }
 0x209   : > { %v1639_v50 = vadd.f32 %v1602_v18, %v1509_v52  ;;  %v1480_v60 = vpop.f32.mrf.mxu0 }
 0x20a   : > { %v7607_v12 = vpop.f32.mrf.mxu1  ;;  %v1512_v29 = vadd.f32 %v1480_v60, %v7552_v2 }
 0x20b   : > { %9123 = vst [vmem:[#allocation26_spill] sm:$0xff] %v7607_v12  ;;  %v1482_v61 = vpop.f32.mrf.mxu0 }
 0x20c   : > { %v1608_v6 = vpop.f32.mrf.mxu1  ;;  %v1513_v62 = vadd.f32 %v1482_v61, %v7554_v4 }
 0x20d   : > { %v1641_v38 = vadd.f32 %v1608_v6, %v1511_v0  ;;  %v7611_v63 = vpop.f32.mrf.mxu0 }
 0x20e   : > { %v1610_v17 = vpop.f32.mrf.mxu1 }
 0x20f   : > { %v1642_v26 = vadd.f32 %v1610_v17, %v1512_v29  ;;  %v1488_v51 = vpop.f32.mrf.mxu0 }
 0x210   : > { %v1612_v13 = vpop.f32.mrf.mxu1  ;;  %v1515_v1 = vadd.f32 %v1488_v51, %v7565_v53 }
 0x211   : > { %v1643_v9 = vadd.f32 %v1612_v13, %v1513_v62  ;;  %v1490_v52 = vpop.f32.mrf.mxu0 }
 0x212   : > { %v7614_v19 = vpop.f32.mrf.mxu1  ;;  %v1516_v18 = vadd.f32 %v1490_v52, %v1354_v35 }
 0x213   : > { %9124 = vst [vmem:[#allocation27_spill] sm:$0xff] %v7614_v19  ;;  %v1492_v22 = vpop.f32.mrf.mxu0 }
 0x214   : > { %v1618_v2 = vpop.f32.mrf.mxu1  ;;  %v1517_v60 = vadd.f32 %v1492_v22, %v1355_v5 }
 0x215   : > { %v7616_v16 = vadd.f32 %v1618_v2, %v1515_v1  ;;  %v7618_v4 = vpop.f32.mrf.mxu0 }
 0x216   : > { %v1620_v0 = vpop.f32.mrf.mxu1 }
 0x217   : > { %v7620_v61 = vadd.f32 %v1620_v0, %v1516_v18  ;;  %v1498_v29 = vpop.f32.mrf.mxu0 }
 0x218   : > { %v1622_v6 = vpop.f32.mrf.mxu1  ;;  %v1519_v17 = vadd.f32 %v1498_v29, %v1357_v3 }
 0x219   : > { %v7622_v20 = vadd.f32 %v1622_v6, %v1517_v60  ;;  %v1500_v53 = vpop.f32.mrf.mxu0 }
 0x21a   : > { %v7624_v62 = vpop.f32.mrf.mxu1  ;;  %v1520_v51 = vadd.f32 %v1500_v53, %v1358_v14 }
 0x21b   : > { %v1502_v35 = vpop.f32.mrf.mxu0 }
 0x21c   : > { %v1628_v13 = vpop.f32.mrf.mxu1  ;;  %v1521_v52 = vadd.f32 %v1502_v35, %v1359_v33 }
 0x21d   : > { %v7626_v22 = vadd.f32 %v1628_v13, %v1519_v17  ;;  %v7628_v1 = vpop.f32.mrf.mxu0 }
 0x21e   : > { %v1630_v5 = vpop.f32.mrf.mxu1 }
 0x21f   : > { %v7630_v2 = vadd.f32 %v1630_v5, %v1520_v51  ;;  %v1760_v18 = vpop.f32.mrf.mxu0 }
 0x220   : > { %v1632_v0 = vpop.f32.mrf.mxu1  ;;  %v1799_v15 = vadd.f32 %v1760_v18, %v1637_v55 }
 0x221   : > { %v7632_v3 = vadd.f32 %v1632_v0, %v1521_v52  ;;  %v1762_v60 = vpop.f32.mrf.mxu0 }
 0x222   : > { %v7634_v29 = vpop.f32.mrf.mxu1  ;;  %v1800_v6 = vadd.f32 %v1762_v60, %v1638_v54 }
 0x223   : > { %v1764_v14 = vpop.f32.mrf.mxu0 }
 0x224   : > { %v1924_v53 = vpop.f32.mrf.mxu1  ;;  %v1801_v37 = vadd.f32 %v1764_v14, %v1639_v50 }
 0x225   : > { %v7636_v33 = vadd.f32 %v1924_v53, %v1799_v15  ;;  %v7638_v17 = vpop.f32.mrf.mxu0 }
 0x226   : > { %9125 = vst [vmem:[#allocation28_spill] sm:$0xff] %v7638_v17  ;;  %v3253_v35 = vpop.permute.xlu0 %3252  ;;  %v3251_v51 = vpop.permute.xlu1 %3250 }
 0x227   : > { %v1926_v13 = vpop.f32.mrf.mxu1  ;;  %v1770_v5 = vpop.f32.mrf.mxu0  ;;  %v3257_v52 = vsel %vm3256_vm12, %v3251_v51, %v3253_v35 }
 0x228   : > { %v7640_v36 = vadd.f32 %v1926_v13, %v1800_v6  ;;  %v1803_v55 = vadd.f32 %v1770_v5, %v1641_v38  ;;  %v3272_v30 = vsel %vm663_vm1, %v3257_v52, 0  ;;  %v6607_v38 = vld [vmem:[%s9114_s3 + $0xa0] sm:$0xff]  }
 0x229   : > { %v1928_v18 = vpop.f32.mrf.mxu1  ;;  %v1772_v0 = vpop.f32.mrf.mxu0 }
 0x22a   : > { %v3410_v31 = vpop.permute.xlu0 %3409  ;;  %v3255_v54 = vpop.permute.xlu1 %3254  ;;  %v7642_v60 = vadd.f32 %v1928_v18, %v1801_v37  ;;  %v1804_v50 = vadd.f32 %v1772_v0, %v1642_v26 }
 0x22b   : > { %v3258_v15 = vsel %vm3256_vm12, %v3253_v35, %v3255_v54  ;;  %v7644_v14 = vpop.f32.mrf.mxu1  ;;  %v1774_v53 = vpop.f32.mrf.mxu0 }
 0x22c   : > { %9126 = vst [vmem:[#allocation29_spill] sm:$0xff] %v7644_v14  ;;  %6198 = vmatprep.subr.msk.bf16.mxu1 %vm663_vm1, %v3258_v15  ;;  %v1805_v6 = vadd.f32 %v1774_v53, %v1643_v9 }
 0x22d   : > { %3292 = vmatpush1.bf16.msra.mxu1 %v3272_v30  ;;  %v1934_v51 = vpop.f32.mrf.mxu1  ;;  %v7651_v13 = vpop.f32.mrf.mxu0  ;;  %v9128_v30 = vmov 0  }
 0x22e   : > { %9127 = vst [vmem:[#allocation30_spill] sm:$0xff] %v7651_v13  ;;  %v3550_v37 = vpop.permute.xlu0 %3549  ;;  %v4244_v26 = vpop.permute.xlu1 %4243  ;;  %v7653_v35 = vadd.f32 %v1934_v51, %v1803_v55 }
 0x22f   : > { %v4245_v5 = vrot.slane %v4244_v26, 4  ;;  %v1936_v18 = vpop.f32.mrf.mxu1  ;;  %v1780_v52 = vpop.f32.mrf.mxu0 }
 0x230   : > { %6199 = vmatmul.mubr.msk.bf16.vlgmr.msra.gmra.mxu1 %vm650_vm9, %v6607_v38  ;;  %v7656_v0 = vadd.f32 %v1936_v18, %v1804_v50  ;;  %v1807_v54 = vadd.f32 %v1780_v52, %v7616_v16  ;;  %v6676_v38 = vld [vmem:[%s6948_s29] sm:$0xff] }
 0x231   : > { %v4247_v9 = vsel %vm4246_vm0, %v4245_v5, %v4244_v26  ;;  %3319 = vmatprep.mubr.bf16.mxu1 %v9128_v30  ;;  %v1938_v15 = vpop.f32.mrf.mxu1  ;;  %v1782_v53 = vpop.f32.mrf.mxu0  ;;  %vm7660_vm10 = vcmp.ne.s16.totalorder %v4245_v5, 0  ;;  %vm4458_vm0 = vcmask 785408  }
 0x232   : > { %vm4248_vm8 = vcmp.ne.s16.totalorder %v4247_v9, 0  ;;  %v3406_v42 = vpop.permute.xlu0 %3405  ;;  %v3408_v25 = vpop.permute.xlu1 %3407  ;;  %v7664_v51 = vadd.f32 %v1938_v15, %v1805_v6  ;;  %v1808_v50 = vadd.f32 %v1782_v53, %v7620_v61  ;;  %v6608_v6 = vld [vmem:[%s9114_s3 + $0xc0] sm:$0xff]   ;;  %v6677_v61 = vld [vmem:[%s6948_s29 + $0x8] sm:$0xf] }
 0x233   : > { %v4250_v18 = vsel %vm4248_vm8, %v6676_v38, 0  ;;  %v3411_v16 = vsel %vm2642_vm13, %v3406_v42, %v3408_v25  ;;  %v3412_v26 = vsel %vm2642_vm13, %v3408_v25, %v3410_v31  ;;  %v7670_v52 = vpop.f32.mrf.mxu1  ;;  %v1784_v9 = vpop.f32.mrf.mxu0  ;;  %v4251_v42 = vsel %vm7660_vm10, %v6677_v61, 0 }
 0x234   : > { %9131 = vst [vmem:[#allocation31_spill] sm:$0xff] %v7670_v52  ;;  %6218 = vmatprep.subr.msk.bf16.mxu0 %vm663_vm1, %v3412_v26  ;;  %v3426_v5 = vsel %vm663_vm1, %v3411_v16, 0  ;;  %v6301_v40 = vcombine.high %v4250_v18, %v4250_v18  ;;  %v6300_v39 = vcombine.low %v4250_v18, %v4250_v18  ;;  %v1809_v31 = vadd.f32 %v1784_v9, %v7622_v20  ;;  %v6609_v18 = vld [vmem:[%s9114_s3 + $0xa8] sm:$0xff]  }
 0x235   : > { %3446 = vmatpush1.bf16.msra.mxu0 %v3426_v5  ;;  %v1944_v15 = vpop.f32.mrf.mxu1  ;;  %v7681_v25 = vpop.f32.mrf.mxu0  ;;  %v6302_v9 = vcombine.low %v4251_v42, %v4251_v42  ;;  %vm5178_vm8 = vcmask 818176  }
 0x236   : > { %9132 = vst [vmem:[#allocation32_spill] sm:$0xff] %v7681_v25  ;;  %v3554_v53 = vpop.permute.xlu0 %3553  ;;  %4291 = vrot.lane.b32.xlu1 %v6301_v40, %s6788_s19  ;;  %4289 = vrot.lane.b32.xlu0 %v6300_v39, %s6788_s19  ;;  %v3552_v16 = vpop.permute.xlu1 %3551  ;;  %v7686_v26 = vadd.f32 %v1944_v15, %v1807_v54 }
 0x237   : > { %v3555_v5 = vsel %vm2514_vm7, %v3550_v37, %v3552_v16  ;;  %v3556_v55 = vsel %vm2514_vm7, %v3552_v16, %v3554_v53  ;;  %v1946_v61 = vpop.f32.mrf.mxu1  ;;  %v1790_v49 = vpop.f32.mrf.mxu0  ;;  %vm4409_vm7 = vcmask 261120  }
 0x238   : > { %6235 = vmatprep.subr.msk.bf16.mxu1 %vm663_vm1, %v3556_v55  ;;  %v3570_v20 = vsel %vm663_vm1, %v3555_v5, 0  ;;  %6219 = vmatmul.mubr.msk.bf16.vlgmr.msra.gmra.mxu0 %vm650_vm9, %v6608_v6  ;;  %v7693_v39 = vadd.f32 %v1946_v61, %v1808_v50  ;;  %v1811_v40 = vadd.f32 %v1790_v49, %v7626_v22  ;;  %v6610_v22 = vld [vmem:[%s9114_s3 + $0xc8] sm:$0xff]  }
 0x239   : > { %3590 = vmatpush1.bf16.msra.mxu1 %v3570_v20  ;;  %3473 = vmatprep.mubr.bf16.mxu0 %v9128_v30  ;;  %v1948_v54 = vpop.f32.mrf.mxu1  ;;  %v1792_v37 = vpop.f32.mrf.mxu0 }
 0x23a   : > { %v3708_v15 = vpop.permute.xlu0 %3707  ;;  %4293 = vrot.lane.b32.xlu0 %v6302_v9, %s6788_s19  ;;  %v4407_v53 = vpop.permute.xlu1 %4406  ;;  %6200 = vmatmul.mubr.msk.bf16.gmra.mxu1 %vm650_vm9, %v6609_v18  ;;  %v7698_v16 = vadd.f32 %v1948_v54, %v1809_v31  ;;  %v1812_v42 = vadd.f32 %v1792_v37, %v7630_v2  ;;  %v7716_v9 = vsel %vm7386_vm4, %v6676_v38, 0  ;;  %vm4865_vm4 = vcmask 523264  }
 0x23b   : > { %v4408_v6 = vrot.slane %v4407_v53, 4  ;;  %3329 = vmatprep.mubr.bf16.mxu1 %v9128_v30  ;;  %v7702_v50 = vpop.f32.mrf.mxu1  ;;  %v1794_v49 = vpop.f32.mrf.mxu0 }
 0x23c   : > { %9133 = vst [vmem:[#allocation33_spill] sm:$0xff] %v7702_v50  ;;  %v1813_v5 = vadd.f32 %v1794_v49, %v7632_v3  ;;  %v6611_v3 = vld [vmem:[%s9114_s3 + $0xb0] sm:$0xff]  }
 0x23d   : > { %v4410_v55 = vsel %vm4409_vm7, %v4408_v6, %v4407_v53  ;;  %v1954_v61 = vpop.f32.mrf.mxu1  ;;  %v7708_v20 = vpop.f32.mrf.mxu0  ;;  %vm4412_vm15 = vcmp.ne.s16.totalorder %v4408_v6, 0 }
 0x23e   : > { %vm4411_vm13 = vcmp.ne.s16.totalorder %v4410_v55, 0  ;;  %v3704_v31 = vpop.permute.xlu0 %3703  ;;  %v7710_v18 = vpop.permute.xlu1 %4014  ;;  %v7712_v2 = vadd.f32 %v1954_v61, %v1811_v40  ;;  %v4414_v23 = vsel %vm4412_vm15, %v7211_v59, 0 }
 0x23f   : > { %v4413_v54 = vsel %vm4411_vm13, %v7207_v57, 0  ;;  %v1956_v37 = vpop.f32.mrf.mxu1  ;;  %v2077_v53 = vpop.f32.mrf.mxu0  ;;  %vm4750_vm13 = vcmask 490496  }
 0x240   : > { %v6321_v49 = vcombine.high %v4413_v54, %v4413_v54  ;;  %v6320_v55 = vcombine.low %v4413_v54, %v4413_v54  ;;  %6220 = vmatmul.mubr.msk.bf16.gmra.mxu0 %vm650_vm9, %v6610_v22  ;;  %v7723_v48 = vadd.f32 %v1956_v37, %v1812_v42  ;;  %v7726_v40 = vadd.f32 %v2077_v53, %v7636_v33 }
 0x241   : > { %3483 = vmatprep.mubr.bf16.mxu0 %v9128_v30  ;;  %v1958_v57 = vpop.f32.mrf.mxu1  ;;  %v2079_v38 = vpop.f32.mrf.mxu0  ;;  %v6282_v54 = vcombine.high %v7716_v9, %v7716_v9  ;;  %v6322_v53 = vcombine.low %v4414_v23, %v4414_v23 }
 0x242   : > { %4454 = vrot.lane.b32.xlu0 %v6321_v49, %s6789_s30  ;;  %4452 = vrot.lane.b32.xlu1 %v6320_v55, %s6789_s30  ;;  %v3706_v6 = vpop.permute.xlu1 %3705  ;;  %v4017_v61 = vpop.permute.xlu0 %4016  ;;  %v7730_v46 = vadd.f32 %v1958_v57, %v1813_v5  ;;  %v7733_v22 = vadd.f32 %v2079_v38, %v7640_v36  ;;  %v6612_v36 = vld [vmem:[%s9114_s3 + $0xd0] sm:$0xff]   ;;  %v6613_v49 = vld [vmem:[%s9114_s3 + $0xb8] sm:$0xff]  }
 0x243   : > { %v3709_v42 = vsel %vm2802_vm3, %v3704_v31, %v3706_v6  ;;  %v3710_v33 = vsel %vm2802_vm3, %v3706_v6, %v3708_v15  ;;  %6201 = vmatmul.mubr.msk.bf16.gmra.mxu1 %vm650_vm9, %v6611_v3  ;;  %v2081_v59 = vpop.f32.mrf.mxu0 }
 0x244   : > { %6255 = vmatprep.subr.msk.bf16.mxu0 %vm663_vm1, %v3710_v33  ;;  %v3724_v37 = vsel %vm663_vm1, %v3709_v42, 0  ;;  %3339 = vmatprep.mubr.bf16.mxu1 %v9128_v30  ;;  %v7747_v5 = vadd.f32 %v2081_v59, %v7642_v60  ;;  %v6678_v33 = vld [vmem:[%s6948_s29 + $0x8] sm:$0xff]  ;;  %v6679_v59 = vld [vmem:[%s6948_s29 + $0x10] sm:$0xf] }
 0x245   : > { %3744 = vmatpush1.bf16.msra.mxu0 %v3724_v37  ;;  %v7749_v15 = vpop.f32.mrf.mxu0 }
 0x246   : > { %9134 = vst [vmem:[#allocation34_spill] sm:$0xff] %v7749_v15  ;;  %5175 = vrot.lane.b32.xlu0 %v7401_v7, %s6790_s28  ;;  %4456 = vrot.lane.b32.xlu1 %v6322_v53, %s6789_s30  ;;  %v4699_v31 = vpop.permute.xlu0 %4698  ;;  %v4019_v3 = vpop.permute.xlu1 %4018 }
 0x247   : > { %v4700_v55 = vrot.slane %v4699_v31, 4  ;;  %v4021_v23 = vsel %vm2022_vm11, %v4017_v61, %v4019_v3  ;;  %v2087_v60 = vpop.f32.mrf.mxu0  ;;  %6283 = vmatprep.subr.msk.bf16.mxu0 %vm663_vm1, %v6282_v54 }
 0x248   : > { %6221 = vmatmul.mubr.msk.bf16.gmra.mxu0 %vm650_vm9, %v6612_v36  ;;  %v7759_v7 = vadd.f32 %v2087_v60, %v7653_v35  ;;  %6272 = vmatprep.subr.msk.bf16.mxu1 %vm663_vm1, %v4021_v23  ;;  %v6614_v36 = vld [vmem:[%s9114_s3 + $0xd8] sm:$0xff]  }
 0x249   : > { %3493 = vmatprep.mubr.bf16.mxu0 %v9128_v30  ;;  %v4702_v57 = vsel %vm4701_vm2, %v4700_v55, %v4699_v31  ;;  %vm4704_vm3 = vcmp.ne.s16.totalorder %v4700_v55, 0  ;;  %v2089_v38 = vpop.f32.mrf.mxu0  ;;  %v7774_v55 = vld [vmem:[%s6948_s29 + $0x10] sm:$0xff] }
 0x24a   : > { %vm4703_vm14 = vcmp.ne.s16.totalorder %v4702_v57, 0  ;;  %v4863_v6 = vpop.permute.xlu1 %4862  ;;  %v7764_v42 = vadd.f32 %v2089_v38, %v7656_v0  ;;  %v4706_v54 = vsel %vm4704_vm3, %v6679_v59, 0  ;;  %v7777_v0 = vld [vmem:[%s6948_s29 + $0x18] sm:$0xf]  ;;  %v4020_v57 = vsel %vm2022_vm11, %v7710_v18, %v4017_v61 }
 0x24b   : > { %6202 = vmatmul.mubr.msk.bf16.gmra.mxu1 %vm650_vm9, %v6613_v49  ;;  %v4705_v35 = vsel %vm4703_vm14, %v6678_v33, 0  ;;  %v4864_v37 = vrot.slane %v4863_v6, 4  ;;  %v2091_v53 = vpop.f32.mrf.mxu0  ;;  %v6359_v38 = vcombine.low %v4706_v54, %v4706_v54  ;;  %v6615_v33 = vld [vmem:[%s9114_s3 + $0xe0] sm:$0xff]   ;;  %v4035_v18 = vsel %vm663_vm1, %v4020_v57, 0 }
 0x24c   : > { %3607 = vmatprep.mubr.bf16.mxu1 %v9128_v30  ;;  %v6357_v31 = vcombine.low %v4705_v35, %v4705_v35  ;;  %v6358_v3 = vcombine.high %v4705_v35, %v4705_v35  ;;  %v7780_v49 = vadd.f32 %v2091_v53, %v7664_v51  ;;  %v6281_v54 = vcombine.low %v7716_v9, %v7716_v9 }
 0x24d   : > { %v4866_v23 = vsel %vm4865_vm4, %v4864_v37, %v4863_v6  ;;  %vm4868_vm5 = vcmp.ne.s16.totalorder %v4864_v37, 0  ;;  %v7783_v60 = vpop.f32.mrf.mxu0  ;;  %v6398_v57 = vcombine.high %v7774_v55, %v7774_v55  ;;  %vm4295_vm11 = vcmask 752640  }
 0x24e   : > { %9135 = vst [vmem:[#allocation35_spill] sm:$0xff] %v7783_v60  ;;  %4744 = vrot.lane.b32.xlu1 %v6357_v31, %s6791_s17  ;;  %4746 = vrot.lane.b32.xlu0 %v6358_v3, %s6791_s17  ;;  %vm4867_vm12 = vcmp.ne.s16.totalorder %v4866_v23, 0  ;;  %v4870_v35 = vsel %vm4868_vm5, %v7777_v0, 0 }
 0x24f   : > { %v4869_v51 = vsel %vm4867_vm12, %v7774_v55, 0  ;;  %v2097_v6 = vpop.f32.mrf.mxu0  ;;  %v6379_v31 = vcombine.low %v4870_v35, %v4870_v35 }
 0x250   : > { %6222 = vmatmul.mubr.msk.bf16.gmra.mxu0 %vm650_vm9, %v6614_v36  ;;  %v6377_v59 = vcombine.low %v4869_v51, %v4869_v51  ;;  %v7794_v37 = vadd.f32 %v2097_v6, %v7686_v26  ;;  %v6378_v53 = vcombine.high %v4869_v51, %v4869_v51  ;;  %v6616_v36 = vld [vmem:[%s9114_s3 + $0x100] sm:$0xff]   ;;  %v6399_v6 = vcombine.low %v7777_v0, %v7777_v0 }
 0x251   : > { %3761 = vmatprep.mubr.bf16.mxu0 %v9128_v30  ;;  %v2099_v61 = vpop.f32.mrf.mxu0 }
 0x252   : > { %4748 = vrot.lane.b32.xlu1 %v6359_v38, %s6791_s17  ;;  %4908 = vrot.lane.b32.xlu0 %v6377_v59, %s6787_s1  ;;  %v7802_v3 = vadd.f32 %v2099_v61, %v7693_v39  ;;  %v6397_v39 = vcombine.low %v7774_v55, %v7774_v55  ;;  %v4151_v38 = vsel %vm663_vm1, %v6281_v54, 0  ;;  %v6619_v54 = vld [vmem:[%s9114_s3 + $0xf0] sm:$0xff]  }
 0x253   : > { %6236 = vmatmul.mubr.msk.bf16.vlgmr.msra.gmra.mxu1 %vm650_vm9, %v6615_v33  ;;  %v2101_v26 = vpop.f32.mrf.mxu0  ;;  %v6617_v33 = vld [vmem:[%s9114_s3 + $0xe8] sm:$0xff]  }
 0x254   : > { %3617 = vmatprep.mubr.bf16.mxu1 %v9128_v30  ;;  %4055 = vmatpush1.bf16.msra.mxu1 %v4035_v18  ;;  %v7810_v9 = vadd.f32 %v2101_v26, %v7698_v16 }
 0x255   : > { %v7812_v23 = vpop.f32.mrf.mxu0 }
 0x256   : > { %9136 = vst [vmem:[#allocation36_spill] sm:$0xff] %v7812_v23  ;;  %4910 = vrot.lane.b32.xlu1 %v6378_v53, %s6787_s1  ;;  %4912 = vrot.lane.b32.xlu0 %v6379_v31, %s6787_s1  ;;  %s9137_s1 = smov 46   ;;  %v6621_v53 = vld [vmem:[%s9114_s3 + $0xf8] sm:$0xff]  }
 0x257   : > { %v2107_v16 = vpop.f32.mrf.mxu0 }
 0x258   : > { %6256 = vmatmul.mubr.msk.bf16.vlgmr.msra.gmra.mxu0 %vm650_vm9, %v6616_v36  ;;  %v7826_v51 = vadd.f32 %v2107_v16, %v7712_v2  ;;  %v6618_v2 = vld [vmem:[%s9114_s3 + $0x108] sm:$0xff]   ;;  %v6622_v36 = vld [vmem:[%s9114_s3 + $0x118] sm:$0xff]  }
 0x259   : > { %3771 = vmatprep.mubr.bf16.mxu0 %v9128_v30  ;;  %v2109_v35 = vpop.f32.mrf.mxu0  ;;  %4171 = vmatpush1.bf16.msra.mxu0 %v4151_v38 }
 0x25a   : > { %5060 = vrot.lane.b32.xlu1 %v6397_v39, %s9137_s1  ;;  %5062 = vrot.lane.b32.xlu0 %v6398_v57, %s9137_s1  ;;  %v7834_v59 = vadd.f32 %v2109_v35, %v7723_v48  ;;  %v6620_v48 = vld [vmem:[%s9114_s3 + $0x110] sm:$0xff]  }
 0x25b   : > { %6237 = vmatmul.mubr.msk.bf16.gmra.mxu1 %vm650_vm9, %v6617_v33  ;;  %v2111_v18 = vpop.f32.mrf.mxu0 }
 0x25c   : > { %3627 = vmatprep.mubr.bf16.mxu1 %v9128_v30  ;;  %v7842_v61 = vadd.f32 %v2111_v18, %v7730_v46  ;;  %v7855_v46 = vpop.f32.mrf.mxu1 }
 0x25d   : > { %v7870_v57 = vpop.f32.mrf.mxu0 }
 0x25e   : > { %5064 = vrot.lane.b32.xlu1 %v6399_v6, %s9137_s1  ;;  %9139 = vst [vmem:[#allocation38_spill] sm:$0xff] %v7870_v57  ;;  %s6439_s1 = sshll.u32 %s6748_s24, 11 }
 0x25f   : > { %s8983_s29 = scalar_lea.hbm %s9052_s16, %s6439_s1 }
 0x260   : > { %6257 = vmatmul.mubr.msk.bf16.gmra.mxu0 %vm650_vm9, %v6618_v2 }
 0x261   : > { %3781 = vmatprep.mubr.bf16.mxu0 %v9128_v30 }
 0x263   : > { %6238 = vmatmul.mubr.msk.bf16.gmra.mxu1 %vm650_vm9, %v6619_v54 }
 0x264   : > { %3637 = vmatprep.mubr.bf16.mxu1 %v9128_v30 }
 0x268   : > { %6258 = vmatmul.mubr.msk.bf16.gmra.mxu0 %vm650_vm9, %v6620_v48  ;;  %v6628_v48 = vld [vmem:[%s9040_s4] sm:$0xff]  }
 0x269   : > { %3791 = vmatprep.mubr.bf16.mxu0 %v9128_v30 }
 0x26a   : > { %v2239_v31 = vpop.f32.mrf.mxu1 }
 0x26b   : > { %6239 = vmatmul.mubr.msk.bf16.gmra.mxu1 %vm650_vm9, %v6621_v53  ;;  %v7864_v26 = vadd.f32 %v2239_v31, %v7726_v40  ;;  %v6626_v40 = vld [vmem:[%s9040_s4 + $0x20] sm:$0xff]  }
 0x26c   : > { %v2241_v39 = vpop.f32.mrf.mxu1  ;;  %4072 = vmatprep.mubr.bf16.mxu1 %v9128_v30 }
 0x26d   : > { %9138 = vst [vmem:[#allocation37_spill] sm:$0xff] %v7864_v26  ;;  %v7873_v38 = vadd.f32 %v2241_v39, %v7733_v22 }
 0x26e   : > { %v2243_v33 = vpop.f32.mrf.mxu1  ;;  %v2569_v16 = vpop.f32.mrf.mxu0 }
 0x26f   : > { %9140 = vst [vmem:[#allocation39_spill] sm:$0xff] %v7873_v38  ;;  %v7876_v35 = vadd.f32 %v2243_v33, %v7747_v5 }
 0x270   : > { %6259 = vmatmul.mubr.msk.bf16.gmra.mxu0 %vm650_vm9, %v6622_v36  ;;  %v7882_v6 = vpop.f32.mrf.mxu1  ;;  %v2571_v18 = vpop.f32.mrf.mxu0 }
 0x271   : > { %9141 = vst [vmem:[#allocation40_spill] sm:$0xff] %v7876_v35  ;;  %9142 = vst [vmem:[#allocation41_spill] sm:$0xff] %v7882_v6  ;;  %4188 = vmatprep.mubr.bf16.mxu0 %v9128_v30 }
 0x272   : > { %v2249_v2 = vpop.f32.mrf.mxu1  ;;  %v2573_v54 = vpop.f32.mrf.mxu0 }
 0x273   : > { %v7886_v22 = vadd.f32 %v2249_v2, %v7759_v7  ;;  %6273 = vmatmul.mubr.msk.bf16.vlgmr.msra.gmra.mxu1 %vm650_vm9, %v6626_v40  ;;  %v6627_v7 = vld [vmem:[%s9040_s4 + $0x28] sm:$0xff]  }
 0x274   : > { %v2251_v5 = vpop.f32.mrf.mxu1  ;;  %4082 = vmatprep.mubr.bf16.mxu1 %v9128_v30  ;;  %v7893_v53 = vpop.f32.mrf.mxu0 }
 0x275   : > { %9143 = vst [vmem:[#allocation42_spill] sm:$0xff] %v7886_v22  ;;  %v7896_v31 = vadd.f32 %v2251_v5, %v7764_v42  ;;  %v6630_v5 = vld [vmem:[%s9040_s4 + $0x8] sm:$0xff]  }
 0x276   : > { %v2253_v36 = vpop.f32.mrf.mxu1  ;;  %v2579_v39 = vpop.f32.mrf.mxu0 }
 0x277   : > { %9144 = vst [vmem:[#allocation43_spill] sm:$0xff] %v7896_v31  ;;  %v7899_v33 = vadd.f32 %v2253_v36, %v7780_v49 }
 0x278   : > { %v7904_v40 = vpop.f32.mrf.mxu1  ;;  %6284 = vmatmul.mubr.msk.bf16.vlgmr.msra.gmra.mxu0 %vm650_vm9, %v6628_v48  ;;  %v2581_v2 = vpop.f32.mrf.mxu0 }
 0x279   : > { %9145 = vst [vmem:[#allocation44_spill] sm:$0xff] %v7899_v33  ;;  %9146 = vst [vmem:[#allocation45_spill] sm:$0xff] %v7904_v40  ;;  %4198 = vmatprep.mubr.bf16.mxu0 %v9128_v30 }
 0x27a   : > { %v2259_v44 = vpop.f32.mrf.mxu1  ;;  %v2583_v35 = vpop.f32.mrf.mxu0 }
 0x27b   : > { %v7909_v42 = vadd.f32 %v2259_v44, %v7794_v37  ;;  %6274 = vmatmul.mubr.msk.bf16.gmra.mxu1 %vm650_vm9, %v6627_v7  ;;  %v6629_v44 = vld [vmem:[%s9040_s4 + $0x30] sm:$0xff]  }
 0x27c   : > { %v2261_v49 = vpop.f32.mrf.mxu1  ;;  %4092 = vmatprep.mubr.bf16.mxu1 %v9128_v30  ;;  %v7916_v36 = vpop.f32.mrf.mxu0 }
 0x27d   : > { %9147 = vst [vmem:[#allocation46_spill] sm:$0xff] %v7909_v42  ;;  %v7919_v48 = vadd.f32 %v2261_v49, %v7802_v3 }
 0x27e   : > { %v2263_v38 = vpop.f32.mrf.mxu1  ;;  %v2589_v26 = vpop.f32.mrf.mxu0 }
 0x27f   : > { %9148 = vst [vmem:[#allocation47_spill] sm:$0xff] %v7919_v48  ;;  %v7922_v6 = vadd.f32 %v2263_v38, %v7810_v9  ;;  %v6632_v38 = vld [vmem:[%s9040_s4 + $0x10] sm:$0xff]  }
 0x280   : > { %v7927_v37 = vpop.f32.mrf.mxu1  ;;  %6285 = vmatmul.mubr.msk.bf16.gmra.mxu0 %vm650_vm9, %v6630_v5  ;;  %v2591_v7 = vpop.f32.mrf.mxu0 }
 0x281   : > { %9149 = vst [vmem:[#allocation48_spill] sm:$0xff] %v7922_v6  ;;  %9150 = vst [vmem:[#allocation49_spill] sm:$0xff] %v7927_v37  ;;  %4208 = vmatprep.mubr.bf16.mxu0 %v9128_v30 }
 0x282   : > { %v2269_v15 = vpop.f32.mrf.mxu1  ;;  %v2593_v33 = vpop.f32.mrf.mxu0 }
 0x283   : > { %v7932_v3 = vadd.f32 %v2269_v15, %v7826_v51  ;;  %6275 = vmatmul.mubr.msk.bf16.gmra.mxu1 %vm650_vm9, %v6629_v44  ;;  %v6631_v15 = vld [vmem:[%s9040_s4 + $0x38] sm:$0xff]  }
 0x284   : > { %v2271_v9 = vpop.f32.mrf.mxu1  ;;  %4102 = vmatprep.mubr.bf16.mxu1 %v9128_v30  ;;  %v7939_v49 = vpop.f32.mrf.mxu0 }
 0x285   : > { %9151 = vst [vmem:[#allocation50_spill] sm:$0xff] %v7932_v3  ;;  %v7942_v5 = vadd.f32 %v2271_v9, %v7834_v59 }
 0x286   : > { %v2273_v14 = vpop.f32.mrf.mxu1  ;;  %v2599_v31 = vpop.f32.mrf.mxu0 }
 0x287   : > { %9152 = vst [vmem:[#allocation51_spill] sm:$0xff] %v7942_v5  ;;  %v7945_v22 = vadd.f32 %v2273_v14, %v7842_v61  ;;  %v6634_v14 = vld [vmem:[%s9040_s4 + $0x18] sm:$0xff]  }
 0x288   : > { %v7950_v51 = vpop.f32.mrf.mxu1  ;;  %6286 = vmatmul.mubr.msk.bf16.gmra.mxu0 %vm650_vm9, %v6632_v38  ;;  %v2601_v44 = vpop.f32.mrf.mxu0 }
 0x289   : > { %9153 = vst [vmem:[#allocation52_spill] sm:$0xff] %v7945_v22  ;;  %9154 = vst [vmem:[#allocation53_spill] sm:$0xff] %v7950_v51  ;;  %4218 = vmatprep.mubr.bf16.mxu0 %v9128_v30 }
 0x28a   : > { %v2603_v40 = vpop.f32.mrf.mxu0  ;;  %v2697_v60 = vpop.f32.mrf.mxu1 }
 0x28b   : > { %6276 = vmatmul.mubr.msk.bf16.gmra.mxu1 %vm650_vm9, %v6631_v15  ;;  %v2698_v59 = vadd.f32 %v2697_v60, %v2569_v16 }
 0x28c   : > { %4348 = vmatprep.mubr.bf16.mxu1 %v9128_v30  ;;  %v7959_v61 = vpop.f32.mrf.mxu0  ;;  %v2699_v9 = vpop.f32.mrf.mxu1 }
 0x28d   : > { %v2700_v17 = vadd.f32 %v2699_v9, %v2571_v18 }
 0x28e   : > { %v2857_v6 = vpop.f32.mrf.mxu0  ;;  %v2701_v38 = vpop.f32.mrf.mxu1 }
 0x28f   : > { %v2896_v52 = vadd.f32 %v2857_v6, %v2698_v59  ;;  %v2702_v48 = vadd.f32 %v2701_v38, %v2573_v54 }
 0x290   : > { %6287 = vmatmul.mubr.msk.bf16.gmra.mxu0 %vm650_vm9, %v6634_v14  ;;  %v2859_v42 = vpop.f32.mrf.mxu0  ;;  %v7962_v37 = vpop.f32.mrf.mxu1 }
 0x291   : > { %4511 = vmatprep.mubr.bf16.mxu0 %v9128_v30  ;;  %v2897_v60 = vadd.f32 %v2859_v42, %v2700_v17 }
 0x292   : > { %v2861_v16 = vpop.f32.mrf.mxu0  ;;  %v2707_v15 = vpop.f32.mrf.mxu1 }
 0x293   : > { %v2898_v12 = vadd.f32 %v2861_v16, %v2702_v48  ;;  %v2708_v23 = vadd.f32 %v2707_v15, %v2579_v39 }
 0x294   : > { %v7965_v13 = vpop.f32.mrf.mxu0  ;;  %v2709_v32 = vpop.f32.mrf.mxu1 }
 0x295   : > { %v2710_v18 = vadd.f32 %v2709_v32, %v2581_v2 }
 0x296   : > { %v2867_v9 = vpop.f32.mrf.mxu0  ;;  %v2711_v22 = vpop.f32.mrf.mxu1 }
 0x297   : > { %v7967_v6 = vadd.f32 %v2867_v9, %v2708_v23  ;;  %v2712_v54 = vadd.f32 %v2711_v22, %v2583_v35 }
 0x298   : > { %v2869_v59 = vpop.f32.mrf.mxu0  ;;  %v7969_v14 = vpop.f32.mrf.mxu1 }
 0x299   : > { %v7971_v38 = vadd.f32 %v2869_v59, %v2710_v18 }
 0x29a   : > { %v2871_v50 = vpop.f32.mrf.mxu0  ;;  %v2717_v17 = vpop.f32.mrf.mxu1 }
 0x29b   : > { %v7973_v42 = vadd.f32 %v2871_v50, %v2712_v54  ;;  %v2718_v48 = vadd.f32 %v2717_v17, %v2589_v26 }
 0x29c   : > { %v7975_v39 = vpop.f32.mrf.mxu0  ;;  %v2719_v16 = vpop.f32.mrf.mxu1 }
 0x29d   : > { %v2720_v15 = vadd.f32 %v2719_v16, %v2591_v7 }
 0x29e   : > { %v2877_v32 = vpop.f32.mrf.mxu0  ;;  %v2721_v2 = vpop.f32.mrf.mxu1 }
 0x29f   : > { %v7977_v5 = vadd.f32 %v2877_v32, %v2718_v48  ;;  %v2722_v23 = vadd.f32 %v2721_v2, %v2593_v33 }
 0x2a0   : > { %v2879_v35 = vpop.f32.mrf.mxu0  ;;  %v7979_v22 = vpop.f32.mrf.mxu1 }
 0x2a1   : > { %v7981_v9 = vadd.f32 %v2879_v35, %v2720_v15 }
 0x2a2   : > { %v2881_v18 = vpop.f32.mrf.mxu0  ;;  %v2727_v59 = vpop.f32.mrf.mxu1 }
 0x2a3   : > { %v7983_v19 = vadd.f32 %v2881_v18, %v2722_v23  ;;  %v2728_v50 = vadd.f32 %v2727_v59, %v2599_v31 }
 0x2a4   : > { %v7985_v26 = vpop.f32.mrf.mxu0  ;;  %v2729_v54 = vpop.f32.mrf.mxu1 }
 0x2a5   : > { %v2730_v17 = vadd.f32 %v2729_v54, %v2601_v44 }
 0x2a6   : > { %v2887_v7 = vpop.f32.mrf.mxu0  ;;  %v2731_v16 = vpop.f32.mrf.mxu1 }
 0x2a7   : > { %v7987_v3 = vadd.f32 %v2887_v7, %v2728_v50  ;;  %v2732_v48 = vadd.f32 %v2731_v16, %v2603_v40 }
 0x2a8   : > { %v4290_v33 = vpop.permute.xlu0 %4289  ;;  %v4292_v32 = vpop.permute.xlu1 %4291 }
 0x2a9   : > { %v2889_v2 = vpop.f32.mrf.mxu0  ;;  %v7989_v15 = vpop.f32.mrf.mxu1  ;;  %v4296_v23 = vsel %vm4295_vm11, %v4290_v33, %v4292_v32 }
 0x2aa   : > { %v7991_v35 = vadd.f32 %v2889_v2, %v2730_v17  ;;  %v4311_v40 = vsel %vm663_vm1, %v4296_v23, 0  ;;  %v6633_v17 = vld [vmem:[%s9040_s4 + $0x40] sm:$0xff]  }
 0x2ab   : > { %v2891_v18 = vpop.f32.mrf.mxu0  ;;  %v3019_v31 = vpop.f32.mrf.mxu1 }
 0x2ac   : > { %v4294_v59 = vpop.permute.xlu0 %4293  ;;  %v7993_v51 = vadd.f32 %v2891_v18, %v2732_v48  ;;  %v3058_v44 = vadd.f32 %v3019_v31, %v2896_v52 }
 0x2ad   : > { %v4297_v54 = vsel %vm4295_vm11, %v4292_v32, %v4294_v59  ;;  %v7995_v27 = vpop.f32.mrf.mxu0  ;;  %v3021_v50 = vpop.f32.mrf.mxu1 }
 0x2ae   : > { %6303 = vmatprep.subr.msk.bf16.mxu1 %vm663_vm1, %v4297_v54  ;;  %v3059_v7 = vadd.f32 %v3021_v50, %v2897_v60  ;;  %v6635_v50 = vld [vmem:[%s9040_s4 + $0x48] sm:$0xff]  }
 0x2af   : > { %4331 = vmatpush1.bf16.msra.mxu1 %v4311_v40  ;;  %v3149_v16 = vpop.f32.mrf.mxu0  ;;  %v3023_v33 = vpop.f32.mrf.mxu1 }
 0x2b0   : > { %6340 = vmatprep.subr.msk.bf16.mxu1 %vm663_vm1, %v6991_v47  ;;  %v8004_v52 = vadd.f32 %v3149_v16, %v3058_v44  ;;  %v3060_v48 = vadd.f32 %v3023_v33, %v2898_v12 }
 0x2b1   : > { %v3151_v32 = vpop.f32.mrf.mxu0  ;;  %v8006_v2 = vpop.f32.mrf.mxu1 }
 0x2b2   : > { %6304 = vmatmul.mubr.msk.bf16.vlgmr.msra.gmra.mxu1 %vm650_vm9, %v6633_v17  ;;  %v8009_v23 = vadd.f32 %v3151_v32, %v3059_v7 }
 0x2b3   : > { %4624 = vmatpush1.bf16.msra.mxu1 %v6988_v45  ;;  %4358 = vmatprep.mubr.bf16.mxu1 %v9128_v30  ;;  %v3153_v60 = vpop.f32.mrf.mxu0  ;;  %v3029_v18 = vpop.f32.mrf.mxu1 }
 0x2b4   : > { %v4455_v31 = vpop.permute.xlu0 %4454  ;;  %v4453_v59 = vpop.permute.xlu1 %4452  ;;  %v8013_v47 = vadd.f32 %v3153_v60, %v3060_v48  ;;  %v3062_v12 = vadd.f32 %v3029_v18, %v7967_v6 }
 0x2b5   : > { %v8016_v44 = vpop.f32.mrf.mxu0  ;;  %v3031_v54 = vpop.f32.mrf.mxu1  ;;  %v4459_v40 = vsel %vm4458_vm0, %v4453_v59, %v4455_v31 }
 0x2b6   : > { %v3063_v45 = vadd.f32 %v3031_v54, %v7971_v38  ;;  %v4474_v25 = vsel %vm663_vm1, %v4459_v40, 0  ;;  %v6636_v38 = vld [vmem:[%s9040_s4 + $0x60] sm:$0xff]  }
 0x2b7   : > { %v3159_v17 = vpop.f32.mrf.mxu0  ;;  %v3033_v7 = vpop.f32.mrf.mxu1 }
 0x2b8   : > { %v5176_v16 = vpop.permute.xlu0 %5175  ;;  %v4457_v33 = vpop.permute.xlu1 %4456  ;;  %v8023_v48 = vadd.f32 %v3159_v17, %v3062_v12  ;;  %v3064_v6 = vadd.f32 %v3033_v7, %v7973_v42 }
 0x2b9   : > { %v5177_v32 = vrot.slane %v5176_v16, 4  ;;  %v4460_v60 = vsel %vm4458_vm0, %v4455_v31, %v4457_v33  ;;  %v3161_v18 = vpop.f32.mrf.mxu0  ;;  %v8027_v57 = vpop.f32.mrf.mxu1 }
 0x2ba   : > { %6305 = vmatmul.mubr.msk.bf16.gmra.mxu1 %vm650_vm9, %v6635_v50  ;;  %6323 = vmatprep.subr.msk.bf16.mxu0 %vm663_vm1, %v4460_v60  ;;  %v8035_v59 = vadd.f32 %v3161_v18, %v3063_v45 }
 0x2bb   : > { %v5179_v12 = vsel %vm5178_vm8, %v5177_v32, %v5176_v16  ;;  %4494 = vmatpush1.bf16.msra.mxu0 %v4474_v25  ;;  %4368 = vmatprep.mubr.bf16.mxu1 %v9128_v30  ;;  %v3163_v42 = vpop.f32.mrf.mxu0  ;;  %v3039_v31 = vpop.f32.mrf.mxu1  ;;  %vm5181_vm7 = vcmp.ne.s16.totalorder %v5177_v32, 0  ;;  %v6637_v25 = vld [vmem:[%s9040_s4 + $0x50] sm:$0xff]  }
 0x2bc   : > { %vm5180_vm10 = vcmp.ne.s16.totalorder %v5179_v12, 0  ;;  %v8038_v54 = vadd.f32 %v3163_v42, %v3064_v6  ;;  %v3066_v50 = vadd.f32 %v3039_v31, %v7977_v5  ;;  %v5183_v6 = vsel %vm5181_vm7, %v7777_v0, 0  ;;  %v2300_v12 = vld [vmem:[%s9044_s8 + $0x30] sm:$0xff] }
 0x2bd   : > { %v5182_v40 = vsel %vm5180_vm10, %v7774_v55, 0  ;;  %v8042_v17 = vpop.f32.mrf.mxu0  ;;  %v3041_v7 = vpop.f32.mrf.mxu1  ;;  %v6419_v31 = vcombine.low %v5183_v6, %v5183_v6  ;;  %v2364_v6 = vld [vmem:[%s9045_s9 + $0x30] sm:$0xff] }
 0x2be   : > { %6324 = vmatmul.mubr.msk.bf16.vlgmr.msra.gmra.mxu0 %vm650_vm9, %v6636_v38  ;;  %v6418_v45 = vcombine.high %v5182_v40, %v5182_v40  ;;  %v6417_v16 = vcombine.low %v5182_v40, %v5182_v40  ;;  %v3067_v33 = vadd.f32 %v3041_v7, %v7981_v9  ;;  %v6638_v40 = vld [vmem:[%s9040_s4 + $0x68] sm:$0xff]  }
 0x2bf   : > { %4521 = vmatprep.mubr.bf16.mxu0 %v9128_v30  ;;  %v3169_v5 = vpop.f32.mrf.mxu0  ;;  %v3043_v55 = vpop.f32.mrf.mxu1 }
 0x2c0   : > { %5223 = vrot.lane.b32.xlu1 %v6418_v45, %s6792_s27  ;;  %5221 = vrot.lane.b32.xlu0 %v6417_v16, %s6792_s27  ;;  %v4745_v32 = vpop.permute.xlu1 %4744  ;;  %v4747_v60 = vpop.permute.xlu0 %4746  ;;  %v8051_v18 = vadd.f32 %v3169_v5, %v3066_v50  ;;  %v3068_v38 = vadd.f32 %v3043_v55, %v7983_v19 }
 0x2c1   : > { %v4751_v9 = vsel %vm4750_vm13, %v4745_v32, %v4747_v60  ;;  %v3171_v0 = vpop.f32.mrf.mxu0  ;;  %v8058_v42 = vpop.f32.mrf.mxu1 }
 0x2c2   : > { %6306 = vmatmul.mubr.msk.bf16.gmra.mxu1 %vm650_vm9, %v6637_v25  ;;  %v8064_v50 = vadd.f32 %v3171_v0, %v3067_v33  ;;  %v4766_v45 = vsel %vm663_vm1, %v4751_v9, 0  ;;  %v2301_v33 = vld [vmem:[%s9044_s8 + $0x38] sm:$0xff] }
 0x2c3   : > { %4378 = vmatprep.mubr.bf16.mxu1 %v9128_v30  ;;  %v3173_v19 = vpop.f32.mrf.mxu0  ;;  %v3049_v7 = vpop.f32.mrf.mxu1 }
 0x2c4   : > { %2334 = vperm.xlu1 %6533, %v2300_v12   ;;  %5225 = vrot.lane.b32.xlu0 %v6419_v31, %s6792_s27  ;;  %v4749_v16 = vpop.permute.xlu1 %4748  ;;  %v4909_v5 = vpop.permute.xlu0 %4908  ;;  %v8068_v55 = vadd.f32 %v3173_v19, %v3068_v38  ;;  %v3070_v25 = vadd.f32 %v3049_v7, %v7987_v3  ;;  %v6639_v38 = vld [vmem:[%s9040_s4 + $0x58] sm:$0xff]   ;;  %s6438_s27 = sshll.u32 %s6940_s20, 6 }
 0x2c5   : > { %v4752_v32 = vsel %vm4750_vm13, %v4747_v60, %v4749_v16  ;;  %v8078_v12 = vpop.f32.mrf.mxu0  ;;  %v3051_v0 = vpop.f32.mrf.mxu1  ;;  %v2365_v16 = vld [vmem:[%s9045_s9 + $0x38] sm:$0xff]  ;;  %s8592_s28 = scalar_lea.vmem %s9051_s15, %s6438_s27  ;;  %s551_s27 = sand.u32 1, %s6740_s22  }
 0x2c6   : > { %6325 = vmatmul.mubr.msk.bf16.gmra.mxu0 %vm650_vm9, %v6638_v40  ;;  %6360 = vmatprep.subr.msk.bf16.mxu0 %vm663_vm1, %v4752_v32  ;;  %v3071_v3 = vadd.f32 %v3051_v0, %v7991_v35  ;;  %v2298_v35 = vld [vmem:[%s9044_s8 + $0x20] sm:$0xff]  ;;  %s5909_s30 = sshll.u32 %s551_s27, 7  ;;  %s8991_s19 = scalar_lea.sflag [#allocation3], %s551_s27 }
 0x2c7   : > { %4531 = vmatprep.mubr.bf16.mxu0 %v9128_v30  ;;  %4786 = vmatpush1.bf16.msra.mxu0 %v4766_v45  ;;  %v3179_v9 = vpop.f32.mrf.mxu0  ;;  %v3053_v31 = vpop.f32.mrf.mxu1  ;;  %s8956_s25 = scalar_lea.vmem [#allocation2], %s5909_s30  ;;  %s6793_s30 = smov [#allocation2]  }
 0x2c8   : > { %2398 = vperm.xlu1 %6533, %v2364_v6   ;;  %2339 = vperm.xlu0 %6534, %v2301_v33   ;;  %v4913_v60 = vpop.permute.xlu0 %4912  ;;  %v4911_v19 = vpop.permute.xlu1 %4910  ;;  %v8087_v7 = vadd.f32 %v3179_v9, %v3070_v25  ;;  %v3072_v40 = vadd.f32 %v3053_v31, %v7993_v51  ;;  %v6640_v25 = vld [vmem:[%s9040_s4 + $0x70] sm:$0xff]   ;;  %v2362_v9 = vld [vmem:[%s9045_s9 + $0x20] sm:$0xff]  ;;  %s5810_s20 = sshll.u32 %s8956_s25, 4  ;;  %s6684_s17 = sshll.u32 %s6793_s30, 4  ;;  %s8985_s20 = int_to_ptr.vmem [resolvable:$true] %s5810_s20  ;;  %s6685_s17 = int_to_ptr.vmem [resolvable:$false] %s6684_s17 }
 0x2c9   : > { %v4915_v45 = vsel %vm4865_vm4, %v4911_v19, %v4913_v60  ;;  %v3181_v32 = vpop.f32.mrf.mxu0  ;;  %v4914_v31 = vsel %vm4865_vm4, %v4909_v5, %v4911_v19  ;;  %v2296_v5 = vld [vmem:[%s9044_s8 + $0x10] sm:$0xff]  ;;  %s6680_s24 = scalar_lea.vmem %s8985_s20, 2048  ;;  %s6686_s1 = scalar_lea.vmem %s6685_s17, 4096 }
 0x2ca   : > { %6307 = vmatmul.mubr.msk.bf16.gmra.mxu1 %vm650_vm9, %v6639_v38  ;;  %6380 = vmatprep.subr.msk.bf16.mxu1 %vm663_vm1, %v4915_v45  ;;  %v8102_v51 = vadd.f32 %v3181_v32, %v3071_v3  ;;  %v2299_v38 = vld [vmem:[%s9044_s8 + $0x28] sm:$0xff]  ;;  %v6641_v3 = vld [vmem:[%s9040_s4 + $0x80] sm:$0xff]   ;;  %v6642_v45 = vld [vmem:[%s9040_s4 + $0x78] sm:$0xff]   ;;  %p6681_p12 = scmp.ne.s32.totalorder %s8985_s20, %s6680_s24  ;;  %p6687_p1 = scmp.lt.s32.totalorder %s8985_s20, %s6685_s17 }
 0x2cb   : > { %4641 = vmatprep.mubr.bf16.mxu1 %v9128_v30  ;;  %v3183_v6 = vpop.f32.mrf.mxu0  ;;  %v2297_v32 = vld [vmem:[%s9044_s8 + $0x18] sm:$0xff]  ;;  %p6688_p2 = scmp.lt.s32.totalorder %s6686_s1, %s6680_s24 }
 0x2cc   : > { %2403 = vperm.xlu1 %6533, %v2365_v16   ;;  %2324 = vperm.xlu0 %6534, %v2298_v35   ;;  %v5061_v33 = vpop.permute.xlu1 %5060  ;;  %v8105_v0 = vadd.f32 %v3183_v6, %v3072_v40  ;;  %v5063_v60 = vpop.permute.xlu0 %5062  ;;  %v4929_v40 = vsel %vm663_vm1, %v4914_v31, 0  ;;  %v2363_v35 = vld [vmem:[%s9045_s9 + $0x28] sm:$0xff]  ;;  %p6682_p13 = pnand %p6681_p12, %p6921_p4 }
 0x2cd   : > { %v6643_v6 = vld [vmem:[%s9040_s4 + $0x88] sm:$0xff]   ;;  %v5066_v31 = vsel %vm963_vm6, %v5061_v33, %v5063_v60  ;;  %v2358_v33 = vld [vmem:[%s9045_s9] sm:$0xff]  ;;  %p6689_p3 = por %p6688_p2, %p6687_p1 }
 0x2ce   : > { %6326 = vmatmul.mubr.msk.bf16.gmra.mxu0 %vm650_vm9, %v6640_v25  ;;  %v2360_v25 = vld [vmem:[%s9045_s9 + $0x10] sm:$0xff]  ;;  %p6683_p0 = pneg %p6682_p13 }
 0x2cf   : > { %4541 = vmatprep.mubr.bf16.mxu0 %v9128_v30 }
 0x2d0   : > { %2329 = vperm.xlu1 %6533, %v2299_v38   ;;  %2388 = vperm.xlu0 %6534, %v2362_v9   ;;  %v5065_v16 = vpop.permute.xlu1 %5064  ;;  %v2361_v38 = vld [vmem:[%s9045_s9 + $0x18] sm:$0xff]  ;;  %v2294_v9 = vld [vmem:[%s9044_s8] sm:$0xff]  ;;  %p6690_p5 = pnand %p6689_p3, %p6683_p0 }
 0x2d1   : > { %v5067_v19 = vsel %vm963_vm6, %v5063_v60, %v5065_v16  ;;  %v2295_v16 = vld [vmem:[%s9044_s8 + $0x8] sm:$0xff]  ;;  %v6645_v60 = vld [vmem:[%s9040_s4 + $0x90] sm:$0xff]   ;;  %vm5227_vm6 = vcmask 228352  }
 0x2d2   : > { %6341 = vmatmul.mubr.msk.bf16.vlgmr.msra.gmra.mxu1 %vm650_vm9, %v6641_v3  ;;  %6400 = vmatprep.subr.msk.bf16.mxu0 %vm663_vm1, %v5067_v19  ;;  %v6644_v3 = vld [vmem:[%s9040_s4 + $0xa0] sm:$0xff]   ;;  %v6646_v19 = vld [vmem:[%s9040_s4 + $0xa8] sm:$0xff]  }
 0x2d3   : > { %4651 = vmatprep.mubr.bf16.mxu1 %v9128_v30  ;;  %4949 = vmatpush1.bf16.msra.mxu1 %v4929_v40  ;;  %v5081_v40 = vsel %vm663_vm1, %v5066_v31, 0  ;;  %v2704_v31 = vadd.f32 %v7962_v37, %v7893_v53  ;;  %v6649_v53 = vld [vmem:[%s9040_s4 + $0xc0] sm:$0xff]  }
 0x2d4   : > { %2393 = vperm.xlu1 %6533, %v2363_v35   ;;  %2314 = vperm.xlu0 %6534, %v2296_v5   ;;  %v2359_v35 = vld [vmem:[%s9045_s9 + $0x8] sm:$0xff]  ;;  %v749_v5 = vld [vmem:[%s9042_s6 + $0x30] sm:$0xff] }
 0x2d5   : > { %v2899_v37 = vadd.f32 %v7965_v13, %v2704_v31  ;;  %v6650_v13 = vld [vmem:[%s9040_s4 + $0xb8] sm:$0xff]  }
 0x2d6   : > { %6327 = vmatmul.mubr.msk.bf16.gmra.mxu0 %vm650_vm9, %v6642_v45  ;;  %v750_v45 = vld [vmem:[%s9042_s6 + $0x38] sm:$0xff] }
 0x2d7   : > { %4803 = vmatprep.mubr.bf16.mxu0 %v9128_v30 }
 0x2d8   : > { %2319 = vperm.xlu1 %6533, %v2297_v32   ;;  %2378 = vperm.xlu0 %6534, %v2360_v25   ;;  %v813_v32 = vld [vmem:[%s9043_s7 + $0x30] sm:$0xff]  ;;  %v6647_v25 = vld [vmem:[%s9040_s4 + $0x98] sm:$0xff]  }
 0x2da   : > { %6342 = vmatmul.mubr.msk.bf16.gmra.mxu1 %vm650_vm9, %v6643_v6  ;;  %v814_v6 = vld [vmem:[%s9043_s7 + $0x38] sm:$0xff] }
 0x2db   : > { %4661 = vmatprep.mubr.bf16.mxu1 %v9128_v30 }
 0x2dc   : > { %2383 = vperm.xlu1 %6533, %v2361_v38   ;;  %2304 = vperm.xlu0 %6534, %v2294_v9   ;;  %v747_v38 = vld [vmem:[%s9042_s6 + $0x20] sm:$0xff]  ;;  %v6648_v9 = vld [vmem:[%s9040_s4 + $0xb0] sm:$0xff]  }
 0x2de   : > { %6361 = vmatmul.mubr.msk.bf16.vlgmr.msra.gmra.mxu0 %vm650_vm9, %v6644_v3  ;;  %v8203_v3 = vpop.f32.mrf.mxu1 }
 0x2df   : > { %4813 = vmatprep.mubr.bf16.mxu0 %v9128_v30  ;;  %5101 = vmatpush1.bf16.msra.mxu0 %v5081_v40  ;;  %v748_v40 = vld [vmem:[%s9042_s6 + $0x28] sm:$0xff] }
 0x2e0   : > { %2309 = vperm.xlu1 %6533, %v2295_v16   ;;  %2368 = vperm.xlu0 %6534, %v2358_v33   ;;  %v811_v16 = vld [vmem:[%s9043_s7 + $0x20] sm:$0xff] }
 0x2e2   : > { %6343 = vmatmul.mubr.msk.bf16.gmra.mxu1 %vm650_vm9, %v6645_v60  ;;  %v812_v60 = vld [vmem:[%s9043_s7 + $0x28] sm:$0xff] }
 0x2e3   : > { %4671 = vmatprep.mubr.bf16.mxu1 %v9128_v30 }
 0x2e4   : > { %2373 = vperm.xlu1 %6533, %v2359_v35   ;;  %783 = vperm.xlu0 %6534, %v749_v5   ;;  %v745_v35 = vld [vmem:[%s9042_s6 + $0x10] sm:$0xff] }
 0x2e6   : > { %6362 = vmatmul.mubr.msk.bf16.gmra.mxu0 %vm650_vm9, %v6646_v19 }
 0x2e7   : > { %4823 = vmatprep.mubr.bf16.mxu0 %v9128_v30 }
 0x2e8   : > { %788 = vperm.xlu1 %6533, %v750_v45   ;;  %847 = vperm.xlu0 %6534, %v813_v32   ;;  %v2714_v45 = vadd.f32 %v7969_v14, %v7916_v36  ;;  %v3061_v32 = vadd.f32 %v8006_v2, %v2899_v37  ;;  %v6651_v14 = vld [vmem:[%s9040_s4 + $0xc8] sm:$0xff]  }
 0x2ea   : > { %6344 = vmatmul.mubr.msk.bf16.gmra.mxu1 %vm650_vm9, %v6647_v25  ;;  %v3191_v31 = vadd.f32 %v8016_v44, %v3061_v32  ;;  %v6652_v44 = vld [vmem:[%s9040_s4 + $0xe0] sm:$0xff]  }
 0x2eb   : > { %4966 = vmatprep.mubr.bf16.mxu1 %v9128_v30 }
 0x2ec   : > { %852 = vperm.xlu1 %6533, %v814_v6   ;;  %773 = vperm.xlu0 %6534, %v747_v38   ;;  %v8233_v6 = vpop.f32.mrf.mxu0  ;;  %v746_v38 = vld [vmem:[%s9042_s6 + $0x18] sm:$0xff] }
 0x2ee   : > { %6363 = vmatmul.mubr.msk.bf16.gmra.mxu0 %vm650_vm9, %v6648_v9  ;;  %v809_v9 = vld [vmem:[%s9043_s7 + $0x10] sm:$0xff] }
 0x2ef   : > { %4833 = vmatprep.mubr.bf16.mxu0 %v9128_v30 }
 0x2f0   : > { %778 = vperm.xlu1 %6533, %v748_v40   ;;  %837 = vperm.xlu0 %6534, %v811_v16   ;;  %v3311_v33 = vpop.f32.mrf.mxu1  ;;  %v743_v16 = vld [vmem:[%s9042_s6] sm:$0xff] }
 0x2f1   : > { %v3350_v5 = vadd.f32 %v3311_v33, %v8004_v52 }
 0x2f2   : > { %6381 = vmatmul.mubr.msk.bf16.vlgmr.msra.gmra.mxu1 %vm650_vm9, %v6649_v53  ;;  %v3313_v19 = vpop.f32.mrf.mxu1 }
 0x2f3   : > { %4976 = vmatprep.mubr.bf16.mxu1 %v9128_v30  ;;  %v3351_v25 = vadd.f32 %v3313_v19, %v8009_v23  ;;  %v2903_v23 = vadd.f32 %v7975_v39, %v2714_v45  ;;  %v2724_v39 = vadd.f32 %v7979_v22, %v7939_v49  ;;  %v744_v19 = vld [vmem:[%s9042_s6 + $0x8] sm:$0xff]  ;;  %v807_v45 = vld [vmem:[%s9043_s7] sm:$0xff] }
 0x2f4   : > { %842 = vperm.xlu1 %6533, %v812_v60   ;;  %763 = vperm.xlu0 %6534, %v745_v35   ;;  %v3315_v52 = vpop.f32.mrf.mxu1 }
 0x2f5   : > { %v3352_v36 = vadd.f32 %v3315_v52, %v8013_v47  ;;  %v810_v47 = vld [vmem:[%s9043_s7 + $0x18] sm:$0xff]  ;;  %v3065_v60 = vadd.f32 %v8027_v57, %v2903_v23  ;;  %v808_v23 = vld [vmem:[%s9043_s7 + $0x8] sm:$0xff] }
 0x2f6   : > { %6364 = vmatmul.mubr.msk.bf16.gmra.mxu0 %vm650_vm9, %v6650_v13  ;;  %v3317_v2 = vpop.f32.mrf.mxu1 }
 0x2f7   : > { %5118 = vmatprep.mubr.bf16.mxu0 %v9128_v30  ;;  %v3353_v13 = vadd.f32 %v3317_v2, %v3191_v31 }
 0x2f8   : > { %768 = vperm.xlu1 %6533, %v746_v38   ;;  %827 = vperm.xlu0 %6534, %v809_v9   ;;  %v3465_v40 = vpop.f32.mrf.mxu0  ;;  %v2907_v38 = vadd.f32 %v7985_v26, %v2724_v39  ;;  %v3195_v9 = vadd.f32 %v8042_v17, %v3065_v60  ;;  %v5343_v26 = vld [vmem:[%s9048_s12 + $0x30] sm:$0xff]  ;;  %v5344_v60 = vld [vmem:[%s9048_s12 + $0x38] sm:$0xff] }
 0x2f9   : > { %v8255_v53 = vadd.f32 %v3465_v40, %v3350_v5  ;;  %v2734_v40 = vadd.f32 %v7989_v15, %v7959_v61  ;;  %v5407_v61 = vld [vmem:[%s9049_s13 + $0x30] sm:$0xff] }
 0x2fa   : > { %6382 = vmatmul.mubr.msk.bf16.gmra.mxu1 %vm650_vm9, %v6651_v14  ;;  %v3467_v37 = vpop.f32.mrf.mxu0  ;;  %v3321_v33 = vpop.f32.mrf.mxu1 }
 0x2fb   : > { %v8264_v35 = vadd.f32 %v3467_v37, %v3351_v25  ;;  %4986 = vmatprep.mubr.bf16.mxu1 %v9128_v30  ;;  %v3354_v5 = vadd.f32 %v3321_v33, %v8023_v48  ;;  %v6653_v48 = vld [vmem:[%s9040_s4 + $0xd0] sm:$0xff]  }
 0x2fc   : > { %832 = vperm.xlu1 %6533, %v810_v47   ;;  %753 = vperm.xlu0 %6534, %v743_v16   ;;  %v3469_v49 = vpop.f32.mrf.mxu0  ;;  %v3323_v22 = vpop.f32.mrf.mxu1  ;;  %v3069_v47 = vadd.f32 %v8058_v42, %v2907_v38 }
 0x2fd   : > { %v8274_v57 = vadd.f32 %v3469_v49, %v3352_v36  ;;  %v3355_v32 = vadd.f32 %v3323_v22, %v8035_v59  ;;  %v2911_v49 = vadd.f32 %v7995_v27, %v2734_v40  ;;  %v5341_v27 = vld [vmem:[%s9048_s12 + $0x20] sm:$0xff] }
 0x2fe   : > { %6401 = vmatmul.mubr.msk.bf16.vlgmr.msra.gmra.mxu0 %vm650_vm9, %v6652_v44  ;;  %v3471_v25 = vpop.f32.mrf.mxu0  ;;  %v3325_v52 = vpop.f32.mrf.mxu1  ;;  %v3199_v22 = vadd.f32 %v8078_v12, %v3069_v47 }
 0x2ff   : > { %v8283_v14 = vadd.f32 %v3471_v25, %v3353_v13  ;;  %5128 = vmatprep.mubr.bf16.mxu0 %v9128_v30  ;;  %v3356_v36 = vadd.f32 %v3325_v52, %v8038_v54  ;;  %v6654_v54 = vld [vmem:[%s9040_s4 + $0xe8] sm:$0xff]   ;;  %v6655_v13 = vld [vmem:[%s9040_s4 + $0xd8] sm:$0xff]   ;;  %v6656_v52 = vld [vmem:[%s9040_s4 + $0xf0] sm:$0xff]  }
 0x300   : > { %758 = vperm.xlu1 %6533, %v744_v19   ;;  %817 = vperm.xlu0 %6534, %v807_v45   ;;  %v3475_v59 = vpop.f32.mrf.mxu0  ;;  %v3327_v2 = vpop.f32.mrf.mxu1  ;;  %v5408_v25 = vld [vmem:[%s9049_s13 + $0x38] sm:$0xff] }
 0x301   : > { %v8293_v31 = vadd.f32 %v3475_v59, %v3354_v5  ;;  %v3357_v39 = vadd.f32 %v3327_v2, %v3195_v9 }
 0x302   : > { %6383 = vmatmul.mubr.msk.bf16.gmra.mxu1 %vm650_vm9, %v6653_v48  ;;  %v3477_v17 = vpop.f32.mrf.mxu0 }
 0x303   : > { %v8302_v16 = vadd.f32 %v3477_v17, %v3355_v32  ;;  %4996 = vmatprep.mubr.bf16.mxu1 %v9128_v30  ;;  %v3331_v44 = vpop.f32.mrf.mxu1 }
 0x304   : > { %822 = vperm.xlu1 %6533, %v808_v23   ;;  %5377 = vperm.xlu0 %6534, %v5343_v26   ;;  %v3479_v37 = vpop.f32.mrf.mxu0  ;;  %v3358_v33 = vadd.f32 %v3331_v44, %v8051_v18  ;;  %v5342_v26 = vld [vmem:[%s9048_s12 + $0x28] sm:$0xff] }
 0x305   : > { %v8312_v15 = vadd.f32 %v3479_v37, %v3356_v36  ;;  %v3333_v42 = vpop.f32.mrf.mxu1 }
 0x306   : > { %6402 = vmatmul.mubr.msk.bf16.gmra.mxu0 %vm650_vm9, %v6654_v54  ;;  %v3481_v5 = vpop.f32.mrf.mxu0  ;;  %v3359_v18 = vadd.f32 %v3333_v42, %v8064_v50  ;;  %v5405_v54 = vld [vmem:[%s9049_s13 + $0x20] sm:$0xff]  ;;  %v6657_v42 = vld [vmem:[%s9040_s4 + $0xf8] sm:$0xff]  }
 0x307   : > { %v8321_v19 = vadd.f32 %v3481_v5, %v3357_v39  ;;  %5138 = vmatprep.mubr.bf16.mxu0 %v9128_v30  ;;  %v3335_v45 = vpop.f32.mrf.mxu1 }
 0x308   : > { %5382 = vperm.xlu1 %6533, %v5344_v60   ;;  %5441 = vperm.xlu0 %6534, %v5407_v61   ;;  %v3485_v32 = vpop.f32.mrf.mxu0  ;;  %v3360_v48 = vadd.f32 %v3335_v45, %v8068_v55  ;;  %v3073_v55 = vadd.f32 %v8203_v3, %v2911_v49  ;;  %v5406_v60 = vld [vmem:[%s9049_s13 + $0x28] sm:$0xff]  ;;  %v5340_v45 = vld [vmem:[%s9048_s12 + $0x18] sm:$0xff] }
 0x309   : > { %v8331_v50 = vadd.f32 %v3485_v32, %v3358_v33  ;;  %v3337_v12 = vpop.f32.mrf.mxu1  ;;  %v5403_v32 = vld [vmem:[%s9049_s13 + $0x10] sm:$0xff] }
 0x30a   : > { %6384 = vmatmul.mubr.msk.bf16.gmra.mxu1 %vm650_vm9, %v6655_v13  ;;  %v3487_v38 = vpop.f32.mrf.mxu0  ;;  %v3361_v36 = vadd.f32 %v3337_v12, %v3199_v22  ;;  %v3203_v39 = vadd.f32 %v8233_v6, %v3073_v55 }
 0x30b   : > { %v8338_v9 = vadd.f32 %v3487_v38, %v3359_v18  ;;  %v3341_v59 = vpop.f32.mrf.mxu1  ;;  %5280 = vmatprep.mubr.bf16.mxu1 %v9128_v30 }
 0x30c   : > { %5446 = vperm.xlu1 %6533, %v5408_v25   ;;  %5367 = vperm.xlu0 %6534, %v5341_v27   ;;  %v3489_v2 = vpop.f32.mrf.mxu0  ;;  %v3362_v23 = vadd.f32 %v3341_v59, %v8087_v7  ;;  %v5337_v59 = vld [vmem:[%s9048_s12] sm:$0xff] }
 0x30d   : > { %v8348_v3 = vadd.f32 %v3489_v2, %v3360_v48  ;;  %v3343_v17 = vpop.f32.mrf.mxu1 }
 0x30e   : > { %6403 = vmatmul.mubr.msk.bf16.gmra.mxu0 %vm650_vm9, %v6656_v52  ;;  %v3491_v40 = vpop.f32.mrf.mxu0  ;;  %v3363_v47 = vadd.f32 %v3343_v17, %v8102_v51  ;;  %v5339_v51 = vld [vmem:[%s9048_s12 + $0x10] sm:$0xff] }
 0x30f   : > { %v8353_v44 = vadd.f32 %v3491_v40, %v3361_v36  ;;  %5148 = vmatprep.mubr.bf16.mxu0 %v9128_v30  ;;  %v3345_v7 = vpop.f32.mrf.mxu1  ;;  %v5404_v36 = vld [vmem:[%s9049_s13 + $0x18] sm:$0xff] }
 0x310   : > { %5372 = vperm.xlu1 %6533, %v5342_v26   ;;  %5431 = vperm.xlu0 %6534, %v5405_v54   ;;  %v3495_v37 = vpop.f32.mrf.mxu0  ;;  %v3364_v33 = vadd.f32 %v3345_v7, %v8105_v0 }
 0x311   : > { %v8363_v61 = vadd.f32 %v3495_v37, %v3362_v23  ;;  %v3347_v6 = vpop.f32.mrf.mxu1 }
 0x312   : > { %v3497_v13 = vpop.f32.mrf.mxu0  ;;  %v3365_v18 = vadd.f32 %v3347_v6, %v3203_v39  ;;  %v5401_v39 = vld [vmem:[%s9049_s13] sm:$0xff] }
 0x313   : > { %v8368_v5 = vadd.f32 %v3497_v13, %v3363_v47  ;;  %v3609_v0 = vpop.f32.mrf.mxu1  ;;  %v5338_v47 = vld [vmem:[%s9048_s12 + $0x8] sm:$0xff]  ;;  %v3824_v13 = vld [vmem:[%s9046_s10 + $0x30] sm:$0xff] }
 0x314   : > { %5436 = vperm.xlu1 %6533, %v5406_v60   ;;  %5357 = vperm.xlu0 %6534, %v5339_v51   ;;  %v3499_v49 = vpop.f32.mrf.mxu0  ;;  %v3648_v22 = vadd.f32 %v3609_v0, %v8255_v53 }
 0x315   : > { %v8377_v48 = vadd.f32 %v3499_v49, %v3364_v33  ;;  %v3611_v25 = vpop.f32.mrf.mxu1 }
 0x316   : > { %6404 = vmatmul.mubr.msk.bf16.gmra.mxu0 %vm650_vm9, %v6657_v42  ;;  %v3501_v27 = vpop.f32.mrf.mxu0  ;;  %v3649_v12 = vadd.f32 %v3611_v25, %v8264_v35  ;;  %v5402_v42 = vld [vmem:[%s9049_s13 + $0x8] sm:$0xff]  ;;  %v3825_v25 = vld [vmem:[%s9046_s10 + $0x38] sm:$0xff] }
 0x317   : > { %v8381_v52 = vadd.f32 %v3501_v27, %v3365_v18  ;;  %v3613_v38 = vpop.f32.mrf.mxu1  ;;  %v3888_v27 = vld [vmem:[%s9047_s11 + $0x30] sm:$0xff] }
 0x318   : > { %5362 = vperm.xlu1 %6533, %v5340_v45   ;;  %5421 = vperm.xlu0 %6534, %v5403_v32   ;;  %v3763_v53 = vpop.f32.mrf.mxu0  ;;  %v3650_v55 = vadd.f32 %v3613_v38, %v8274_v57 }
 0x319   : > { %v8390_v2 = vadd.f32 %v3763_v53, %v3648_v22  ;;  %v3615_v23 = vpop.f32.mrf.mxu1 }
 0x31a   : > { %v3765_v35 = vpop.f32.mrf.mxu0  ;;  %v3651_v26 = vadd.f32 %v3615_v23, %v8283_v14  ;;  %v3889_v23 = vld [vmem:[%s9047_s11 + $0x38] sm:$0xff] }
 0x31b   : > { %v8393_v54 = vadd.f32 %v3765_v35, %v3649_v12  ;;  %v3619_v17 = vpop.f32.mrf.mxu1  ;;  %v3822_v35 = vld [vmem:[%s9046_s10 + $0x20] sm:$0xff] }
 0x31c   : > { %5426 = vperm.xlu1 %6533, %v5404_v36   ;;  %5347 = vperm.xlu0 %6534, %v5337_v59   ;;  %v3767_v57 = vpop.f32.mrf.mxu0  ;;  %v3652_v40 = vadd.f32 %v3619_v17, %v8293_v31 }
 0x31d   : > { %v8402_v7 = vadd.f32 %v3767_v57, %v3650_v55  ;;  %v3621_v37 = vpop.f32.mrf.mxu1 }
 0x31e   : > { %v3769_v14 = vpop.f32.mrf.mxu0  ;;  %v3653_v33 = vadd.f32 %v3621_v37, %v8302_v16 }
 0x31f   : > { %v8405_v60 = vadd.f32 %v3769_v14, %v3651_v26  ;;  %v3623_v51 = vpop.f32.mrf.mxu1  ;;  %v3823_v14 = vld [vmem:[%s9046_s10 + $0x28] sm:$0xff] }
 0x320   : > { %5352 = vperm.xlu1 %6533, %v5338_v47   ;;  %5411 = vperm.xlu0 %6534, %v5401_v39   ;;  %v3773_v31 = vpop.f32.mrf.mxu0  ;;  %v3654_v6 = vadd.f32 %v3623_v51, %v8312_v15 }
 0x321   : > { %v8414_v18 = vadd.f32 %v3773_v31, %v3652_v40  ;;  %v3625_v0 = vpop.f32.mrf.mxu1 }
 0x322   : > { %v3775_v16 = vpop.f32.mrf.mxu0  ;;  %v3655_v49 = vadd.f32 %v3625_v0, %v8321_v19  ;;  %v3887_v0 = vld [vmem:[%s9047_s11 + $0x28] sm:$0xff] }
 0x323   : > { %v8417_v22 = vadd.f32 %v3775_v16, %v3653_v33  ;;  %v3629_v45 = vpop.f32.mrf.mxu1  ;;  %v3886_v33 = vld [vmem:[%s9047_s11 + $0x20] sm:$0xff]  ;;  %v3820_v16 = vld [vmem:[%s9046_s10 + $0x10] sm:$0xff] }
 0x324   : > { %5416 = vperm.xlu1 %6533, %v5402_v42   ;;  %3858 = vperm.xlu0 %6534, %v3824_v13   ;;  %v3777_v15 = vpop.f32.mrf.mxu0  ;;  %v3656_v32 = vadd.f32 %v3629_v45, %v8331_v50 }
 0x325   : > { %v8426_v12 = vadd.f32 %v3777_v15, %v3654_v6  ;;  %v3631_v38 = vpop.f32.mrf.mxu1 }
 0x326   : > { %v3779_v19 = vpop.f32.mrf.mxu0  ;;  %v3657_v53 = vadd.f32 %v3631_v38, %v8338_v9  ;;  %v1183_v9 = vadd.f32 %v7585_v11, %v7510_v10 }
 0x327   : > { %v8429_v55 = vadd.f32 %v3779_v19, %v3655_v49  ;;  %v3633_v36 = vpop.f32.mrf.mxu1  ;;  %v3821_v19 = vld [vmem:[%s9046_s10 + $0x18] sm:$0xff] }
 0x328   : > { %3863 = vperm.xlu1 %6533, %v3825_v25   ;;  %3922 = vperm.xlu0 %6534, %v3888_v27   ;;  %v3783_v50 = vpop.f32.mrf.mxu0  ;;  %v3658_v59 = vadd.f32 %v3633_v36, %v8348_v3 }
 0x329   : > { %v8438_v26 = vadd.f32 %v3783_v50, %v3656_v32  ;;  %v3635_v17 = vpop.f32.mrf.mxu1 }
 0x32a   : > { %v3785_v57 = vpop.f32.mrf.mxu0  ;;  %v3659_v40 = vadd.f32 %v3635_v17, %v8353_v44  ;;  %v1360_v44 = vadd.f32 %v7597_v41, %v1183_v9 }
 0x32b   : > { %v8443_v47 = vadd.f32 %v3785_v57, %v3657_v53  ;;  %v3639_v3 = vpop.f32.mrf.mxu1  ;;  %v1163_v57 = vadd.f32 %v7542_v56, %v7428_v24 }
 0x32c   : > { %3927 = vperm.xlu1 %6533, %v3889_v23   ;;  %3848 = vperm.xlu0 %6534, %v3822_v35   ;;  %v3787_v39 = vpop.f32.mrf.mxu0  ;;  %v3660_v37 = vadd.f32 %v3639_v3, %v8363_v61  ;;  %v1522_v45 = vadd.f32 %v7628_v1, %v1360_v44  ;;  %v6658_v3 = vld [vmem:[%s9040_s4 + $0x100] sm:$0xff]  }
 0x32d   : > { %v8452_v10 = vadd.f32 %v3787_v39, %v3658_v59  ;;  %v3641_v11 = vpop.f32.mrf.mxu1 }
 0x32e   : > { %v3789_v51 = vpop.f32.mrf.mxu0  ;;  %v3661_v31 = vadd.f32 %v3641_v11, %v8368_v5  ;;  %v1173_v5 = vadd.f32 %v7568_v43, %v7477_v58  ;;  %v3884_v58 = vld [vmem:[%s9047_s11 + $0x10] sm:$0xff] }
 0x32f   : > { %v8456_v6 = vadd.f32 %v3789_v51, %v3659_v40  ;;  %v3643_v42 = vpop.f32.mrf.mxu1  ;;  %v1352_v51 = vadd.f32 %v7561_v21, %v1163_v57  ;;  %v9160_v57 = vld [vmem:[#allocation27_spill] sm:$0xff] }
 0x330   : > { %3853 = vperm.xlu1 %6533, %v3823_v14   ;;  %3912 = vperm.xlu0 %6534, %v3886_v33   ;;  %v3793_v61 = vpop.f32.mrf.mxu0  ;;  %v3662_v13 = vadd.f32 %v3643_v42, %v8377_v48  ;;  %v1356_v53 = vadd.f32 %v7580_v34, %v1173_v5  ;;  %v3885_v34 = vld [vmem:[%s9047_s11 + $0x18] sm:$0xff] }
 0x331   : > { %v8465_v41 = vadd.f32 %v3793_v61, %v3660_v37  ;;  %v3645_v49 = vpop.f32.mrf.mxu1 }
 0x332   : > { %v5222_v15 = vpop.permute.xlu0 %5221  ;;  %v5224_v32 = vpop.permute.xlu1 %5223  ;;  %v3663_v48 = vadd.f32 %v3645_v49, %v8381_v52  ;;  %v1652_v52 = vadd.f32 %v7634_v29, %v1522_v45  ;;  %v3818_v29 = vld [vmem:[%s9046_s10] sm:$0xff]  ;;  %v1518_v24 = vadd.f32 %v7618_v4, %v1356_v53  ;;  %v1153_v49 = vadd.f32 %v7517_v28, %v7365_v8 }
 0x333   : > { %v3795_v25 = vpop.f32.mrf.mxu0  ;;  %v4074_v27 = vpop.f32.mrf.mxu1  ;;  %v5228_v36 = vsel %vm5227_vm6, %v5222_v15, %v5224_v32  ;;  %v3882_v4 = vld [vmem:[%s9047_s11] sm:$0xff]  ;;  %v1514_v45 = vadd.f32 %v7611_v63, %v1352_v51 }
 0x334   : > { %3917 = vperm.xlu1 %6533, %v3887_v0   ;;  %3838 = vperm.xlu0 %6534, %v3820_v16   ;;  %v8471_v38 = vadd.f32 %v3795_v25, %v3661_v31  ;;  %v5243_v40 = vsel %vm663_vm1, %v5228_v36, 0  ;;  %v1814_v56 = vadd.f32 %v7708_v20, %v1652_v52  ;;  %v3819_v31 = vld [vmem:[%s9046_s10 + $0x8] sm:$0xff]  ;;  %v1648_v61 = vadd.f32 %v7624_v62, %v1518_v24  ;;  %v5634_v28 = vld [vmem:[%s9050_s14] sm:$0xff] }
 0x335   : > { %v3797_v43 = vpop.f32.mrf.mxu0  ;;  %v4076_v1 = vpop.f32.mrf.mxu1  ;;  %v3883_v62 = vld [vmem:[%s9047_s11 + $0x8] sm:$0xff] }
 0x336   : > { %v5226_v50 = vpop.permute.xlu0 %5225  ;;  %v8481_v59 = vadd.f32 %v3797_v43, %v3662_v13  ;;  %v1978_v13 = vadd.f32 %v7855_v46, %v1814_v56  ;;  %v6659_v46 = vld [vmem:[%s9040_s4 + $0x108] sm:$0xff]   ;;  %v9163_v56 = vld [vmem:[#allocation52_spill] sm:$0xff] }
 0x337   : > { %v5229_v23 = vsel %vm5227_vm6, %v5224_v32, %v5226_v50  ;;  %v3799_v35 = vpop.f32.mrf.mxu0  ;;  %v4078_v17 = vpop.f32.mrf.mxu1  ;;  %v9158_v52 = vld [vmem:[#allocation53_spill] sm:$0xff]  ;;  %v9159_v50 = vld [vmem:[#allocation50_spill] sm:$0xff] }
 0x338   : > { %3843 = vperm.xlu1 %6533, %v3821_v19   ;;  %3902 = vperm.xlu0 %6534, %v3884_v58   ;;  %v8483_v9 = vadd.f32 %v3799_v35, %v3663_v48  ;;  %v9155_v48 = vld [vmem:[#allocation32_spill] sm:$0xff] }
 0x339   : > { %6420 = vmatprep.subr.msk.bf16.mxu1 %vm663_vm1, %v5229_v23  ;;  %v4080_v39 = vpop.f32.mrf.mxu1  ;;  %v4190_v37 = vpop.f32.mrf.mxu0  ;;  %v1810_v25 = vadd.f32 %v9155_v48, %v1648_v61 }
 0x33a   : > { %5263 = vmatpush1.bf16.msra.mxu1 %v5243_v40  ;;  %v8500_v14 = vadd.f32 %v4190_v37, %v4074_v27  ;;  %v9156_v27 = vld [vmem:[#allocation38_spill] sm:$0xff]  ;;  %v1644_v40 = vadd.f32 %v9160_v57, %v1514_v45  ;;  %v9162_v37 = vld [vmem:[#allocation33_spill] sm:$0xff] }
 0x33b   : > { %v4084_v33 = vpop.f32.mrf.mxu1  ;;  %v4192_v11 = vpop.f32.mrf.mxu0  ;;  %v2131_v8 = vadd.f32 %v9156_v27, %v1978_v13  ;;  %v1974_v24 = vadd.f32 %v9162_v37, %v1810_v25  ;;  %v9165_v25 = vld [vmem:[#allocation30_spill] sm:$0xff] }
 0x33c   : > { %3907 = vperm.xlu1 %6533, %v3885_v34   ;;  %3828 = vperm.xlu0 %6534, %v3818_v29   ;;  %v8502_v44 = vadd.f32 %v4192_v11, %v4076_v1  ;;  %v9157_v1 = vld [vmem:[#allocation24_spill] sm:$0xff]  ;;  %v9161_v34 = vld [vmem:[#allocation51_spill] sm:$0xff]  ;;  %v1806_v27 = vadd.f32 %v9165_v25, %v1644_v40  ;;  %v9169_v37 = vld [vmem:[#allocation46_spill] sm:$0xff] }
 0x33d   : > { %6421 = vmatmul.mubr.msk.bf16.vlgmr.msra.gmra.mxu1 %vm650_vm9, %v6658_v3  ;;  %v4086_v20 = vpop.f32.mrf.mxu1  ;;  %v4194_v42 = vpop.f32.mrf.mxu0  ;;  %v1348_v53 = vadd.f32 %v9157_v1, %v1153_v49  ;;  %v2293_v36 = vadd.f32 %v9158_v52, %v2131_v8  ;;  %v5635_v3 = vld [vmem:[%s9050_s14 + $0x8] sm:$0xff]  ;;  %v5637_v8 = vld [vmem:[%s9050_s14 + $0x18] sm:$0xff]  ;;  %v5638_v52 = vld [vmem:[%s9050_s14 + $0x20] sm:$0xff] }
 0x33e   : > { %5290 = vmatprep.mubr.bf16.mxu1 %v9128_v30  ;;  %v8515_v0 = vadd.f32 %v4194_v42, %v4078_v17 }
 0x33f   : > { %v2335_v21 = vpop.permute.xlu1 %2334  ;;  %v4088_v16 = vpop.f32.mrf.mxu1 }
 0x340   : > { %3833 = vperm.xlu1 %6533, %v3819_v31   ;;  %3892 = vperm.xlu0 %6534, %v3882_v4   ;;  %v4196_v5 = vpop.f32.mrf.mxu0  ;;  %v2354_v23 = vmul.f32 %v2335_v21, %v9159_v50  ;;  %v2355_v29 = vmul.f32 %v2335_v21, %v9161_v34  ;;  %v5636_v31 = vld [vmem:[%s9050_s14 + $0x10] sm:$0xff] }
 0x341   : > { %v4090_v15 = vpop.f32.mrf.mxu1  ;;  %v8526_v32 = vadd.f32 %v4196_v5, %v4080_v39  ;;  %v9167_v34 = vld [vmem:[#allocation26_spill] sm:$0xff] }
 0x342   : > { %v4200_v63 = vpop.f32.mrf.mxu0 }
 0x343   : > { %v2340_v19 = vpop.permute.xlu0 %2339  ;;  %v2399_v58 = vpop.permute.xlu1 %2398  ;;  %v8533_v43 = vadd.f32 %v4200_v63, %v4084_v33  ;;  %v9166_v63 = vld [vmem:[#allocation36_spill] sm:$0xff] }
 0x344   : > { %3897 = vperm.xlu1 %6533, %v3883_v62   ;;  %v4094_v35 = vpop.f32.mrf.mxu1  ;;  %v4202_v17 = vpop.f32.mrf.mxu0  ;;  %5644 = vperm.xlu0 %6534, %v5634_v28   ;;  %v2356_v33 = vmul.f32 %v2340_v19, %v9163_v56  ;;  %v2357_v11 = vmul.f32 %v2340_v19, %v2293_v36  ;;  %v2418_v51 = vadd.f32 %v2399_v58, %v2354_v23  ;;  %v6660_v28 = vld [vmem:[%s9040_s4 + $0x110] sm:$0xff]  }
 0x345   : > { %6422 = vmatmul.mubr.msk.bf16.gmra.mxu1 %vm650_vm9, %v6659_v46  ;;  %v8544_v39 = vadd.f32 %v4202_v17, %v4086_v20  ;;  %v2419_v61 = vadd.f32 %v2399_v58, %v2355_v29  ;;  %v9164_v20 = vld [vmem:[#allocation25_spill] sm:$0xff]  ;;  %v2127_v19 = vadd.f32 %v9166_v63, %v1974_v24 }
 0x346   : > { %5300 = vmatprep.mubr.bf16.mxu1 %v9128_v30  ;;  %v4096_v4 = vpop.f32.mrf.mxu1  ;;  %v4204_v42 = vpop.f32.mrf.mxu0  ;;  %v1510_v5 = vadd.f32 %v9164_v20, %v1348_v53  ;;  %v2434_v58 = vmax.f32 %v2418_v51, 0.0  ;;  %v9168_v29 = vld [vmem:[#allocation49_spill] sm:$0xff]  ;;  %v9170_v51 = vld [vmem:[#allocation47_spill] sm:$0xff] }
 0x347   : > { %v2325_v13 = vpop.permute.xlu0 %2324  ;;  %v2404_v21 = vpop.permute.xlu1 %2403  ;;  %v8552_v49 = vadd.f32 %v4204_v42, %v4088_v16  ;;  %v2435_v23 = vmax.f32 %v2419_v61, 0.0 }
 0x348   : > { %v2420_v45 = vadd.f32 %v2404_v21, %v2356_v33  ;;  %v2421_v62 = vadd.f32 %v2404_v21, %v2357_v11  ;;  %5649 = vperm.xlu1 %6533, %v5635_v3   ;;  %v4098_v46 = vpop.f32.mrf.mxu1  ;;  %v4206_v48 = vpop.f32.mrf.mxu0  ;;  %5654 = vperm.xlu0 %6534, %v5636_v31   ;;  %v2289_v3 = vadd.f32 %v9168_v29, %v2127_v19  ;;  %v5641_v29 = vld [vmem:[%s9050_s14 + $0x38] sm:$0xff] }
 0x349   : > { %v8562_v16 = vadd.f32 %v4206_v48, %v4090_v15  ;;  %v1640_v15 = vadd.f32 %v9167_v34, %v1510_v5  ;;  %v2350_v24 = vmul.f32 %v2325_v13, %v9169_v37  ;;  %v2351_v31 = vmul.f32 %v2325_v13, %v9170_v51  ;;  %v9172_v5 = vld [vmem:[#allocation48_spill] sm:$0xff]  ;;  %v5639_v48 = vld [vmem:[%s9050_s14 + $0x28] sm:$0xff]  ;;  %v5640_v13 = vld [vmem:[%s9050_s14 + $0x30] sm:$0xff] }
 0x34a   : > { %v2436_v1 = vmax.f32 %v2420_v45, 0.0  ;;  %v2437_v53 = vmax.f32 %v2421_v62, 0.0  ;;  %v4100_v36 = vpop.f32.mrf.mxu1  ;;  %v4210_v50 = vpop.f32.mrf.mxu0  ;;  %v9175_v51 = vld [vmem:[#allocation45_spill] sm:$0xff] }
 0x34b   : > { %v2389_v17 = vpop.permute.xlu0 %2388  ;;  %v2330_v57 = vpop.permute.xlu1 %2329  ;;  %v8568_v40 = vadd.f32 %v4210_v50, %v4094_v35  ;;  %v9171_v35 = vld [vmem:[#allocation31_spill] sm:$0xff] }
 0x34c   : > { %v5495_v56 = vpack.c.bf16 %v2436_v1, %v2434_v58  ;;  %5659 = vperm.xlu1 %6533, %v5637_v8   ;;  %v4104_v33 = vpop.f32.mrf.mxu1  ;;  %v4212_v11 = vpop.f32.mrf.mxu0  ;;  %v5496_v42 = vpack.c.bf16 %v2437_v53, %v2435_v23  ;;  %5664 = vperm.xlu0 %6534, %v5638_v52   ;;  %v1970_v21 = vadd.f32 %v9171_v35, %v1806_v27  ;;  %v9173_v1 = vld [vmem:[#allocation28_spill] sm:$0xff]  ;;  %v9174_v50 = vld [vmem:[#allocation35_spill] sm:$0xff] }
 0x34d   : > { %6423 = vmatmul.mubr.msk.bf16.gmra.mxu1 %vm650_vm9, %v6660_v28  ;;  %v8576_v61 = vadd.f32 %v4212_v11, %v4096_v4  ;;  %v2414_v20 = vadd.f32 %v2389_v17, %v2350_v24  ;;  %v2352_v45 = vmul.f32 %v2330_v57, %v9172_v5  ;;  %v2353_v62 = vmul.f32 %v2330_v57, %v2289_v3  ;;  %v9177_v5 = vld [vmem:[#allocation43_spill] sm:$0xff] }
 0x34e   : > { %5310 = vmatprep.mubr.bf16.mxu1 %v9128_v30  ;;  %v4214_v25 = vpop.f32.mrf.mxu0  ;;  %v2415_v8 = vadd.f32 %v2389_v17, %v2351_v31  ;;  %5561 = vmatprep.subr.bf16.mxu0 %v5496_v42  ;;  %v4106_v30 = vpop.f32.mrf.mxu1  ;;  %v1802_v53 = vadd.f32 %v9173_v1, %v1640_v15  ;;  %v2123_v23 = vadd.f32 %v9174_v50, %v1970_v21  ;;  %v9176_v31 = vld [vmem:[#allocation42_spill] sm:$0xff] }
 0x34f   : > { %v2315_v4 = vpop.permute.xlu0 %2314  ;;  %v2394_v28 = vpop.permute.xlu1 %2393  ;;  %v8587_v27 = vadd.f32 %v4214_v25, %v4098_v46  ;;  %5562 = vmatpush1.bf16.msra.mxu0 %v5495_v56  ;;  %v6661_v46 = vld [vmem:[%s9040_s4 + $0x118] sm:$0xff]   ;;  %v2430_v17 = vmax.f32 %v2414_v20, 0.0  ;;  %v5698_v56 = vld [vmem:[%s8592_s28] sm:$0xff] }
 0x350   : > { %v2416_v63 = vadd.f32 %v2394_v28, %v2352_v45  ;;  %v2417_v19 = vadd.f32 %v2394_v28, %v2353_v62  ;;  %v4216_v58 = vpop.f32.mrf.mxu0  ;;  %5669 = vperm.xlu1 %6533, %v5639_v48   ;;  %5674 = vperm.xlu0 %6534, %v5640_v13   ;;  %v2431_v37 = vmax.f32 %v2415_v8, 0.0  ;;  %v2346_v42 = vmul.f32 %v2315_v4, %v9176_v31  ;;  %v4108_v21 = vpop.f32.mrf.mxu1  ;;  %v9178_v13 = vld [vmem:[#allocation29_spill] sm:$0xff]  ;;  %v9179_v8 = vld [vmem:[#allocation44_spill] sm:$0xff] }
 0x351   : > { %v8598_v52 = vadd.f32 %v4216_v58, %v4100_v36  ;;  %v2285_v36 = vadd.f32 %v9175_v51, %v2123_v23  ;;  %v2347_v45 = vmul.f32 %v2315_v4, %v9177_v5  ;;  %v1966_v25 = vadd.f32 %v9178_v13, %v1802_v53  ;;  %v5700_v23 = vld [vmem:[%s8592_s28 + $0x10] sm:$0xff] }
 0x352   : > { %v2432_v57 = vmax.f32 %v2416_v63, 0.0  ;;  %v2433_v34 = vmax.f32 %v2417_v19, 0.0  ;;  %v4220_v3 = vpop.f32.mrf.mxu0  ;;  %v5699_v19 = vld [vmem:[%s8592_s28 + $0x8] sm:$0xff]  ;;  %v4110_v53 = vpop.f32.mrf.mxu1 }
 0x353   : > { %v2379_v15 = vpop.permute.xlu0 %2378  ;;  %v2320_v24 = vpop.permute.xlu1 %2319  ;;  %v8605_v11 = vadd.f32 %v4220_v3, %v4104_v33 }
 0x354   : > { %v5493_v35 = vpack.c.bf16 %v2432_v57, %v2430_v17  ;;  %v4222_v20 = vpop.f32.mrf.mxu0  ;;  %5679 = vperm.xlu1 %6533, %v5641_v29   ;;  %v5494_v62 = vpack.c.bf16 %v2433_v34, %v2431_v37  ;;  %v2410_v33 = vadd.f32 %v2379_v15, %v2346_v42  ;;  %v2348_v28 = vmul.f32 %v2320_v24, %v9179_v8  ;;  %v9180_v29 = vld [vmem:[#allocation34_spill] sm:$0xff]  ;;  %v5702_v42 = vld [vmem:[%s8592_s28 + $0x20] sm:$0xff] }
 0x355   : > { %6424 = vmatmul.mubr.msk.bf16.gmra.mxu1 %vm650_vm9, %v6661_v46  ;;  %v8611_v48 = vadd.f32 %v4222_v20, %v4106_v30  ;;  %v2349_v63 = vmul.f32 %v2320_v24, %v2285_v36  ;;  %5708 = vperm.xlu0 %6534, %v5698_v56   ;;  %v2411_v1 = vadd.f32 %v2379_v15, %v2347_v45  ;;  %v5701_v56 = vld [vmem:[%s8592_s28 + $0x18] sm:$0xff]  ;;  %v9182_v20 = vld [vmem:[#allocation37_spill] sm:$0xff]  ;;  %v9184_v8 = vld [vmem:[#allocation40_spill] sm:$0xff] }
 0x356   : > { %v4224_v58 = vpop.f32.mrf.mxu0  ;;  %5563 = vmatprep.subr.bf16.mxu0 %v5494_v62  ;;  %v2119_v3 = vadd.f32 %v9180_v29, %v1966_v25  ;;  %v2426_v37 = vmax.f32 %v2410_v33, 0.0  ;;  %v9183_v62 = vld [vmem:[#allocation39_spill] sm:$0xff] }
 0x357   : > { %v2305_v4 = vpop.permute.xlu0 %2304  ;;  %v2384_v50 = vpop.permute.xlu1 %2383  ;;  %v8617_v17 = vadd.f32 %v4224_v58, %v4108_v21  ;;  %5564 = vmatpush1.bf16.msra.mxu0 %v5493_v35  ;;  %v2427_v51 = vmax.f32 %v2411_v1, 0.0  ;;  %v9181_v35 = vld [vmem:[#allocation41_spill] sm:$0xff]  ;;  %v5705_v29 = vld [vmem:[%s8592_s28 + $0x38] sm:$0xff] }
 0x358   : > { %v2412_v30 = vadd.f32 %v2384_v50, %v2348_v28  ;;  %v2413_v46 = vadd.f32 %v2384_v50, %v2349_v63  ;;  %v4226_v57 = vpop.f32.mrf.mxu0  ;;  %5713 = vperm.xlu1 %6533, %v5699_v19   ;;  %v2281_v21 = vadd.f32 %v9181_v35, %v2119_v3  ;;  %v2342_v5 = vmul.f32 %v2305_v4, %v9182_v20  ;;  %v5703_v19 = vld [vmem:[%s8592_s28 + $0x28] sm:$0xff] }
 0x359   : > { %v8619_v34 = vadd.f32 %v4226_v57, %v4110_v53  ;;  %5718 = vperm.xlu0 %6534, %v5700_v23   ;;  %v2343_v13 = vmul.f32 %v2305_v4, %v9183_v62  ;;  %v5704_v23 = vld [vmem:[%s8592_s28 + $0x30] sm:$0xff] }
 0x35a   : > { %v2428_v15 = vmax.f32 %v2412_v30, 0.0  ;;  %v2429_v24 = vmax.f32 %v2413_v46, 0.0 }
 0x35b   : > { %v2369_v36 = vpop.permute.xlu0 %2368  ;;  %v2310_v31 = vpop.permute.xlu1 %2309 }
 0x35c   : > { %v5491_v45 = vpack.c.bf16 %v2428_v15, %v2426_v37  ;;  %5723 = vperm.xlu1 %6533, %v5701_v56   ;;  %v5492_v25 = vpack.c.bf16 %v2429_v24, %v2427_v51  ;;  %v2406_v33 = vadd.f32 %v2369_v36, %v2342_v5  ;;  %v2344_v28 = vmul.f32 %v2310_v31, %v9184_v8  ;;  %v9185_v24 = vld [vmem:[#allocation20_spill] sm:$0xff]  ;;  %v9188_v5 = vld [vmem:[#allocation23_spill] sm:$0xff] }
 0x35d   : > { %v2345_v63 = vmul.f32 %v2310_v31, %v2281_v21  ;;  %5728 = vperm.xlu0 %6534, %v5702_v42   ;;  %v2407_v58 = vadd.f32 %v2369_v36, %v2343_v13  ;;  %v9186_v36 = vld [vmem:[#allocation21_spill] sm:$0xff]  ;;  %v9187_v21 = vld [vmem:[#allocation22_spill] sm:$0xff] }
 0x35e   : > { %5565 = vmatprep.subr.bf16.mxu0 %v5492_v25  ;;  %v2422_v53 = vmax.f32 %v2406_v33, 0.0 }
 0x35f   : > { %v784_v1 = vpop.permute.xlu0 %783  ;;  %v2374_v50 = vpop.permute.xlu1 %2373  ;;  %5566 = vmatpush1.bf16.msra.mxu0 %v5491_v45  ;;  %v2423_v3 = vmax.f32 %v2407_v58, 0.0 }
 0x360   : > { %v2408_v30 = vadd.f32 %v2374_v50, %v2344_v28  ;;  %v2409_v46 = vadd.f32 %v2374_v50, %v2345_v63  ;;  %5733 = vperm.xlu1 %6533, %v5703_v19   ;;  %v803_v56 = vmul.f32 %v784_v1, %v9185_v24  ;;  %v804_v31 = vmul.f32 %v784_v1, %v9186_v36 }
 0x361   : > { %5738 = vperm.xlu0 %6534, %v5704_v23   ;;  %v9189_v23 = vld [vmem:[#allocation16_spill] sm:$0xff] }
 0x362   : > { %v2424_v4 = vmax.f32 %v2408_v30, 0.0  ;;  %v2425_v57 = vmax.f32 %v2409_v46, 0.0 }
 0x363   : > { %v848_v37 = vpop.permute.xlu0 %847  ;;  %v789_v15 = vpop.permute.xlu1 %788 }
 0x364   : > { %v5489_v51 = vpack.c.bf16 %v2424_v4, %v2422_v53  ;;  %5743 = vperm.xlu1 %6533, %v5705_v29   ;;  %v5490_v42 = vpack.c.bf16 %v2425_v57, %v2423_v3  ;;  %v867_v35 = vadd.f32 %v848_v37, %v803_v56  ;;  %v805_v20 = vmul.f32 %v789_v15, %v9187_v21  ;;  %v9190_v53 = vld [vmem:[#allocation17_spill] sm:$0xff]  ;;  %v9191_v3 = vld [vmem:[#allocation18_spill] sm:$0xff] }
 0x365   : > { %v806_v45 = vmul.f32 %v789_v15, %v9188_v5  ;;  %v868_v62 = vadd.f32 %v848_v37, %v804_v31  ;;  %v9192_v15 = vld [vmem:[#allocation19_spill] sm:$0xff] }
 0x366   : > { %5567 = vmatprep.subr.bf16.mxu0 %v5490_v42  ;;  %v883_v28 = vmax.f32 %v867_v35, 0.0 }
 0x367   : > { %v774_v13 = vpop.permute.xlu0 %773  ;;  %v853_v25 = vpop.permute.xlu1 %852  ;;  %5568 = vmatpush1.bf16.msra.mxu0 %v5489_v51  ;;  %v884_v58 = vmax.f32 %v868_v62, 0.0 }
 0x368   : > { %v869_v33 = vadd.f32 %v853_v25, %v805_v20  ;;  %v870_v8 = vadd.f32 %v853_v25, %v806_v45  ;;  %v799_v30 = vmul.f32 %v774_v13, %v9189_v23  ;;  %v800_v4 = vmul.f32 %v774_v13, %v9190_v53  ;;  %v9196_v53 = vld [vmem:[#allocation15_spill] sm:$0xff] }
 0x36a   : > { %v885_v63 = vmax.f32 %v869_v33, 0.0  ;;  %v886_v19 = vmax.f32 %v870_v8, 0.0  ;;  %v9193_v33 = vld [vmem:[#allocation12_spill] sm:$0xff] }
 0x36b   : > { %v838_v50 = vpop.permute.xlu0 %837  ;;  %v779_v1 = vpop.permute.xlu1 %778 }
 0x36c   : > { %v5487_v46 = vpack.c.bf16 %v885_v63, %v883_v28  ;;  %v5488_v57 = vpack.c.bf16 %v886_v19, %v884_v58  ;;  %v863_v29 = vadd.f32 %v838_v50, %v799_v30  ;;  %v801_v37 = vmul.f32 %v779_v1, %v9191_v3  ;;  %v9194_v19 = vld [vmem:[#allocation13_spill] sm:$0xff]  ;;  %v9195_v30 = vld [vmem:[#allocation14_spill] sm:$0xff] }
 0x36d   : > { %v802_v24 = vmul.f32 %v779_v1, %v9192_v15  ;;  %v864_v56 = vadd.f32 %v838_v50, %v800_v4 }
 0x36e   : > { %5569 = vmatprep.subr.bf16.mxu0 %v5488_v57  ;;  %v879_v35 = vmax.f32 %v863_v29, 0.0 }
 0x36f   : > { %v764_v51 = vpop.permute.xlu0 %763  ;;  %v843_v36 = vpop.permute.xlu1 %842  ;;  %5570 = vmatpush1.bf16.msra.mxu0 %v5487_v46  ;;  %v880_v45 = vmax.f32 %v864_v56, 0.0 }
 0x370   : > { %v865_v31 = vadd.f32 %v843_v36, %v801_v37  ;;  %v866_v42 = vadd.f32 %v843_v36, %v802_v24  ;;  %v795_v8 = vmul.f32 %v764_v51, %v9193_v33  ;;  %v796_v58 = vmul.f32 %v764_v51, %v9194_v19 }
 0x372   : > { %v881_v21 = vmax.f32 %v865_v31, 0.0  ;;  %v882_v20 = vmax.f32 %v866_v42, 0.0  ;;  %v4350_v5 = vpop.f32.mrf.mxu1 }
 0x373   : > { %v4389_v62 = vadd.f32 %v4350_v5, %v8500_v14  ;;  %v828_v13 = vpop.permute.xlu0 %827  ;;  %v769_v25 = vpop.permute.xlu1 %768 }
 0x374   : > { %v5485_v28 = vpack.c.bf16 %v881_v21, %v879_v35  ;;  %v4352_v63 = vpop.f32.mrf.mxu1  ;;  %v5486_v1 = vpack.c.bf16 %v882_v20, %v880_v45  ;;  %v859_v23 = vadd.f32 %v828_v13, %v795_v8  ;;  %v797_v46 = vmul.f32 %v769_v25, %v9195_v30  ;;  %v9197_v45 = vld [vmem:[#allocation8_spill] sm:$0xff] }
 0x375   : > { %v4390_v50 = vadd.f32 %v4352_v63, %v8502_v44  ;;  %v798_v4 = vmul.f32 %v769_v25, %v9196_v53  ;;  %v860_v29 = vadd.f32 %v828_v13, %v796_v58  ;;  %v9198_v13 = vld [vmem:[#allocation9_spill] sm:$0xff]  ;;  %v9199_v58 = vld [vmem:[#allocation10_spill] sm:$0xff] }
 0x376   : > { %v4354_v57 = vpop.f32.mrf.mxu1  ;;  %5571 = vmatprep.subr.bf16.mxu0 %v5486_v1  ;;  %v875_v44 = vmax.f32 %v859_v23, 0.0  ;;  %v9200_v23 = vld [vmem:[#allocation11_spill] sm:$0xff] }
 0x377   : > { %v4391_v14 = vadd.f32 %v4354_v57, %v8515_v0  ;;  %v754_v3 = vpop.permute.xlu0 %753  ;;  %v833_v37 = vpop.permute.xlu1 %832  ;;  %5572 = vmatpush1.bf16.msra.mxu0 %v5485_v28  ;;  %v876_v35 = vmax.f32 %v860_v29, 0.0 }
 0x378   : > { %v861_v15 = vadd.f32 %v833_v37, %v797_v46  ;;  %v862_v24 = vadd.f32 %v833_v37, %v798_v4  ;;  %v4356_v56 = vpop.f32.mrf.mxu1  ;;  %v791_v0 = vmul.f32 %v754_v3, %v9197_v45  ;;  %v792_v25 = vmul.f32 %v754_v3, %v9198_v13 }
 0x379   : > { %v4392_v51 = vadd.f32 %v4356_v56, %v8526_v32 }
 0x37a   : > { %v877_v36 = vmax.f32 %v861_v15, 0.0  ;;  %v878_v31 = vmax.f32 %v862_v24, 0.0  ;;  %v4360_v42 = vpop.f32.mrf.mxu1 }
 0x37b   : > { %v4393_v21 = vadd.f32 %v4360_v42, %v8533_v43  ;;  %v818_v20 = vpop.permute.xlu0 %817  ;;  %v759_v5 = vpop.permute.xlu1 %758 }
 0x37c   : > { %v5483_v33 = vpack.c.bf16 %v877_v36, %v875_v44  ;;  %v4362_v8 = vpop.f32.mrf.mxu1  ;;  %v5484_v63 = vpack.c.bf16 %v878_v31, %v876_v35  ;;  %v855_v19 = vadd.f32 %v818_v20, %v791_v0  ;;  %v856_v32 = vadd.f32 %v818_v20, %v792_v25 }
 0x37d   : > { %v4394_v28 = vadd.f32 %v4362_v8, %v8544_v39  ;;  %v793_v1 = vmul.f32 %v759_v5, %v9199_v58  ;;  %v794_v30 = vmul.f32 %v759_v5, %v9200_v23 }
 0x37e   : > { %v4364_v46 = vpop.f32.mrf.mxu1  ;;  %v4513_v53 = vpop.f32.mrf.mxu0  ;;  %5573 = vmatprep.subr.bf16.mxu0 %v5484_v63  ;;  %v871_v44 = vmax.f32 %v855_v19, 0.0  ;;  %v872_v36 = vmax.f32 %v856_v32, 0.0 }
 0x37f   : > { %v4395_v43 = vadd.f32 %v4364_v46, %v8552_v49  ;;  %v4552_v4 = vadd.f32 %v4513_v53, %v4389_v62  ;;  %v8654_v57 = vpop.permute.xlu0 %5377  ;;  %v823_v29 = vpop.permute.xlu1 %822  ;;  %5574 = vmatpush1.bf16.msra.mxu0 %v5483_v33 }
 0x380   : > { %9201 = vst [vmem:[#allocation32_spill] sm:$0xff] %v8654_v57  ;;  %v857_v3 = vadd.f32 %v823_v29, %v793_v1  ;;  %v858_v37 = vadd.f32 %v823_v29, %v794_v30  ;;  %v4366_v39 = vpop.f32.mrf.mxu1  ;;  %v4515_v15 = vpop.f32.mrf.mxu0 }
 0x381   : > { %v4396_v24 = vadd.f32 %v4366_v39, %v8562_v16  ;;  %v4553_v56 = vadd.f32 %v4515_v15, %v4390_v50 }
 0x382   : > { %v873_v31 = vmax.f32 %v857_v3, 0.0  ;;  %v874_v42 = vmax.f32 %v858_v37, 0.0  ;;  %v4370_v35 = vpop.f32.mrf.mxu1  ;;  %v4517_v20 = vpop.f32.mrf.mxu0 }
 0x383   : > { %v4397_v49 = vadd.f32 %v4370_v35, %v8568_v40  ;;  %v4554_v62 = vadd.f32 %v4517_v20, %v4391_v14  ;;  %v8658_v5 = vpop.permute.xlu0 %5441  ;;  %v8660_v45 = vpop.permute.xlu1 %5382 }
 0x384   : > { %9202 = vst [vmem:[#allocation38_spill] sm:$0xff] %v8658_v5  ;;  %9203 = vst [vmem:[#allocation24_spill] sm:$0xff] %v8660_v45  ;;  %v5481_v0 = vpack.c.bf16 %v873_v31, %v871_v44  ;;  %v4372_v13 = vpop.f32.mrf.mxu1  ;;  %v4519_v25 = vpop.f32.mrf.mxu0  ;;  %v5482_v33 = vpack.c.bf16 %v874_v42, %v872_v36 }
 0x385   : > { %v4398_v16 = vadd.f32 %v4372_v13, %v8576_v61  ;;  %v4555_v50 = vadd.f32 %v4519_v25, %v4392_v51 }
 0x386   : > { %v4374_v8 = vpop.f32.mrf.mxu1  ;;  %v4523_v63 = vpop.f32.mrf.mxu0  ;;  %5575 = vmatprep.subr.bf16.mxu0 %v5482_v33 }
 0x387   : > { %v4399_v19 = vadd.f32 %v4374_v8, %v8587_v27  ;;  %v4556_v32 = vadd.f32 %v4523_v63, %v4393_v21  ;;  %v8664_v58 = vpop.permute.xlu0 %5367  ;;  %5576 = vmatpush1.bf16.msra.mxu0 %v5481_v0  ;;  %v8666_v40 = vpop.permute.xlu1 %5446 }
 0x388   : > { %9204 = vst [vmem:[#allocation53_spill] sm:$0xff] %v8664_v58  ;;  %9205 = vst [vmem:[#allocation50_spill] sm:$0xff] %v8666_v40  ;;  %v4376_v14 = vpop.f32.mrf.mxu1  ;;  %v4525_v1 = vpop.f32.mrf.mxu0 }
 0x389   : > { %v4400_v23 = vadd.f32 %v4376_v14, %v8598_v52  ;;  %v4557_v30 = vadd.f32 %v4525_v1, %v4394_v28 }
 0x38a   : > { %v4380_v46 = vpop.f32.mrf.mxu1  ;;  %v4527_v53 = vpop.f32.mrf.mxu0 }
 0x38b   : > { %v8670_v61 = vadd.f32 %v4380_v46, %v8605_v11  ;;  %v4558_v51 = vadd.f32 %v4527_v53, %v4395_v43  ;;  %v8672_v29 = vpop.permute.xlu0 %5431  ;;  %v8674_v27 = vpop.permute.xlu1 %5372 }
 0x38c   : > { %9206 = vst [vmem:[#allocation27_spill] sm:$0xff] %v8672_v29  ;;  %9207 = vst [vmem:[#allocation51_spill] sm:$0xff] %v8674_v27  ;;  %v4382_v21 = vpop.f32.mrf.mxu1  ;;  %v4529_v3 = vpop.f32.mrf.mxu0 }
 0x38d   : > { %v8677_v37 = vadd.f32 %v4382_v21, %v8611_v48  ;;  %v4559_v39 = vadd.f32 %v4529_v3, %v4396_v24 }
 0x38e   : > { %v4384_v15 = vpop.f32.mrf.mxu1  ;;  %v4533_v44 = vpop.f32.mrf.mxu0 }
 0x38f   : > { %v8680_v52 = vadd.f32 %v4384_v15, %v8617_v17  ;;  %v4560_v28 = vadd.f32 %v4533_v44, %v4397_v49  ;;  %v8682_v36 = vpop.permute.xlu0 %5357  ;;  %v8684_v11 = vpop.permute.xlu1 %5436 }
 0x390   : > { %9208 = vst [vmem:[#allocation33_spill] sm:$0xff] %v8684_v11  ;;  %v4386_v43 = vpop.f32.mrf.mxu1  ;;  %v4535_v31 = vpop.f32.mrf.mxu0 }
 0x391   : > { %v8687_v42 = vadd.f32 %v4386_v43, %v8619_v34  ;;  %v4561_v35 = vadd.f32 %v4535_v31, %v4398_v16 }
 0x392   : > { %v4537_v20 = vpop.f32.mrf.mxu0  ;;  %v4643_v48 = vpop.f32.mrf.mxu1 }
 0x393   : > { %v4562_v0 = vadd.f32 %v4537_v20, %v4399_v19  ;;  %v4682_v24 = vadd.f32 %v4643_v48, %v4552_v4  ;;  %v8689_v13 = vpop.permute.xlu0 %5421  ;;  %v8691_v25 = vpop.permute.xlu1 %5362 }
 0x394   : > { %9209 = vst [vmem:[#allocation52_spill] sm:$0xff] %v8689_v13  ;;  %9210 = vst [vmem:[#allocation25_spill] sm:$0xff] %v8691_v25  ;;  %v4539_v17 = vpop.f32.mrf.mxu0  ;;  %v4645_v49 = vpop.f32.mrf.mxu1 }
 0x395   : > { %v4563_v33 = vadd.f32 %v4539_v17, %v4400_v23  ;;  %v4683_v8 = vadd.f32 %v4645_v49, %v4553_v56 }
 0x396   : > { %v8693_v63 = vpop.f32.mrf.mxu0  ;;  %v4647_v14 = vpop.f32.mrf.mxu1 }
 0x397   : > { %v4684_v1 = vadd.f32 %v4647_v14, %v4554_v62  ;;  %v8695_v46 = vpop.permute.xlu0 %5347  ;;  %v8697_v34 = vpop.permute.xlu1 %5426 }
 0x398   : > { %9211 = vst [vmem:[#allocation30_spill] sm:$0xff] %v8697_v34  ;;  %v8699_v16 = vpop.f32.mrf.mxu0  ;;  %v4649_v19 = vpop.f32.mrf.mxu1 }
 0x399   : > { %v8701_v4 = vadd.f32 %v4649_v19, %v4555_v50 }
 0x39a   : > { %v8703_v53 = vpop.f32.mrf.mxu0  ;;  %v4653_v21 = vpop.f32.mrf.mxu1 }
 0x39b   : > { %v8705_v3 = vadd.f32 %v4653_v21, %v4556_v32  ;;  %v8707_v23 = vpop.permute.xlu0 %5411  ;;  %v8709_v56 = vpop.permute.xlu1 %5352 }
 0x39c   : > { %v8711_v15 = vpop.f32.mrf.mxu0  ;;  %v4655_v62 = vpop.f32.mrf.mxu1 }
 0x39d   : > { %v8713_v44 = vadd.f32 %v4655_v62, %v4557_v30 }
 0x39e   : > { %v4657_v43 = vpop.f32.mrf.mxu1  ;;  %v4805_v31 = vpop.f32.mrf.mxu0 }
 0x39f   : > { %v8715_v20 = vadd.f32 %v4657_v43, %v4558_v51  ;;  %v4844_v50 = vadd.f32 %v4805_v31, %v4682_v24  ;;  %v3859_v48 = vpop.permute.xlu0 %3858  ;;  %v8717_v17 = vpop.permute.xlu1 %5416 }
 0x3a0   : > { %v4659_v49 = vpop.f32.mrf.mxu1  ;;  %v4807_v32 = vpop.f32.mrf.mxu0  ;;  %v3878_v51 = vmul.f32 %v3859_v48, %v8465_v41  ;;  %v3879_v24 = vmul.f32 %v3859_v48, %v8471_v38 }
 0x3a1   : > { %v8719_v14 = vadd.f32 %v4659_v49, %v4559_v39  ;;  %v4845_v19 = vadd.f32 %v4807_v32, %v4683_v8 }
 0x3a2   : > { %v4663_v21 = vpop.f32.mrf.mxu1  ;;  %v4809_v40 = vpop.f32.mrf.mxu0 }
 0x3a3   : > { %v8721_v45 = vadd.f32 %v4663_v21, %v4560_v28  ;;  %v8723_v5 = vadd.f32 %v4809_v40, %v4684_v1  ;;  %v3923_v30 = vpop.permute.xlu0 %3922  ;;  %v3864_v62 = vpop.permute.xlu1 %3863 }
 0x3a4   : > { %v4665_v43 = vpop.f32.mrf.mxu1  ;;  %v3942_v57 = vadd.f32 %v3923_v30, %v3878_v51  ;;  %v3880_v39 = vmul.f32 %v3864_v62, %v8481_v59  ;;  %v3881_v8 = vmul.f32 %v3864_v62, %v8483_v9  ;;  %v8731_v49 = vpop.f32.mrf.mxu0  ;;  %v3943_v32 = vadd.f32 %v3923_v30, %v3879_v24 }
 0x3a5   : > { %v8727_v31 = vadd.f32 %v4665_v43, %v4561_v35 }
 0x3a6   : > { %v4667_v28 = vpop.f32.mrf.mxu1  ;;  %v3958_v38 = vmax.f32 %v3942_v57, 0.0  ;;  %v8737_v35 = vpop.f32.mrf.mxu0  ;;  %v3959_v9 = vmax.f32 %v3943_v32, 0.0 }
 0x3a7   : > { %v8733_v40 = vadd.f32 %v4667_v28, %v4562_v0  ;;  %v3849_v1 = vpop.permute.xlu0 %3848  ;;  %v3928_v21 = vpop.permute.xlu1 %3927 }
 0x3a8   : > { %v3944_v11 = vadd.f32 %v3928_v21, %v3880_v39  ;;  %v3945_v41 = vadd.f32 %v3928_v21, %v3881_v8  ;;  %v4669_v27 = vpop.f32.mrf.mxu1  ;;  %v3874_v0 = vmul.f32 %v3849_v1, %v8438_v26  ;;  %v3875_v39 = vmul.f32 %v3849_v1, %v8443_v47  ;;  %v8749_v57 = vpop.f32.mrf.mxu0 }
 0x3a9   : > { %v8735_v29 = vadd.f32 %v4669_v27, %v4563_v33 }
 0x3aa   : > { %v3960_v48 = vmax.f32 %v3944_v11, 0.0  ;;  %v3961_v59 = vmax.f32 %v3945_v41, 0.0  ;;  %v8739_v51 = vpop.f32.mrf.mxu1 }
 0x3ab   : > { %v3913_v62 = vpop.permute.xlu0 %3912  ;;  %v3854_v43 = vpop.permute.xlu1 %3853 }
 0x3ac   : > { %v8742_v30 = vpack.c.bf16 %v3960_v48, %v3958_v38  ;;  %v8744_v24 = vpop.f32.mrf.mxu1  ;;  %v8747_v27 = vpack.c.bf16 %v3961_v59, %v3959_v9  ;;  %v3938_v33 = vadd.f32 %v3913_v62, %v3874_v0  ;;  %v3876_v11 = vmul.f32 %v3854_v43, %v8452_v10 }
 0x3ad   : > { %v3877_v8 = vmul.f32 %v3854_v43, %v8456_v6  ;;  %v3939_v32 = vadd.f32 %v3913_v62, %v3875_v39 }
 0x3ae   : > { %9212 = vst [vmem:[#allocation36_spill] sm:$0xff] %v8742_v30  ;;  %9213 = vst [vmem:[#allocation26_spill] sm:$0xff] %v8747_v27  ;;  %v8753_v28 = vpop.f32.mrf.mxu1  ;;  %v8757_v30 = vpop.f32.mrf.mxu0  ;;  %v3954_v47 = vmax.f32 %v3938_v33, 0.0 }
 0x3af   : > { %v3839_v21 = vpop.permute.xlu0 %3838  ;;  %v3918_v26 = vpop.permute.xlu1 %3917  ;;  %v3955_v0 = vmax.f32 %v3939_v32, 0.0 }
 0x3b0   : > { %v3940_v41 = vadd.f32 %v3918_v26, %v3876_v11  ;;  %v3941_v38 = vadd.f32 %v3918_v26, %v3877_v8  ;;  %v8755_v48 = vpop.f32.mrf.mxu1  ;;  %v3870_v43 = vmul.f32 %v3839_v21, %v8414_v18  ;;  %v3871_v11 = vmul.f32 %v3839_v21, %v8417_v22  ;;  %v8769_v33 = vpop.f32.mrf.mxu0 }
 0x3b1   : > { %9214 = vst [vmem:[#allocation49_spill] sm:$0xff] %v8755_v48 }
 0x3b2   : > { %v3956_v1 = vmax.f32 %v3940_v41, 0.0  ;;  %v3957_v59 = vmax.f32 %v3941_v38, 0.0  ;;  %v4968_v9 = vpop.f32.mrf.mxu1 }
 0x3b3   : > { %v8759_v27 = vadd.f32 %v4968_v9, %v4844_v50  ;;  %v3903_v10 = vpop.permute.xlu0 %3902  ;;  %v3844_v6 = vpop.permute.xlu1 %3843 }
 0x3b4   : > { %v8762_v62 = vpack.c.bf16 %v3956_v1, %v3954_v47  ;;  %v4970_v39 = vpop.f32.mrf.mxu1  ;;  %v8767_v26 = vpack.c.bf16 %v3957_v59, %v3955_v0  ;;  %v3934_v41 = vadd.f32 %v3903_v10, %v3870_v43  ;;  %v3872_v32 = vmul.f32 %v3844_v6, %v8426_v12 }
 0x3b5   : > { %v8765_v8 = vadd.f32 %v4970_v39, %v4845_v19  ;;  %v3873_v50 = vmul.f32 %v3844_v6, %v8429_v55  ;;  %v3935_v9 = vadd.f32 %v3903_v10, %v3871_v11  ;;  %v8776_v19 = vpop.f32.mrf.mxu0 }
 0x3b6   : > { %9215 = vst [vmem:[#allocation46_spill] sm:$0xff] %v8762_v62  ;;  %9216 = vst [vmem:[#allocation47_spill] sm:$0xff] %v8767_v26  ;;  %v4972_v38 = vpop.f32.mrf.mxu1  ;;  %v3950_v21 = vmax.f32 %v3934_v41, 0.0 }
 0x3b7   : > { %v8774_v18 = vadd.f32 %v4972_v38, %v8723_v5  ;;  %v3829_v47 = vpop.permute.xlu0 %3828  ;;  %v3908_v1 = vpop.permute.xlu1 %3907  ;;  %v3951_v39 = vmax.f32 %v3935_v9, 0.0 }
 0x3b8   : > { %v3936_v62 = vadd.f32 %v3908_v1, %v3872_v32  ;;  %v3937_v22 = vadd.f32 %v3908_v1, %v3873_v50  ;;  %v3866_v12 = vmul.f32 %v3829_v47, %v8390_v2  ;;  %v3867_v55 = vmul.f32 %v3829_v47, %v8393_v54  ;;  %v8784_v6 = vpop.f32.mrf.mxu0 }
 0x3ba   : > { %v3952_v59 = vmax.f32 %v3936_v62, 0.0  ;;  %v3953_v0 = vmax.f32 %v3937_v22, 0.0  ;;  %v8788_v1 = vpop.f32.mrf.mxu0 }
 0x3bb   : > { %v3893_v43 = vpop.permute.xlu0 %3892  ;;  %v3834_v26 = vpop.permute.xlu1 %3833 }
 0x3bc   : > { %v8780_v10 = vpack.c.bf16 %v3952_v59, %v3950_v21  ;;  %v8782_v5 = vpack.c.bf16 %v3953_v0, %v3951_v39  ;;  %v3930_v11 = vadd.f32 %v3893_v43, %v3866_v12  ;;  %v3931_v32 = vadd.f32 %v3893_v43, %v3867_v55  ;;  %v6664_v21 = vld [vmem:[%s9041_s5 + $0x4] ss:$8 sps:$4 sm:$0xff]  }
 0x3bd   : > { %v3868_v50 = vmul.f32 %v3834_v26, %v8402_v7  ;;  %v3869_v62 = vmul.f32 %v3834_v26, %v8405_v60  ;;  %5593 = vmatprep.mubr.bf16.mxu0 %v6664_v21  ;;  %v8797_v7 = vpop.f32.mrf.mxu0  ;;  %v4974_v26 = vpop.f32.mrf.mxu1 }
 0x3be   : > { %9217 = vst [vmem:[#allocation31_spill] sm:$0xff] %v8780_v10  ;;  %9218 = vst [vmem:[#allocation48_spill] sm:$0xff] %v8782_v5  ;;  %v3946_v2 = vmax.f32 %v3930_v11, 0.0  ;;  %v3947_v22 = vmax.f32 %v3931_v32, 0.0 }
 0x3bf   : > { %v3898_v41 = vpop.permute.xlu1 %3897  ;;  %9221 = vst [vmem:[#allocation45_spill] sm:$0xff] %v8797_v7  ;;  %v8799_v60 = vpop.f32.mrf.mxu0 }
 0x3c0   : > { %v3932_v38 = vadd.f32 %v3898_v41, %v3868_v50  ;;  %v3933_v9 = vadd.f32 %v3898_v41, %v3869_v62  ;;  %9222 = vst [vmem:[#allocation42_spill] sm:$0xff] %v8799_v60  ;;  %v4978_v43 = vpop.f32.mrf.mxu1  ;;  %v4847_v60 = vadd.f32 %v8731_v49, %v8701_v4 }
 0x3c1   : > { %v8801_v39 = vpop.f32.mrf.mxu0 }
 0x3c2   : > { %v3948_v54 = vmax.f32 %v3932_v38, 0.0  ;;  %v3949_v47 = vmax.f32 %v3933_v9, 0.0  ;;  %9223 = vst [vmem:[#allocation43_spill] sm:$0xff] %v8801_v39  ;;  %v4980_v55 = vpop.f32.mrf.mxu1 }
 0x3c3   : > { %v8803_v12 = vpop.f32.mrf.mxu0 }
 0x3c4   : > { %v8793_v59 = vpack.c.bf16 %v3948_v54, %v3946_v2  ;;  %v8795_v0 = vpack.c.bf16 %v3949_v47, %v3947_v22  ;;  %9224 = vst [vmem:[#allocation29_spill] sm:$0xff] %v8803_v12  ;;  %v4982_v32 = vpop.f32.mrf.mxu1 }
 0x3c5   : > { %v8805_v11 = vpop.f32.mrf.mxu0 }
 0x3c6   : > { %9219 = vst [vmem:[#allocation28_spill] sm:$0xff] %v8793_v59  ;;  %9220 = vst [vmem:[#allocation35_spill] sm:$0xff] %v8795_v0  ;;  %v4984_v62 = vpop.f32.mrf.mxu1 }
 0x3c7   : > { %9225 = vst [vmem:[#allocation44_spill] sm:$0xff] %v8805_v11  ;;  %v5120_v50 = vpop.f32.mrf.mxu0 }
 0x3c8   : > { %v8807_v38 = vpop.f32.mrf.mxu1  ;;  %v5159_v58 = vadd.f32 %v5120_v50, %v8759_v27  ;;  %v4849_v27 = vadd.f32 %v8749_v57, %v8713_v44 }
 0x3c9   : > { %v5122_v41 = vpop.f32.mrf.mxu0 }
 0x3ca   : > { %v8809_v2 = vpop.f32.mrf.mxu1 }
 0x3cb   : > { %v5124_v9 = vpop.f32.mrf.mxu0 }
 0x3cc   : > { %v8811_v54 = vpop.f32.mrf.mxu1  ;;  %v5161_v13 = vadd.f32 %v5124_v9, %v8774_v18  ;;  %v5012_v18 = vadd.f32 %v4980_v55, %v4849_v27  ;;  %v9232_v27 = vld [vmem:[#allocation45_spill] sm:$0xff] }
 0x3cd   : > { %v5126_v22 = vpop.f32.mrf.mxu0  ;;  %9226 = vst [vmem:[#allocation34_spill] sm:$0xff] %v8811_v54 }
 0x3ce   : > { %v8813_v21 = vpop.f32.mrf.mxu1 }
 0x3cf   : > { %v5130_v47 = vpop.f32.mrf.mxu0  ;;  %9227 = vst [vmem:[#allocation41_spill] sm:$0xff] %v8813_v21  ;;  %v5160_v21 = vadd.f32 %v5122_v41, %v8765_v8 }
 0x3d0   : > { %v8815_v0 = vpop.f32.mrf.mxu1 }
 0x3d1   : > { %v5132_v59 = vpop.f32.mrf.mxu0  ;;  %9228 = vst [vmem:[#allocation37_spill] sm:$0xff] %v8815_v0 }
 0x3d2   : > { %v8817_v5 = vpop.f32.mrf.mxu1 }
 0x3d3   : > { %v5134_v10 = vpop.f32.mrf.mxu0  ;;  %9229 = vst [vmem:[#allocation39_spill] sm:$0xff] %v8817_v5  ;;  %v4848_v5 = vadd.f32 %v8737_v35, %v8705_v3  ;;  %v4564_v3 = vadd.f32 %v8693_v63, %v8670_v61  ;;  %v4565_v35 = vadd.f32 %v8699_v16, %v8677_v37  ;;  %v4850_v61 = vadd.f32 %v8757_v30, %v8715_v20 }
 0x3d4   : > { %v8819_v12 = vpop.f32.mrf.mxu1  ;;  %v4851_v37 = vadd.f32 %v8769_v33, %v8719_v14  ;;  %v5164_v63 = vadd.f32 %v5132_v59, %v5012_v18 }
 0x3d5   : > { %v5136_v11 = vpop.f32.mrf.mxu0  ;;  %9230 = vst [vmem:[#allocation40_spill] sm:$0xff] %v8819_v12  ;;  %v5010_v12 = vadd.f32 %v4974_v26, %v4847_v60  ;;  %v5011_v4 = vadd.f32 %v4978_v43, %v4848_v5 }
 0x3d6   : > { %v8823_v39 = vpop.f32.mrf.mxu1  ;;  %v5014_v20 = vadd.f32 %v4984_v62, %v4851_v37  ;;  %v4695_v62 = vadd.f32 %v8744_v24, %v4565_v35  ;;  %v9233_v24 = vld [vmem:[#allocation52_spill] sm:$0xff]  ;;  %v9236_v35 = vld [vmem:[#allocation42_spill] sm:$0xff] }
 0x3d7   : > { %v8821_v48 = vpop.f32.mrf.mxu0  ;;  %9231 = vst [vmem:[#allocation20_spill] sm:$0xff] %v8823_v39  ;;  %v5162_v49 = vadd.f32 %v5126_v22, %v5010_v12  ;;  %v5163_v44 = vadd.f32 %v5130_v47, %v5011_v4 }
 0x3d8   : > { %v5166_v41 = vadd.f32 %v5136_v11, %v5014_v20 }
 0x3d9   : > { %v8829_v54 = vpop.f32.mrf.mxu0 }
 0x3db   : > { %v8837_v8 = vpop.f32.mrf.mxu0 }
 0x3fd   : > { %v5282_v34 = vpop.f32.mrf.mxu1 }
 0x3fe   : > { %v5321_v0 = vadd.f32 %v5282_v34, %v5159_v58 }
 0x3ff   : > { %v5284_v25 = vpop.f32.mrf.mxu1 }
 0x400   : > { %v5385_v39 = vmul.f32 %v8695_v46, %v5321_v0  ;;  %v5322_v7 = vadd.f32 %v5284_v25, %v5160_v21  ;;  %v4566_v25 = vadd.f32 %v8703_v53, %v8680_v52 }
 0x401   : > { %v5286_v50 = vpop.f32.mrf.mxu1 }
 0x402   : > { %v5386_v58 = vmul.f32 %v8695_v46, %v5322_v7  ;;  %v5323_v34 = vadd.f32 %v5286_v50, %v5161_v13  ;;  %v5449_v57 = vadd.f32 %v8707_v23, %v5385_v39  ;;  %v8850_v13 = vadd.f32 %v8711_v15, %v8687_v42  ;;  %v5146_v46 = vpop.f32.mrf.mxu0 }
 0x403   : > { %v5288_v0 = vpop.f32.mrf.mxu1  ;;  %v4694_v39 = vadd.f32 %v8739_v51, %v4564_v3  ;;  %v4852_v42 = vadd.f32 %v8776_v19, %v8721_v45  ;;  %v5013_v15 = vadd.f32 %v4982_v32, %v4850_v61  ;;  %v4696_v21 = vadd.f32 %v8753_v28, %v4566_v25  ;;  %v9239_v61 = vld [vmem:[#allocation53_spill] sm:$0xff] }
 0x404   : > { %v5387_v5 = vmul.f32 %v8709_v56, %v5323_v34  ;;  %v5324_v60 = vadd.f32 %v5288_v0, %v5162_v49  ;;  %v5450_v16 = vadd.f32 %v8707_v23, %v5386_v58  ;;  %v5465_v43 = vmax.f32 %v5449_v57, 0.0  ;;  %v5150_v9 = vpop.f32.mrf.mxu0  ;;  %v9234_v49 = vld [vmem:[#allocation25_spill] sm:$0xff] }
 0x405   : > { %v5292_v52 = vpop.f32.mrf.mxu1  ;;  %v4853_v23 = vadd.f32 %v8784_v6, %v8727_v31  ;;  %v5015_v12 = vadd.f32 %v8807_v38, %v4852_v42  ;;  %v4855_v50 = vadd.f32 %v9232_v27, %v8735_v29  ;;  %v4856_v18 = vadd.f32 %v9236_v35, %v4694_v39  ;;  %v9237_v0 = vld [vmem:[#allocation41_spill] sm:$0xff]  ;;  %v9238_v29 = vld [vmem:[#allocation30_spill] sm:$0xff]  ;;  %v9251_v35 = vld [vmem:[#allocation32_spill] sm:$0xff] }
 0x406   : > { %v5451_v53 = vadd.f32 %v8717_v17, %v5387_v5  ;;  %v5388_v7 = vmul.f32 %v8709_v56, %v5324_v60  ;;  %v5325_v26 = vadd.f32 %v5292_v52, %v5163_v44  ;;  %v5165_v56 = vadd.f32 %v5134_v10, %v5013_v15  ;;  %v9248_v27 = vld [vmem:[#allocation33_spill] sm:$0xff] }
 0x407   : > { %v5294_v30 = vpop.f32.mrf.mxu1  ;;  %v5466_v45 = vmax.f32 %v5450_v16, 0.0  ;;  %v5016_v10 = vadd.f32 %v8809_v2, %v4853_v23  ;;  %v5167_v38 = vadd.f32 %v8821_v48, %v5015_v12  ;;  %v5152_v2 = vpop.f32.mrf.mxu0  ;;  %v5018_v28 = vadd.f32 %v9237_v0, %v4855_v50  ;;  %v9241_v16 = vld [vmem:[#allocation37_spill] sm:$0xff] }
 0x408   : > { %v5467_v14 = vmax.f32 %v5451_v53, 0.0  ;;  %v5452_v33 = vadd.f32 %v8717_v17, %v5388_v7  ;;  %v5326_v59 = vadd.f32 %v5294_v30, %v5164_v63  ;;  %v5389_v55 = vmul.f32 %v8682_v36, %v5325_v26  ;;  %v9240_v63 = vld [vmem:[#allocation43_spill] sm:$0xff] }
 0x409   : > { %v5296_v51 = vpop.f32.mrf.mxu1  ;;  %v4854_v17 = vadd.f32 %v8788_v1, %v8733_v40  ;;  %v5168_v34 = vadd.f32 %v8829_v54, %v5016_v10  ;;  %v4857_v52 = vadd.f32 %v9240_v63, %v4695_v62  ;;  %v5019_v53 = vadd.f32 %v9241_v16, %v4856_v18  ;;  %v5154_v15 = vpop.f32.mrf.mxu0  ;;  %v9253_v63 = vld [vmem:[#allocation24_spill] sm:$0xff] }
 0x40a   : > { %v8867_v19 = vpack.c.bf16 %v5467_v14, %v5465_v43  ;;  %v5468_v32 = vmax.f32 %v5452_v33, 0.0  ;;  %v5390_v22 = vmul.f32 %v8682_v36, %v5326_v59  ;;  %v5327_v31 = vadd.f32 %v5296_v51, %v5165_v56  ;;  %v9235_v36 = vld [vmem:[#allocation34_spill] sm:$0xff]  ;;  %v9243_v33 = vld [vmem:[#allocation39_spill] sm:$0xff] }
 0x40b   : > { %v5298_v6 = vpop.f32.mrf.mxu1  ;;  %v5453_v4 = vadd.f32 %v9233_v24, %v5389_v55  ;;  %v5017_v58 = vadd.f32 %v9235_v36, %v4854_v17  ;;  %v5170_v42 = vadd.f32 %v5146_v46, %v5018_v28  ;;  %v5020_v59 = vadd.f32 %v9243_v33, %v4857_v52  ;;  %v9244_v51 = vld [vmem:[#allocation27_spill] sm:$0xff]  ;;  %v9246_v46 = vld [vmem:[#allocation29_spill] sm:$0xff]  ;;  %v9256_v33 = vld [vmem:[#allocation36_spill] sm:$0xff] }
 0x40c   : > { %v5328_v47 = vadd.f32 %v5298_v6, %v5166_v41  ;;  %v8875_v11 = vpack.c.bf16 %v5468_v32, %v5466_v45  ;;  %v5391_v40 = vmul.f32 %v9234_v49, %v5327_v31  ;;  %v5454_v25 = vadd.f32 %v9233_v24, %v5390_v22  ;;  %v9245_v45 = vld [vmem:[#allocation51_spill] sm:$0xff]  ;;  %v9247_v22 = vld [vmem:[#allocation44_spill] sm:$0xff] }
 0x40d   : > { %v5302_v1 = vpop.f32.mrf.mxu1  ;;  %v5169_v5 = vadd.f32 %v8837_v8, %v5017_v58  ;;  %v5469_v7 = vmax.f32 %v5453_v4, 0.0  ;;  %v9242_v8 = vld [vmem:[#allocation49_spill] sm:$0xff]  ;;  %v5171_v55 = vadd.f32 %v5150_v9, %v5019_v53  ;;  %v4858_v17 = vadd.f32 %v9246_v46, %v4696_v21  ;;  %v9249_v4 = vld [vmem:[#allocation40_spill] sm:$0xff]  ;;  %v6671_v46 = vld [vmem:[%s9041_s5 + $0x30] ss:$8 sps:$4 sm:$0xff]  }
 0x40e   : > { %v5392_v48 = vmul.f32 %v9234_v49, %v5328_v47  ;;  %v5329_v3 = vadd.f32 %v5302_v1, %v5167_v38  ;;  %v5455_v44 = vadd.f32 %v9238_v29, %v5391_v40  ;;  %v4697_v14 = vadd.f32 %v9242_v8, %v8850_v13  ;;  %v5156_v47 = vpop.f32.mrf.mxu0  ;;  %v9250_v40 = vld [vmem:[#allocation20_spill] sm:$0xff] }
 0x40f   : > { %v5304_v57 = vpop.f32.mrf.mxu1  ;;  %v5470_v23 = vmax.f32 %v5454_v25, 0.0  ;;  %v5172_v6 = vadd.f32 %v5152_v2, %v5020_v59  ;;  %v5021_v49 = vadd.f32 %v9249_v4, %v4858_v17  ;;  %v9257_v59 = vld [vmem:[#allocation47_spill] sm:$0xff]  ;;  %v5645_v17 = vpop.permute.xlu0 %5644 }
 0x410   : > { %v5456_v60 = vadd.f32 %v9238_v29, %v5392_v48  ;;  %v5393_v37 = vmul.f32 %v9239_v61, %v5329_v3  ;;  %v5330_v54 = vadd.f32 %v5304_v57, %v5168_v34  ;;  %v5471_v26 = vmax.f32 %v5455_v44, 0.0 }
 0x411   : > { %v5306_v39 = vpop.f32.mrf.mxu1  ;;  %v4859_v31 = vadd.f32 %v9247_v22, %v4697_v14  ;;  %v5173_v48 = vadd.f32 %v5154_v15, %v5021_v49  ;;  %v9255_v14 = vld [vmem:[#allocation26_spill] sm:$0xff]  ;;  %v5650_v22 = vpop.permute.xlu1 %5649 }
 0x412   : > { %v5472_v20 = vmax.f32 %v5456_v60, 0.0  ;;  %v5394_v30 = vmul.f32 %v9239_v61, %v5330_v54  ;;  %v5331_v43 = vadd.f32 %v5306_v39, %v5169_v5  ;;  %v5507_v12 = vpack.c.bf16 %v5471_v26, %v5469_v7  ;;  %v9254_v7 = vld [vmem:[#allocation50_spill] sm:$0xff] }
 0x413   : > { %v5308_v56 = vpop.f32.mrf.mxu1  ;;  %v5457_v41 = vadd.f32 %v9244_v51, %v5393_v37  ;;  %v5022_v1 = vadd.f32 %v9250_v40, %v4859_v31  ;;  %v9252_v37 = vld [vmem:[#allocation38_spill] sm:$0xff]  ;;  %v5655_v31 = vpop.permute.xlu0 %5654 }
 0x414   : > { %v5395_v32 = vmul.f32 %v9245_v45, %v5331_v43  ;;  %v5332_v62 = vadd.f32 %v5308_v56, %v5170_v42  ;;  %v5508_v38 = vpack.c.bf16 %v5472_v20, %v5470_v23  ;;  %v5458_v13 = vadd.f32 %v9244_v51, %v5394_v30  ;;  %v9258_v23 = vld [vmem:[#allocation46_spill] sm:$0xff]  ;;  %v9259_v56 = vld [vmem:[#allocation48_spill] sm:$0xff]  ;;  %v9261_v51 = vld [vmem:[#allocation35_spill] sm:$0xff] }
 0x415   : > { %v5312_v10 = vpop.f32.mrf.mxu1  ;;  %v5473_v58 = vmax.f32 %v5457_v41, 0.0  ;;  %v5174_v3 = vadd.f32 %v5156_v47, %v5022_v1  ;;  %v6665_v41 = vld [vmem:[%s9041_s5 + $0x10] ss:$8 sps:$4 sm:$0xff]  }
 0x416   : > { %v5459_v50 = vadd.f32 %v9248_v27, %v5395_v32  ;;  %v5396_v24 = vmul.f32 %v9245_v45, %v5332_v62  ;;  %v5333_v9 = vadd.f32 %v5312_v10, %v5171_v55  ;;  %v5474_v28 = vmax.f32 %v5458_v13, 0.0  ;;  %v9260_v55 = vld [vmem:[#allocation31_spill] sm:$0xff]  ;;  %v6670_v45 = vld [vmem:[%s9041_s5 + $0x24] ss:$8 sps:$4 sm:$0xff]   ;;  %v6668_v32 = vld [vmem:[%s9041_s5 + $0x20] ss:$8 sps:$4 sm:$0xff]  }
 0x417   : > { %v5314_v36 = vpop.f32.mrf.mxu1  ;;  %v6673_v62 = vld [vmem:[%s9041_s5 + $0x34] ss:$8 sps:$4 sm:$0xff]   ;;  %v5665_v10 = vpop.permute.xlu0 %5664 }
 0x418   : > { %v5475_v21 = vmax.f32 %v5459_v50, 0.0  ;;  %v5460_v34 = vadd.f32 %v9248_v27, %v5396_v24  ;;  %v5334_v2 = vadd.f32 %v5314_v36, %v5172_v6  ;;  %v5397_v18 = vmul.f32 %v9251_v35, %v5333_v9  ;;  %v5660_v6 = vpop.permute.xlu1 %5659 }
 0x419   : > { %v5316_v0 = vpop.f32.mrf.mxu1 }
 0x41a   : > { %v5509_v25 = vpack.c.bf16 %v5475_v21, %v5473_v58  ;;  %v5476_v29 = vmax.f32 %v5460_v34, 0.0  ;;  %v5398_v44 = vmul.f32 %v9251_v35, %v5334_v2  ;;  %v5335_v57 = vadd.f32 %v5316_v0, %v5173_v48 }
 0x41b   : > { %v5318_v5 = vpop.f32.mrf.mxu1  ;;  %v5461_v54 = vadd.f32 %v9252_v37, %v5397_v18  ;;  %v8949_v47 = vpop.permute.xlu0 %5674 }
 0x41c   : > { %v5336_v60 = vadd.f32 %v5318_v5, %v5174_v3  ;;  %v5510_v61 = vpack.c.bf16 %v5476_v29, %v5474_v28  ;;  %v5399_v52 = vmul.f32 %v9253_v63, %v5335_v57  ;;  %v5462_v16 = vadd.f32 %v9252_v37, %v5398_v44 }
 0x41d   : > { %v5477_v42 = vmax.f32 %v5461_v54, 0.0 }
 0x41e   : > { %v5400_v53 = vmul.f32 %v9253_v63, %v5336_v60  ;;  %v5463_v26 = vadd.f32 %v9254_v7, %v5399_v52  ;;  %v5478_v20 = vmax.f32 %v5462_v16, 0.0 }
 0x41f   : > { %v5709_v24 = vpop.permute.xlu0 %5708 }
 0x420   : > { %v5464_v39 = vadd.f32 %v9254_v7, %v5400_v53  ;;  %v5479_v15 = vmax.f32 %v5463_v26, 0.0 }
 0x422   : > { %v5480_v30 = vmax.f32 %v5464_v39, 0.0  ;;  %v5511_v43 = vpack.c.bf16 %v5479_v15, %v5477_v42 }
 0x424   : > { %v5512_v8 = vpack.c.bf16 %v5480_v30, %v5478_v20 }
 0x426   : > { %5577 = vmatprep.subr.bf16.mxu0 %v5512_v8 }
 0x427   : > { %5578 = vmatpush2.bf16.msra.mxu0 %v5511_v43 }
 0x428   : > { %5579 = vmatprep.subr.bf16.mxu0 %v5510_v61 }
 0x42b   : > { %5580 = vmatpush2.bf16.msra.mxu0 %v5509_v25  ;;  %v5719_v25 = vpop.permute.xlu0 %5718 }
 0x42c   : > { %5581 = vmatprep.subr.bf16.mxu0 %v5508_v38  ;;  %v8947_v38 = vpop.permute.xlu1 %5669 }
 0x42f   : > { %5582 = vmatpush2.bf16.msra.mxu0 %v5507_v12  ;;  %v9262_v12 = vld [vmem:[#allocation28_spill] sm:$0xff]  ;;  %v5729_v20 = vpop.permute.xlu0 %5728 }
 0x430   : > { %5583 = vmatprep.subr.bf16.mxu0 %v8875_v11  ;;  %v6662_v11 = vld [vmem:[%s9041_s5] ss:$8 sps:$4 sm:$0xff]   ;;  %v8952_v13 = vpop.permute.xlu1 %5679 }
 0x433   : > { %5584 = vmatpush2.bf16.msra.mxu0 %v8867_v19  ;;  %v6667_v19 = vld [vmem:[%s9041_s5 + $0x14] ss:$8 sps:$4 sm:$0xff]  }
 0x434   : > { %5585 = vmatprep.subr.bf16.mxu0 %v9255_v14  ;;  %v5714_v21 = vpop.permute.xlu1 %5713 }
 0x437   : > { %5586 = vmatpush2.bf16.msra.mxu0 %v9256_v33 }
 0x438   : > { %5587 = vmatprep.subr.bf16.mxu0 %v9257_v59  ;;  %v5724_v63 = vpop.permute.xlu1 %5723 }
 0x43b   : > { %5588 = vmatpush2.bf16.msra.mxu0 %v9258_v23 }
 0x43c   : > { %5589 = vmatprep.subr.bf16.mxu0 %v9259_v56 }
 0x43f   : > { %5590 = vmatpush2.bf16.msra.mxu0 %v9260_v55  ;;  %v5734_v55 = vpop.permute.xlu1 %5733 }
 0x440   : > { %5591 = vmatprep.subr.bf16.mxu0 %v9261_v51 }
 0x443   : > { %5592 = vmatpush2.bf16.msra.mxu0 %v9262_v12 }
 0x446   : > { %5594 = vmatmul.mubr.bf16.vlgmr.msra.gmra.mxu0 %v6662_v11 }
 0x447   : > { %5603 = vmatprep.mubr.bf16.mxu0 %v6667_v19 }
 0x44e   : > { %5604 = vmatmul.mubr.bf16.gmra.mxu0 %v6665_v41 }
 0x44f   : > { %5613 = vmatprep.mubr.bf16.mxu0 %v6670_v45 }
 0x456   : > { %5614 = vmatmul.mubr.bf16.gmra.mxu0 %v6668_v32 }
 0x457   : > { %5623 = vmatprep.mubr.bf16.mxu0 %v6673_v62 }
 0x45e   : > { %5624 = vmatmul.mubr.bf16.gmra.mxu0 %v6671_v46  ;;  %v5739_v46 = vpop.permute.xlu0 %5738 }
 0x506   : > { %v5595_v27 = vpop.f32.mrf.mxu0 }
 0x507   : > { %v5682_v50 = vmul.f32 %v5645_v17, %v5595_v27 }
 0x508   : > { %v5597_v9 = vpop.f32.mrf.mxu0 }
 0x509   : > { %v5746_v4 = vadd.f32 %v5709_v24, %v5682_v50  ;;  %v5683_v49 = vmul.f32 %v5645_v17, %v5597_v9 }
 0x50a   : > { %v5599_v40 = vpop.f32.mrf.mxu0 }
 0x50b   : > { %v5762_v1 = vmax.f32 %v5746_v4, 0.0  ;;  %v5747_v36 = vadd.f32 %v5709_v24, %v5683_v49  ;;  %v5684_v58 = vmul.f32 %v5650_v22, %v5599_v40  ;;  %v5744_v24 = vpop.permute.xlu1 %5743 }
 0x50c   : > { %v5601_v34 = vpop.f32.mrf.mxu0 }
 0x50d   : > { %5778 = vst [vmem:[%s8956_s25] sm:$0xff] %v5762_v1  ;;  %v5763_v2 = vmax.f32 %v5747_v36, 0.0  ;;  %v5748_v48 = vadd.f32 %v5714_v21, %v5684_v58  ;;  %v5685_v3 = vmul.f32 %v5650_v22, %v5601_v34 }
 0x50e   : > { %v5605_v35 = vpop.f32.mrf.mxu0 }
 0x50f   : > { %5779 = vst [vmem:[%s8956_s25 + $0x8] sm:$0xff] %v5763_v2  ;;  %v5764_v18 = vmax.f32 %v5748_v48, 0.0  ;;  %v5749_v0 = vadd.f32 %v5714_v21, %v5685_v3  ;;  %v5686_v28 = vmul.f32 %v5655_v31, %v5605_v35 }
 0x510   : > { %v5607_v29 = vpop.f32.mrf.mxu0 }
 0x511   : > { %5780 = vst [vmem:[%s8956_s25 + $0x10] sm:$0xff] %v5764_v18  ;;  %v5765_v44 = vmax.f32 %v5749_v0, 0.0  ;;  %v5750_v57 = vadd.f32 %v5719_v25, %v5686_v28  ;;  %v5687_v5 = vmul.f32 %v5655_v31, %v5607_v29 }
 0x512   : > { %v5609_v60 = vpop.f32.mrf.mxu0 }
 0x513   : > { %5781 = vst [vmem:[%s8956_s25 + $0x18] sm:$0xff] %v5765_v44  ;;  %v5766_v61 = vmax.f32 %v5750_v57, 0.0  ;;  %v5751_v37 = vadd.f32 %v5719_v25, %v5687_v5  ;;  %v5688_v54 = vmul.f32 %v5660_v6, %v5609_v60 }
 0x514   : > { %v5611_v52 = vpop.f32.mrf.mxu0 }
 0x515   : > { %5782 = vst [vmem:[%s8956_s25 + $0x20] sm:$0xff] %v5766_v61  ;;  %v5767_v16 = vmax.f32 %v5751_v37, 0.0  ;;  %v5752_v53 = vadd.f32 %v5724_v63, %v5688_v54  ;;  %v5689_v7 = vmul.f32 %v5660_v6, %v5611_v52 }
 0x516   : > { %v5615_v26 = vpop.f32.mrf.mxu0 }
 0x517   : > { %5783 = vst [vmem:[%s8956_s25 + $0x28] sm:$0xff] %v5767_v16  ;;  %v5768_v39 = vmax.f32 %v5752_v53, 0.0  ;;  %v5753_v42 = vadd.f32 %v5724_v63, %v5689_v7  ;;  %v5690_v15 = vmul.f32 %v5665_v10, %v5615_v26 }
 0x518   : > { %v5617_v30 = vpop.f32.mrf.mxu0 }
 0x519   : > { %5784 = vst [vmem:[%s8956_s25 + $0x30] sm:$0xff] %v5768_v39  ;;  %v5769_v43 = vmax.f32 %v5753_v42, 0.0  ;;  %v5754_v8 = vadd.f32 %v5729_v20, %v5690_v15  ;;  %v5691_v14 = vmul.f32 %v5665_v10, %v5617_v30 }
 0x51a   : > { %v5619_v33 = vpop.f32.mrf.mxu0 }
 0x51b   : > { %5785 = vst [vmem:[%s8956_s25 + $0x38] sm:$0xff] %v5769_v43  ;;  %v5770_v59 = vmax.f32 %v5754_v8, 0.0  ;;  %v5755_v23 = vadd.f32 %v5729_v20, %v5691_v14  ;;  %v5692_v56 = vmul.f32 %v8947_v38, %v5619_v33 }
 0x51c   : > { %v5621_v51 = vpop.f32.mrf.mxu0 }
 0x51d   : > { %5786 = vst [vmem:[%s8956_s25 + $0x40] sm:$0xff] %v5770_v59  ;;  %v5771_v11 = vmax.f32 %v5755_v23, 0.0  ;;  %v5756_v12 = vadd.f32 %v5734_v55, %v5692_v56  ;;  %v5693_v19 = vmul.f32 %v8947_v38, %v5621_v51 }
 0x51e   : > { %v5625_v41 = vpop.f32.mrf.mxu0 }
 0x51f   : > { %5787 = vst [vmem:[%s8956_s25 + $0x48] sm:$0xff] %v5771_v11  ;;  %v5772_v45 = vmax.f32 %v5756_v12, 0.0  ;;  %v5757_v32 = vadd.f32 %v5734_v55, %v5693_v19  ;;  %v5694_v62 = vmul.f32 %v8949_v47, %v5625_v41 }
 0x520   : > { %v5627_v17 = vpop.f32.mrf.mxu0 }
 0x521   : > { %5788 = vst [vmem:[%s8956_s25 + $0x50] sm:$0xff] %v5772_v45  ;;  %v5773_v22 = vmax.f32 %v5757_v32, 0.0  ;;  %v5758_v31 = vadd.f32 %v5739_v46, %v5694_v62  ;;  %v5695_v6 = vmul.f32 %v8949_v47, %v5627_v17 }
 0x522   : > { %v5629_v10 = vpop.f32.mrf.mxu0 }
 0x523   : > { %5789 = vst [vmem:[%s8956_s25 + $0x58] sm:$0xff] %v5773_v22  ;;  %v5774_v38 = vmax.f32 %v5758_v31, 0.0  ;;  %v5759_v27 = vadd.f32 %v5739_v46, %v5695_v6  ;;  %v5696_v50 = vmul.f32 %v8952_v13, %v5629_v10 }
 0x524   : > { %v5631_v9 = vpop.f32.mrf.mxu0 }
 0x525   : > { %5790 = vst [vmem:[%s8956_s25 + $0x60] sm:$0xff] %v5774_v38  ;;  %v5775_v4 = vmax.f32 %v5759_v27, 0.0  ;;  %v5760_v49 = vadd.f32 %v5744_v24, %v5696_v50  ;;  %v5697_v40 = vmul.f32 %v8952_v13, %v5631_v9 }
 0x527   : > { %5791 = vst [vmem:[%s8956_s25 + $0x68] sm:$0xff] %v5775_v4  ;;  %v5776_v47 = vmax.f32 %v5760_v49, 0.0  ;;  %v5761_v1 = vadd.f32 %v5744_v24, %v5697_v40 }
 0x529   : > { %5792 = vst [vmem:[%s8956_s25 + $0x70] sm:$0xff] %v5776_v47  ;;  %v5777_v36 = vmax.f32 %v5761_v1, 0.0 }
 0x52b   : > { %5793 = vst [vmem:[%s8956_s25 + $0x78] sm:$0xff] %v5777_v36 }
 0x52c   : > { %6693 = shalt.err (!%p6690_p5)
}
 0x52d   : > { %s6694_s27 = scalar_lea.hbm %s8983_s29, 2048  ;;  %s6698_s30 = scalar_lea.hbm %s9052_s16, 4096 }
 0x52e   : > { %p6695_p6 = scmp.ne.s32.totalorder %s8983_s29, %s6694_s27  ;;  %p6699_p10 = scmp.lt.s32.totalorder %s8983_s29, %s9052_s16 }
 0x52f   : > { %p6700_p11 = scmp.lt.s32.totalorder %s6698_s30, %s6694_s27 }
 0x530   : > { %p6696_p7 = pnand %p6695_p6, %p6921_p4 }
 0x531   : > { %p6701_p12 = por %p6700_p11, %p6699_p10 }
 0x532   : > { %p6697_p9 = pneg %p6696_p7 }
 0x534   : > { %p6702_p13 = pnand %p6701_p12, %p6697_p9 }
 0x536   : > { %6705 = shalt.err (!%p6702_p13)
}
 0x537   : > { %s6794_s24 = smov 256   ;;  %s6795_s17 = smov 16  }
 0x538   : > { %6441 = dma.vmem_to_hbm [thread:$0]  (%p6921_p4), %s8985_s20, 2048, %s8983_s29, %s8991_s19, %s6794_s24, %s6794_s24, %s6795_s17  }
 0x539 PF: > { %p6447_p0 = scmp.ge.s32.totalorder %s6756_s26, 2  ;;  %s5825_s1 = sand.u32 1, %s6736_s21  }
 0x53a   : > { %s5826_s2 = scalar_lea.sflag [#allocation3], %s5825_s1 }
 0x53b   : > { %p6444_p1 = pnand %p6447_p0, %p6928_p8 }
 0x53d   : > { %p6445_p2 = pneg %p6444_p1 }
 0x53f   : > { %6731 = dma.done.wait (%p6445_p2), %s5826_s2, 2048  }
 0x540   : > { %6733 = vsyncadd (%p6445_p2), %s5826_s2, 4294965248  ;;  %s29_s26 = sadd.s32 1, %s6756_s26   ;;  %s9263_s3 = sld [smem:[#allocation7_spill]] }
 0x541   : > { %p26_p3 = scmp.ge.s32.totalorder %s29_s26, 4   ;;  %s9264_s24 = sld [smem:[#allocation5_spill]] }
 0x542   : > { %s9265_s25 = sld [smem:[#allocation6_spill]]  ;;  %s9266_s21 = smov %s6740_s22 }
 0x543   : > { %s9267_s22 = smov %s6744_s23  ;;  %28 = sbr.rel (!%p26_p3) target bundleno = 9 (0x9), region = 146 }
 0x546   : > { %s9268_s23 = smov %s9263_s3 }
 0x548   :  { %5831 = vsyncpa [#allocation3], 1 }
 0x549   :  { %5833 = vsyncpa [#allocation3 + $0x1], 1 }

</bundles_post_ra>
